<compile_context>
chip_gen: v5e
topology: v5e:2x2
jax: 0.10.0
libtpu: 0.0.40
codegen_flags: <defaults>
</compile_context>

<pallas_src>
import numpy as np
import jax
import jax.numpy as jnp
from jax.experimental import pallas as pl
from jax.experimental.pallas import tpu as pltpu

EPS = 1e-5  # BatchNorm eps

# conv1 geometry: input (freq=267, time=9), kernel (25, 3), no padding.
KH, KW = 25, 3
H_IN, W_IN = 267, 9
H_CONV, W_CONV = H_IN - KH + 1, W_IN - KW + 1      # 243, 7
PH, PW = 6, 3                                      # max-pool kernel == stride
HP, WP = H_CONV // PH, W_CONV // PW                # 40, 2 (floor mode)
NPOOL = HP * WP                                    # 80 pooled positions / sample
NWIN = PH * PW                                     # 18 positions per pool window
K_RAW = KH * KW                                    # 75 patch features (C_in = 1)
K_PAD = 80                                         # K zero-padded (16-multiple)
C_OUT = 32
FC1_IN = C_OUT * NPOOL                             # 2560
FC1_OUT = 256


# ---------------------------------------------------------------------------
# Pallas kernels
# ---------------------------------------------------------------------------
def _conv_bn_relu_pool_kernel(p_ref, w_ref, b_ref, o_ref):
    """(N*18*80, 80) bf16 patches @ (80, 32) bf16 folded conv weights (f32
    accumulate), then the (6,3) max-pool as a depth-5 tree of maxima over
    8-aligned (N*80)-row slabs, plus bias/BN-shift + ReLU (f32 epilogue)."""
    rows = p_ref.shape[0] // NWIN                       # N * NPOOL (static)
    y = jnp.dot(p_ref[...], w_ref[...], preferred_element_type=jnp.float32)
    vals = [y[s * rows:(s + 1) * rows, :] for s in range(NWIN)]
    while len(vals) > 1:                                # pairwise tree max
        nxt = [jnp.maximum(vals[i], vals[i + 1])
               for i in range(0, len(vals) - 1, 2)]
        if len(vals) % 2:
            nxt.append(vals[-1])
        vals = nxt
    # bias + ReLU commute with the max-pool (constant per channel); only the
    # 32 real channels are stored, in (n, pos, chan) order, so the host-side
    # reshape to (N, 2560) is free and matches the permuted fc1 weights.
    o_ref[...] = jnp.maximum(vals[0] + b_ref[...], 0.0)


def _fc_head_kernel(z_ref, w1_ref, b1_ref, w2_ref, b2_ref, o_ref):
    """sigmoid(fc2(relu(fc1(z)))); fc1 on the MXU in bf16 with f32 accumulate,
    fc2 as a VPU multiply + lane reduction (no lane-width-1 MXU matmul)."""
    z = z_ref[...].astype(jnp.bfloat16)
    h = jnp.dot(z, w1_ref[...], preferred_element_type=jnp.float32)
    h = jnp.maximum(h + b1_ref[...], 0.0)
    logit = jnp.sum(h * w2_ref[...], axis=-1, keepdims=True) + b2_ref[...]
    o_ref[...] = 1.0 / (1.0 + jnp.exp(-logit))


# ---------------------------------------------------------------------------
# Pallas wrappers (gridless, whole-array VMEM residency)
# ---------------------------------------------------------------------------
def _vmem():
    return pl.BlockSpec(memory_space=pltpu.MemorySpace.VMEM)


def conv_bn_relu_pool(patches, w_conv, b_conv):
    n = patches.shape[0] // (NWIN * NPOOL)
    return pl.pallas_call(
        _conv_bn_relu_pool_kernel,
        out_shape=jax.ShapeDtypeStruct((n * NPOOL, C_OUT), jnp.float32),
        in_specs=[_vmem(), _vmem(), _vmem()],
        out_specs=_vmem(),
    )(patches, w_conv, b_conv)


def fc_head(z, w1, b1, w2, b2):
    n = z.shape[0]
    return pl.pallas_call(
        _fc_head_kernel,
        out_shape=jax.ShapeDtypeStruct((n, 1), jnp.float32),
        in_specs=[_vmem() for _ in range(5)],
        out_specs=_vmem(),
    )(z, w1, b1, w2, b2)


# ---------------------------------------------------------------------------
# Host-side glue: tiny static slices of the 19 KB input (plain XLA, in bf16)
# ---------------------------------------------------------------------------
def _build_patches(x2):
    """x2: (N, 267, 9) -> (N*18*80, 80) bf16 im2col patches with rows ordered
    (dh, dw, n, hp, wp) and cols (kh, kw), restricted to the conv outputs that
    survive floor-mode (6,3) pooling; K zero-padded 75 -> 80."""
    n = x2.shape[0]
    x2 = x2.astype(jnp.bfloat16)                       # halve relayout traffic
    cols = [x2[:, i:i + HP * PH, j:j + WP * PW]        # (N, 240, 6)
            for i in range(KH) for j in range(KW)]
    p = jnp.stack(cols, axis=-1)                       # (N, 240, 6, 75)
    p = p.reshape(n, HP, PH, WP, PW, K_RAW)            # (n, hp, dh, wp, dw, k)
    p = p.transpose(2, 4, 0, 1, 3, 5)                  # (dh, dw, n, hp, wp, k)
    p = p.reshape(NWIN * n * NPOOL, K_RAW)
    return jnp.pad(p, ((0, 0), (0, K_PAD - K_RAW)))


# ---------------------------------------------------------------------------
# Parameters: PyTorch-default-style init, BN folded + weights pre-packed once
# ---------------------------------------------------------------------------
def init_params(key):
    ks = jax.random.split(key, 6)

    cb = 1.0 / np.sqrt(1 * KH * KW)
    conv_w = jax.random.uniform(ks[0], (C_OUT, 1, KH, KW), jnp.float32, -cb, cb)
    conv_b = jax.random.uniform(ks[1], (C_OUT,), jnp.float32, -cb, cb)
    fb1 = 1.0 / np.sqrt(FC1_IN)
    fc1_w = jax.random.uniform(ks[2], (FC1_OUT, FC1_IN), jnp.float32, -fb1, fb1)
    fc1_b = jax.random.uniform(ks[3], (FC1_OUT,), jnp.float32, -fb1, fb1)
    fb2 = 1.0 / np.sqrt(FC1_OUT)
    fc2_w = jax.random.uniform(ks[4], (1, FC1_OUT), jnp.float32, -fb2, fb2)
    fc2_b = jax.random.uniform(ks[5], (1,), jnp.float32, -fb2, fb2)

    # Fold eval-mode BatchNorm (gamma=1, beta=0, mean=0, var=1) into conv1:
    # w' = w * scale, b' = b * scale + shift.
    bn_scale = jnp.full((C_OUT,), 1.0 / np.sqrt(1.0 + EPS), jnp.float32)
    bn_shift = jnp.zeros((C_OUT,), jnp.float32)
    wf = conv_w * bn_scale[:, None, None, None]
    bf = conv_b * bn_scale + bn_shift

    # Conv weight pre-packed as a (K_PAD, C_OUT) GEMM matrix, stored bf16.
    w_conv = jnp.zeros((K_PAD, C_OUT), jnp.float32)
    w_conv = w_conv.at[:K_RAW, :].set(wf.reshape(C_OUT, K_RAW).T)
    b_conv = bf.reshape(1, C_OUT)

    # fc1 weights permuted ONCE to the pooled slab's natural (pos, chan) row
    # order: w1[p*32 + c, :] = fc1_w.T[c*80 + p, :].  Stored bf16 (dominant
    # HBM stream halved); fc1 accumulates in f32 on the MXU.
    w1 = fc1_w.reshape(FC1_OUT, C_OUT, NPOOL).transpose(2, 1, 0)
    w1 = w1.reshape(FC1_IN, FC1_OUT)

    return {
        "w_conv": w_conv.astype(jnp.bfloat16),
        "b_conv": b_conv,
        "w1": w1.astype(jnp.bfloat16),
        "b1": fc1_b.reshape(1, FC1_OUT),
        "w2": fc2_w,                           # (1, 256) row for the VPU fc2
        "b2": fc2_b.reshape(1, 1),
    }


# ---------------------------------------------------------------------------
# Forward (mirrors onsetconv1.forward, eval semantics)
# ---------------------------------------------------------------------------
@jax.jit
def forward(params, x_nchw):
    n = x_nchw.shape[0]
    x2 = x_nchw[:, 0, :, :]                              # (N, 267, 9), C_in = 1
    patches = _build_patches(x2)                         # (N*1440, 80) bf16

    pooled = conv_bn_relu_pool(patches, params["w_conv"], params["b_conv"])
    # (N*80, 32) rows are already (n, pos, chan) -> free, contiguous reshape
    # that matches the permuted fc1 weight rows (no XLA transpose launch).
    z = pooled.reshape(n, FC1_IN)                        # (N, 2560)

    # TODO(synk): F.dropout (stochastic, training=True by default in the
    # functional API) is treated as identity (deterministic / eval semantics).
    return fc_head(z, params["w1"], params["b1"], params["w2"], params["b2"])


if __name__ == "__main__":
    key = jax.random.PRNGKey(0)
    pk, xk = jax.random.split(key)
    params = init_params(pk)

    # Input (N=2, C=1, freq=267, time=9): conv(25,3) -> (243,7); pool(6,3) ->
    # (40,2); 32*40*2 = 2560 matches nn.Linear(2560, 256).
    x = jax.random.normal(xk, (2, 1, H_IN, W_IN), jnp.float32)

    out = forward(params, x)
    out = jax.block_until_ready(out)
    assert out.shape == (2, 1)
    assert bool(jnp.all((out >= 0.0) & (out <= 1.0)))
    print("KERNEL_OK")
</pallas_src>

<mosaic_0001>
module attributes {stable_mosaic.version = 11 : i64} {
  func.func @_conv_bn_relu_pool_kernel(%arg0: memref<2880x80xbf16, #tpu.memory_space<vmem>>, %arg1: memref<80x32xbf16, #tpu.memory_space<vmem>>, %arg2: memref<1x32xf32, #tpu.memory_space<vmem>>, %arg3: memref<160x32xf32, #tpu.memory_space<vmem>>) attributes {dimension_semantics = [], scalar_prefetch = 0 : i64, scratch_operands = 0 : i64, tpu.core_type = #tpu.core_type<tc>} {
    %c0 = arith.constant 0 : index
    %c0_0 = arith.constant 0 : index
    %0 = vector.load %arg0[%c0, %c0_0] : memref<2880x80xbf16, #tpu.memory_space<vmem>>, vector<2880x80xbf16>
    %c0_1 = arith.constant 0 : index
    %c0_2 = arith.constant 0 : index
    %1 = vector.load %arg1[%c0_1, %c0_2] : memref<80x32xbf16, #tpu.memory_space<vmem>>, vector<80x32xbf16>
    %cst = arith.constant dense<0.000000e+00> : vector<2880x32xf32>
    %2 = tpu.matmul %0, %1, %cst {dimension_numbers = #tpu.dot_dimension_numbers<[1], [0], [0], [1], [0, 0, 1, 1], [], []>} : vector<2880x80xbf16>, vector<80x32xbf16>, vector<2880x32xf32> -> vector<2880x32xf32>
    %3 = vector.extract_strided_slice %2 {offsets = [0, 0], sizes = [160, 32], strides = [1, 1]} : vector<2880x32xf32> to vector<160x32xf32>
    %4 = vector.extract_strided_slice %2 {offsets = [160, 0], sizes = [160, 32], strides = [1, 1]} : vector<2880x32xf32> to vector<160x32xf32>
    %5 = vector.extract_strided_slice %2 {offsets = [320, 0], sizes = [160, 32], strides = [1, 1]} : vector<2880x32xf32> to vector<160x32xf32>
    %6 = vector.extract_strided_slice %2 {offsets = [480, 0], sizes = [160, 32], strides = [1, 1]} : vector<2880x32xf32> to vector<160x32xf32>
    %7 = vector.extract_strided_slice %2 {offsets = [640, 0], sizes = [160, 32], strides = [1, 1]} : vector<2880x32xf32> to vector<160x32xf32>
    %8 = vector.extract_strided_slice %2 {offsets = [800, 0], sizes = [160, 32], strides = [1, 1]} : vector<2880x32xf32> to vector<160x32xf32>
    %9 = vector.extract_strided_slice %2 {offsets = [960, 0], sizes = [160, 32], strides = [1, 1]} : vector<2880x32xf32> to vector<160x32xf32>
    %10 = vector.extract_strided_slice %2 {offsets = [1120, 0], sizes = [160, 32], strides = [1, 1]} : vector<2880x32xf32> to vector<160x32xf32>
    %11 = vector.extract_strided_slice %2 {offsets = [1280, 0], sizes = [160, 32], strides = [1, 1]} : vector<2880x32xf32> to vector<160x32xf32>
    %12 = vector.extract_strided_slice %2 {offsets = [1440, 0], sizes = [160, 32], strides = [1, 1]} : vector<2880x32xf32> to vector<160x32xf32>
    %13 = vector.extract_strided_slice %2 {offsets = [1600, 0], sizes = [160, 32], strides = [1, 1]} : vector<2880x32xf32> to vector<160x32xf32>
    %14 = vector.extract_strided_slice %2 {offsets = [1760, 0], sizes = [160, 32], strides = [1, 1]} : vector<2880x32xf32> to vector<160x32xf32>
    %15 = vector.extract_strided_slice %2 {offsets = [1920, 0], sizes = [160, 32], strides = [1, 1]} : vector<2880x32xf32> to vector<160x32xf32>
    %16 = vector.extract_strided_slice %2 {offsets = [2080, 0], sizes = [160, 32], strides = [1, 1]} : vector<2880x32xf32> to vector<160x32xf32>
    %17 = vector.extract_strided_slice %2 {offsets = [2240, 0], sizes = [160, 32], strides = [1, 1]} : vector<2880x32xf32> to vector<160x32xf32>
    %18 = vector.extract_strided_slice %2 {offsets = [2400, 0], sizes = [160, 32], strides = [1, 1]} : vector<2880x32xf32> to vector<160x32xf32>
    %19 = vector.extract_strided_slice %2 {offsets = [2560, 0], sizes = [160, 32], strides = [1, 1]} : vector<2880x32xf32> to vector<160x32xf32>
    %20 = vector.extract_strided_slice %2 {offsets = [2720, 0], sizes = [160, 32], strides = [1, 1]} : vector<2880x32xf32> to vector<160x32xf32>
    %21 = arith.maximumf %3, %4 : vector<160x32xf32>
    %22 = arith.maximumf %5, %6 : vector<160x32xf32>
    %23 = arith.maximumf %7, %8 : vector<160x32xf32>
    %24 = arith.maximumf %9, %10 : vector<160x32xf32>
    %25 = arith.maximumf %11, %12 : vector<160x32xf32>
    %26 = arith.maximumf %13, %14 : vector<160x32xf32>
    %27 = arith.maximumf %15, %16 : vector<160x32xf32>
    %28 = arith.maximumf %17, %18 : vector<160x32xf32>
    %29 = arith.maximumf %19, %20 : vector<160x32xf32>
    %30 = arith.maximumf %21, %22 : vector<160x32xf32>
    %31 = arith.maximumf %23, %24 : vector<160x32xf32>
    %32 = arith.maximumf %25, %26 : vector<160x32xf32>
    %33 = arith.maximumf %27, %28 : vector<160x32xf32>
    %34 = arith.maximumf %30, %31 : vector<160x32xf32>
    %35 = arith.maximumf %32, %33 : vector<160x32xf32>
    %36 = arith.maximumf %34, %35 : vector<160x32xf32>
    %37 = arith.maximumf %36, %29 : vector<160x32xf32>
    %c0_3 = arith.constant 0 : index
    %c0_4 = arith.constant 0 : index
    %38 = vector.load %arg2[%c0_3, %c0_4] : memref<1x32xf32, #tpu.memory_space<vmem>>, vector<1x32xf32>
    %39 = vector.broadcast %38 : vector<1x32xf32> to vector<160x32xf32>
    %40 = arith.addf %37, %39 : vector<160x32xf32>
    %cst_5 = arith.constant 0.000000e+00 : f32
    %41 = vector.broadcast %cst_5 : f32 to vector<160x32xf32>
    %42 = arith.maximumf %40, %41 : vector<160x32xf32>
    %c0_6 = arith.constant 0 : index
    %c0_7 = arith.constant 0 : index
    %43 = vector.load %arg3[%c0_6, %c0_7] : memref<160x32xf32, #tpu.memory_space<vmem>>, vector<160x32xf32>
    tpu.vector_store %arg3[%c0_6, %c0_7], %42 {strides = array<i32>} : memref<160x32xf32, #tpu.memory_space<vmem>>, vector<160x32xf32>,
    return
  }
}

module attributes {stable_mosaic.version = 11 : i64} {
  func.func @_fc_head_kernel(%arg0: memref<2x2560xf32, #tpu.memory_space<vmem>>, %arg1: memref<2560x256xbf16, #tpu.memory_space<vmem>>, %arg2: memref<1x256xf32, #tpu.memory_space<vmem>>, %arg3: memref<1x256xf32, #tpu.memory_space<vmem>>, %arg4: memref<1x1xf32, #tpu.memory_space<vmem>>, %arg5: memref<2x1xf32, #tpu.memory_space<vmem>>) attributes {dimension_semantics = [], scalar_prefetch = 0 : i64, scratch_operands = 0 : i64, tpu.core_type = #tpu.core_type<tc>} {
    %c0 = arith.constant 0 : index
    %c0_0 = arith.constant 0 : index
    %0 = vector.load %arg0[%c0, %c0_0] : memref<2x2560xf32, #tpu.memory_space<vmem>>, vector<2x2560xf32>
    %1 = arith.truncf %0 : vector<2x2560xf32> to vector<2x2560xbf16>
    %c0_1 = arith.constant 0 : index
    %c0_2 = arith.constant 0 : index
    %2 = vector.load %arg1[%c0_1, %c0_2] : memref<2560x256xbf16, #tpu.memory_space<vmem>>, vector<2560x256xbf16>
    %cst = arith.constant dense<0.000000e+00> : vector<2x256xf32>
    %3 = tpu.matmul %1, %2, %cst {dimension_numbers = #tpu.dot_dimension_numbers<[1], [0], [0], [1], [0, 0, 1, 1], [], []>} : vector<2x2560xbf16>, vector<2560x256xbf16>, vector<2x256xf32> -> vector<2x256xf32>
    %c0_3 = arith.constant 0 : index
    %c0_4 = arith.constant 0 : index
    %4 = vector.load %arg2[%c0_3, %c0_4] : memref<1x256xf32, #tpu.memory_space<vmem>>, vector<1x256xf32>
    %5 = vector.broadcast %4 : vector<1x256xf32> to vector<2x256xf32>
    %6 = arith.addf %3, %5 : vector<2x256xf32>
    %cst_5 = arith.constant 0.000000e+00 : f32
    %7 = vector.broadcast %cst_5 : f32 to vector<2x256xf32>
    %8 = arith.maximumf %6, %7 : vector<2x256xf32>
    %c0_6 = arith.constant 0 : index
    %c0_7 = arith.constant 0 : index
    %9 = vector.load %arg3[%c0_6, %c0_7] : memref<1x256xf32, #tpu.memory_space<vmem>>, vector<1x256xf32>
    %10 = vector.broadcast %9 : vector<1x256xf32> to vector<2x256xf32>
    %11 = arith.mulf %8, %10 : vector<2x256xf32>
    %cst_8 = arith.constant dense<0.000000e+00> : vector<2xf32>
    %12 = vector.multi_reduction <add>, %11, %cst_8 [1] : vector<2x256xf32> to vector<2xf32>
    %13 = vector.shape_cast %12 : vector<2xf32> to vector<2x1xf32>
    %c0_9 = arith.constant 0 : index
    %c0_10 = arith.constant 0 : index
    %14 = vector.load %arg4[%c0_9, %c0_10] : memref<1x1xf32, #tpu.memory_space<vmem>>, vector<1x1xf32>
    %15 = vector.broadcast %14 : vector<1x1xf32> to vector<2x1xf32>
    %16 = arith.addf %13, %15 : vector<2x1xf32>
    %cst_11 = arith.constant 0.000000e+00 : f32
    %17 = vector.broadcast %cst_11 : f32 to vector<2x1xf32>
    %18 = arith.subf %17, %16 : vector<2x1xf32>
    %19 = math.exp %18 : vector<2x1xf32>
    %cst_12 = arith.constant 1.000000e+00 : f32
    %20 = vector.broadcast %cst_12 : f32 to vector<2x1xf32>
    %21 = arith.addf %20, %19 : vector<2x1xf32>
    %cst_13 = arith.constant 1.000000e+00 : f32
    %22 = vector.broadcast %cst_13 : f32 to vector<2x1xf32>
    %23 = arith.divf %22, %21 : vector<2x1xf32>
    %c0_14 = arith.constant 0 : index
    %c0_15 = arith.constant 0 : index
    %24 = vector.load %arg5[%c0_14, %c0_15] : memref<2x1xf32, #tpu.memory_space<vmem>>, vector<2x1xf32>
    tpu.vector_store %arg5[%c0_14, %c0_15], %23 {strides = array<i32>} : memref<2x1xf32, #tpu.memory_space<vmem>>, vector<2x1xf32>,
    return
  }
}

</mosaic_0001>

<bundles_post_ra>
// kernel: forward.2
= control target key start
LH: loop header
LB: loop body
LE: loop exit
PB: predicated region body
PF: predicated region fallthrough
CT: control target
= control target key end

     0   :  { %vm1315_vm0 = vcmask 654336   ;;  %vm3149_vm1 = vcmask 261120   ;;  %s6595_s1 = inlined_call_operand.vmem [shape: bf16[80,32], index: 1, kind: input, shape index: {}]   ;;  %s6596_s0 = inlined_call_operand.vmem [shape: bf16[2880,80], index: 0, kind: input, shape index: {}]   ;;  %s6597_s2 = inlined_call_operand.vmem [shape: f32[1,32], index: 2, kind: input, shape index: {}]   ;;  %s6598_s3 = inlined_call_operand.vmem [shape: f32[160,32], index: 3, kind: output, shape index: {}]  }
   0x1   :  { %v4278_v0 = vld [vmem:[%s6595_s1 + $0x20] sm:$0xff]  ;;  %v4277_v1 = vld [vmem:[%s6595_s1 + $0x18] sm:$0xff]  ;;  %v4276_v2 = vld [vmem:[%s6595_s1 + $0x10] sm:$0xff] }
   0x2   :  { %1859 = vmatpush.bf16.msra.mxu0 %v4278_v0  ;;  %4279 = vmatpush.bf16.msra.mxu1 %v4278_v0  ;;  %v4275_v3 = vld [vmem:[%s6595_s1 + $0x8] sm:$0xff]  ;;  %v4274_v4 = vld [vmem:[%s6595_s1] sm:$0xff]  ;;  %v4184_v7 = vld [vmem:[%s6596_s0 + $0x2d0] sm:$0xff] }
   0x3   :  { %4280 = vmatpush.bf16.msra.mxu2 %v4278_v0  ;;  %4281 = vmatpush.bf16.msra.mxu3 %v4278_v0  ;;  %v4094_v5 = vld [vmem:[%s6596_s0] sm:$0xff]  ;;  %v4139_v6 = vld [vmem:[%s6596_s0 + $0x168] sm:$0xff]  ;;  %v4229_v8 = vld [vmem:[%s6596_s0 + $0x438] sm:$0xff] }
   0x4   :  { %v4095_v9 = vld [vmem:[%s6596_s0 + $0x8] sm:$0xff]  ;;  %v4140_v10 = vld [vmem:[%s6596_s0 + $0x170] sm:$0xff]  ;;  %v4185_v11 = vld [vmem:[%s6596_s0 + $0x2d8] sm:$0xff] }
   0x5   :  { %v4230_v12 = vld [vmem:[%s6596_s0 + $0x440] sm:$0xff]  ;;  %v4096_v13 = vld [vmem:[%s6596_s0 + $0x10] sm:$0xff]  ;;  %v4141_v14 = vld [vmem:[%s6596_s0 + $0x178] sm:$0xff] }
   0x6   :  { %1860 = vmatpush.bf16.msra.mxu0 %v4277_v1  ;;  %4282 = vmatpush.bf16.msra.mxu1 %v4277_v1  ;;  %v4186_v15 = vld [vmem:[%s6596_s0 + $0x2e0] sm:$0xff]  ;;  %v4231_v16 = vld [vmem:[%s6596_s0 + $0x448] sm:$0xff]  ;;  %v4097_v17 = vld [vmem:[%s6596_s0 + $0x18] sm:$0xff] }
   0x7   :  { %4283 = vmatpush.bf16.msra.mxu2 %v4277_v1  ;;  %4284 = vmatpush.bf16.msra.mxu3 %v4277_v1  ;;  %v4142_v18 = vld [vmem:[%s6596_s0 + $0x180] sm:$0xff]  ;;  %v4187_v19 = vld [vmem:[%s6596_s0 + $0x2e8] sm:$0xff]  ;;  %v4232_v20 = vld [vmem:[%s6596_s0 + $0x450] sm:$0xff] }
   0x8   :  { %v4098_v21 = vld [vmem:[%s6596_s0 + $0x20] sm:$0xff]  ;;  %v4143_v22 = vld [vmem:[%s6596_s0 + $0x188] sm:$0xff]  ;;  %v4188_v23 = vld [vmem:[%s6596_s0 + $0x2f0] sm:$0xff] }
   0x9   :  { %v4233_v24 = vld [vmem:[%s6596_s0 + $0x458] sm:$0xff]  ;;  %v4099_v25 = vld [vmem:[%s6596_s0 + $0x28] sm:$0xff]  ;;  %v4144_v26 = vld [vmem:[%s6596_s0 + $0x190] sm:$0xff] }
   0xa   :  { %1861 = vmatpush.bf16.msra.mxu0 %v4276_v2  ;;  %4285 = vmatpush.bf16.msra.mxu1 %v4276_v2  ;;  %v4189_v27 = vld [vmem:[%s6596_s0 + $0x2f8] sm:$0xff]  ;;  %v4234_v28 = vld [vmem:[%s6596_s0 + $0x460] sm:$0xff]  ;;  %v4100_v29 = vld [vmem:[%s6596_s0 + $0x30] sm:$0xff] }
   0xb   :  { %4286 = vmatpush.bf16.msra.mxu2 %v4276_v2  ;;  %4287 = vmatpush.bf16.msra.mxu3 %v4276_v2  ;;  %v4145_v30 = vld [vmem:[%s6596_s0 + $0x198] sm:$0xff]  ;;  %v4190_v31 = vld [vmem:[%s6596_s0 + $0x300] sm:$0xff]  ;;  %v4235_v32 = vld [vmem:[%s6596_s0 + $0x468] sm:$0xff] }
   0xc   :  { %v4101_v33 = vld [vmem:[%s6596_s0 + $0x38] sm:$0xff]  ;;  %v4146_v34 = vld [vmem:[%s6596_s0 + $0x1a0] sm:$0xff]  ;;  %v4191_v35 = vld [vmem:[%s6596_s0 + $0x308] sm:$0xff] }
   0xd   :  { %v4236_v36 = vld [vmem:[%s6596_s0 + $0x470] sm:$0xff]  ;;  %v4102_v37 = vld [vmem:[%s6596_s0 + $0x40] sm:$0xff]  ;;  %v4147_v38 = vld [vmem:[%s6596_s0 + $0x1a8] sm:$0xff] }
   0xe   :  { %1862 = vmatpush.bf16.msra.mxu0 %v4275_v3  ;;  %4288 = vmatpush.bf16.msra.mxu1 %v4275_v3  ;;  %v4192_v41 = vld [vmem:[%s6596_s0 + $0x310] sm:$0xff]  ;;  %v4237_v42 = vld [vmem:[%s6596_s0 + $0x478] sm:$0xff]  ;;  %v4103_v51 = vld [vmem:[%s6596_s0 + $0x48] sm:$0xff] }
   0xf   :  { %4289 = vmatpush.bf16.msra.mxu2 %v4275_v3  ;;  %4290 = vmatpush.bf16.msra.mxu3 %v4275_v3  ;;  %v4148_v52 = vld [vmem:[%s6596_s0 + $0x1b0] sm:$0xff]  ;;  %v4193_v57 = vld [vmem:[%s6596_s0 + $0x318] sm:$0xff]  ;;  %v4238_v58 = vld [vmem:[%s6596_s0 + $0x480] sm:$0xff] }
  0x10   :  { %v4104_v3 = vld [vmem:[%s6596_s0 + $0x50] sm:$0xff] }
  0x12   :  { %1863 = vmatpush.bf16.msra.mxu0 %v4274_v4  ;;  %4291 = vmatpush.bf16.msra.mxu1 %v4274_v4 }
  0x13   :  { %4292 = vmatpush.bf16.msra.mxu2 %v4274_v4  ;;  %4293 = vmatpush.bf16.msra.mxu3 %v4274_v4  ;;  %v4149_v4 = vld [vmem:[%s6596_s0 + $0x1b8] sm:$0xff] }
  0x15   :  { %3914 = vmatmul.msk.bf16.vlgmr.msra.gmra.mxu0 %vm1315_vm0, %v4094_v5  ;;  %3959 = vmatmul.msk.bf16.vlgmr.msra.gmra.mxu1 %vm1315_vm0, %v4139_v6 }
  0x16   :  { %4004 = vmatmul.msk.bf16.vlgmr.msra.gmra.mxu2 %vm1315_vm0, %v4184_v7  ;;  %4049 = vmatmul.msk.bf16.vlgmr.msra.gmra.mxu3 %vm1315_vm0, %v4229_v8 }
  0x25   :  { %3915 = vmatmul.msk.bf16.gmra.mxu0 %vm1315_vm0, %v4095_v9  ;;  %3960 = vmatmul.msk.bf16.gmra.mxu1 %vm1315_vm0, %v4140_v10  ;;  %v4194_v9 = vld [vmem:[%s6596_s0 + $0x320] sm:$0xff]  ;;  %v4239_v10 = vld [vmem:[%s6596_s0 + $0x488] sm:$0xff] }
  0x26   :  { %4005 = vmatmul.msk.bf16.gmra.mxu2 %vm1315_vm0, %v4185_v11  ;;  %4050 = vmatmul.msk.bf16.gmra.mxu3 %vm1315_vm0, %v4230_v12 }
  0x35   :  { %3916 = vmatmul.msk.bf16.gmra.mxu0 %vm1315_vm0, %v4096_v13  ;;  %3961 = vmatmul.msk.bf16.gmra.mxu1 %vm1315_vm0, %v4141_v14 }
  0x36   :  { %4006 = vmatmul.msk.bf16.gmra.mxu2 %vm1315_vm0, %v4186_v15  ;;  %4051 = vmatmul.msk.bf16.gmra.mxu3 %vm1315_vm0, %v4231_v16 }
  0x45   :  { %3917 = vmatmul.msk.bf16.gmra.mxu0 %vm1315_vm0, %v4097_v17  ;;  %3962 = vmatmul.msk.bf16.gmra.mxu1 %vm1315_vm0, %v4142_v18 }
  0x46   :  { %4007 = vmatmul.msk.bf16.gmra.mxu2 %vm1315_vm0, %v4187_v19  ;;  %4052 = vmatmul.msk.bf16.gmra.mxu3 %vm1315_vm0, %v4232_v20  ;;  %v4105_v19 = vld [vmem:[%s6596_s0 + $0x58] sm:$0xff]  ;;  %v4150_v20 = vld [vmem:[%s6596_s0 + $0x1c0] sm:$0xff] }
  0x55   :  { %3918 = vmatmul.msk.bf16.gmra.mxu0 %vm1315_vm0, %v4098_v21  ;;  %3963 = vmatmul.msk.bf16.gmra.mxu1 %vm1315_vm0, %v4143_v22 }
  0x56   :  { %4008 = vmatmul.msk.bf16.gmra.mxu2 %vm1315_vm0, %v4188_v23  ;;  %4053 = vmatmul.msk.bf16.gmra.mxu3 %vm1315_vm0, %v4233_v24 }
  0x65   :  { %3919 = vmatmul.msk.bf16.gmra.mxu0 %vm1315_vm0, %v4099_v25  ;;  %3964 = vmatmul.msk.bf16.gmra.mxu1 %vm1315_vm0, %v4144_v26  ;;  %v4195_v25 = vld [vmem:[%s6596_s0 + $0x328] sm:$0xff]  ;;  %v4240_v26 = vld [vmem:[%s6596_s0 + $0x490] sm:$0xff] }
  0x66   :  { %4009 = vmatmul.msk.bf16.gmra.mxu2 %vm1315_vm0, %v4189_v27  ;;  %4054 = vmatmul.msk.bf16.gmra.mxu3 %vm1315_vm0, %v4234_v28 }
  0x75   :  { %3920 = vmatmul.msk.bf16.gmra.mxu0 %vm1315_vm0, %v4100_v29  ;;  %3965 = vmatmul.msk.bf16.gmra.mxu1 %vm1315_vm0, %v4145_v30 }
  0x76   :  { %4010 = vmatmul.msk.bf16.gmra.mxu2 %vm1315_vm0, %v4190_v31  ;;  %4055 = vmatmul.msk.bf16.gmra.mxu3 %vm1315_vm0, %v4235_v32 }
  0x85   :  { %3921 = vmatmul.msk.bf16.gmra.mxu0 %vm1315_vm0, %v4101_v33  ;;  %3966 = vmatmul.msk.bf16.gmra.mxu1 %vm1315_vm0, %v4146_v34 }
  0x86   :  { %4011 = vmatmul.msk.bf16.gmra.mxu2 %vm1315_vm0, %v4191_v35  ;;  %4056 = vmatmul.msk.bf16.gmra.mxu3 %vm1315_vm0, %v4236_v36  ;;  %v4106_v35 = vld [vmem:[%s6596_s0 + $0x60] sm:$0xff]  ;;  %v4151_v36 = vld [vmem:[%s6596_s0 + $0x1c8] sm:$0xff] }
  0x92   :  { %v4464_v39 = vpop.f32.mrf.mxu0  ;;  %v4466_v40 = vpop.f32.mrf.mxu1 }
  0x95   :  { %3922 = vmatmul.msk.bf16.gmra.mxu0 %vm1315_vm0, %v4102_v37  ;;  %3967 = vmatmul.msk.bf16.gmra.mxu1 %vm1315_vm0, %v4147_v38 }
  0x96   :  { %4012 = vmatmul.msk.bf16.gmra.mxu2 %vm1315_vm0, %v4192_v41  ;;  %4057 = vmatmul.msk.bf16.gmra.mxu3 %vm1315_vm0, %v4237_v42 }
  0x99   :  { %v4478_v43 = vpop.f32.mrf.mxu2  ;;  %v4480_v44 = vpop.f32.mrf.mxu3 }
  0x9a   :  { %v2765_v45 = vmax.f32 %v4464_v39, %v4478_v43  ;;  %v2815_v46 = vmax.f32 %v4466_v40, %v4480_v44  ;;  %v4486_v47 = vpop.f32.mrf.mxu0  ;;  %v4488_v48 = vpop.f32.mrf.mxu1 }
  0xa1   :  { %v4490_v49 = vpop.f32.mrf.mxu2  ;;  %v4492_v50 = vpop.f32.mrf.mxu3 }
  0xa2   :  { %v2766_v53 = vmax.f32 %v4486_v47, %v4490_v49  ;;  %v2816_v54 = vmax.f32 %v4488_v48, %v4492_v50  ;;  %v4504_v55 = vpop.f32.mrf.mxu0  ;;  %v4506_v56 = vpop.f32.mrf.mxu1 }
  0xa5   :  { %3923 = vmatmul.msk.bf16.gmra.mxu0 %vm1315_vm0, %v4103_v51  ;;  %3968 = vmatmul.msk.bf16.gmra.mxu1 %vm1315_vm0, %v4148_v52  ;;  %v4196_v51 = vld [vmem:[%s6596_s0 + $0x330] sm:$0xff]  ;;  %v4241_v52 = vld [vmem:[%s6596_s0 + $0x498] sm:$0xff] }
  0xa6   :  { %4013 = vmatmul.msk.bf16.gmra.mxu2 %vm1315_vm0, %v4193_v57  ;;  %4058 = vmatmul.msk.bf16.gmra.mxu3 %vm1315_vm0, %v4238_v58 }
  0xa9   :  { %v4518_v59 = vpop.f32.mrf.mxu2  ;;  %v4520_v60 = vpop.f32.mrf.mxu3 }
  0xaa   :  { %v2767_v61 = vmax.f32 %v4504_v55, %v4518_v59  ;;  %v2817_v62 = vmax.f32 %v4506_v56, %v4520_v60  ;;  %v4526_v63 = vpop.f32.mrf.mxu0  ;;  %v4528_v0 = vpop.f32.mrf.mxu1 }
  0xb1   :  { %v4530_v1 = vpop.f32.mrf.mxu2  ;;  %v4532_v2 = vpop.f32.mrf.mxu3 }
  0xb2   :  { %v2768_v5 = vmax.f32 %v4526_v63, %v4530_v1  ;;  %v2818_v6 = vmax.f32 %v4528_v0, %v4532_v2  ;;  %v4544_v7 = vpop.f32.mrf.mxu0  ;;  %v4546_v8 = vpop.f32.mrf.mxu1 }
  0xb5   :  { %3924 = vmatmul.msk.bf16.gmra.mxu0 %vm1315_vm0, %v4104_v3  ;;  %3969 = vmatmul.msk.bf16.gmra.mxu1 %vm1315_vm0, %v4149_v4  ;;  %v4197_v3 = vld [vmem:[%s6596_s0 + $0x338] sm:$0xff]  ;;  %v4242_v4 = vld [vmem:[%s6596_s0 + $0x4a0] sm:$0xff] }
  0xb6   :  { %4014 = vmatmul.msk.bf16.gmra.mxu2 %vm1315_vm0, %v4194_v9  ;;  %4059 = vmatmul.msk.bf16.gmra.mxu3 %vm1315_vm0, %v4239_v10 }
  0xb9   :  { %v4558_v11 = vpop.f32.mrf.mxu2  ;;  %v4560_v12 = vpop.f32.mrf.mxu3 }
  0xba   :  { %v2769_v13 = vmax.f32 %v4544_v7, %v4558_v11  ;;  %v2819_v14 = vmax.f32 %v4546_v8, %v4560_v12  ;;  %v4566_v15 = vpop.f32.mrf.mxu0  ;;  %v4568_v16 = vpop.f32.mrf.mxu1 }
  0xc1   :  { %v4570_v17 = vpop.f32.mrf.mxu2  ;;  %v4572_v18 = vpop.f32.mrf.mxu3 }
  0xc2   :  { %v2770_v21 = vmax.f32 %v4566_v15, %v4570_v17  ;;  %v2820_v22 = vmax.f32 %v4568_v16, %v4572_v18  ;;  %v4584_v23 = vpop.f32.mrf.mxu0  ;;  %v4586_v24 = vpop.f32.mrf.mxu1 }
  0xc5   :  { %3925 = vmatmul.msk.bf16.gmra.mxu0 %vm1315_vm0, %v4105_v19  ;;  %3970 = vmatmul.msk.bf16.gmra.mxu1 %vm1315_vm0, %v4150_v20 }
  0xc6   :  { %4015 = vmatmul.msk.bf16.gmra.mxu2 %vm1315_vm0, %v4195_v25  ;;  %4060 = vmatmul.msk.bf16.gmra.mxu3 %vm1315_vm0, %v4240_v26  ;;  %v4107_v25 = vld [vmem:[%s6596_s0 + $0x68] sm:$0xff]  ;;  %v4152_v26 = vld [vmem:[%s6596_s0 + $0x1d0] sm:$0xff] }
  0xc9   :  { %v4598_v27 = vpop.f32.mrf.mxu2  ;;  %v4600_v28 = vpop.f32.mrf.mxu3 }
  0xca   :  { %v2771_v29 = vmax.f32 %v4584_v23, %v4598_v27  ;;  %v2821_v30 = vmax.f32 %v4586_v24, %v4600_v28  ;;  %v4606_v31 = vpop.f32.mrf.mxu0  ;;  %v4608_v32 = vpop.f32.mrf.mxu1 }
  0xd1   :  { %v4610_v33 = vpop.f32.mrf.mxu2  ;;  %v4612_v34 = vpop.f32.mrf.mxu3 }
  0xd2   :  { %v4624_v41 = vpop.f32.mrf.mxu0  ;;  %v4626_v42 = vpop.f32.mrf.mxu1 }
  0xd5   :  { %3926 = vmatmul.msk.bf16.gmra.mxu0 %vm1315_vm0, %v4106_v35  ;;  %3971 = vmatmul.msk.bf16.gmra.mxu1 %vm1315_vm0, %v4151_v36 }
  0xd6   :  { %4016 = vmatmul.msk.bf16.gmra.mxu2 %vm1315_vm0, %v4196_v51  ;;  %4061 = vmatmul.msk.bf16.gmra.mxu3 %vm1315_vm0, %v4241_v52 }
  0xd9   :  { %v4638_v57 = vpop.f32.mrf.mxu2  ;;  %v4640_v58 = vpop.f32.mrf.mxu3 }
  0xda   :  { %v4646_v9 = vpop.f32.mrf.mxu0  ;;  %v4648_v10 = vpop.f32.mrf.mxu1 }
  0xe1   :  { %v4650_v19 = vpop.f32.mrf.mxu2  ;;  %v4652_v20 = vpop.f32.mrf.mxu3 }
  0xe2   :  { %v1890_v51 = vpop.f32.mrf.mxu0  ;;  %v2115_v52 = vpop.f32.mrf.mxu1 }
  0xe3   :  { %v4673_v37 = vmax.f32 %v1890_v51, %v2815_v46  ;;  %v4678_v35 = vmax.f32 %v2115_v52, %v2765_v45 }
  0xe5   :  { %3927 = vmatmul.msk.bf16.gmra.mxu0 %vm1315_vm0, %v4107_v25  ;;  %3972 = vmatmul.msk.bf16.gmra.mxu1 %vm1315_vm0, %v4152_v26  ;;  %v4108_v25 = vld [vmem:[%s6596_s0 + $0x70] sm:$0xff]  ;;  %v4153_v26 = vld [vmem:[%s6596_s0 + $0x1d8] sm:$0xff] }
  0xe6   :  { %4017 = vmatmul.msk.bf16.gmra.mxu2 %vm1315_vm0, %v4197_v3  ;;  %4062 = vmatmul.msk.bf16.gmra.mxu3 %vm1315_vm0, %v4242_v4 }
  0xe9   :  { %v4684_v36 = vpop.f32.mrf.mxu2  ;;  %v4686_v38 = vpop.f32.mrf.mxu3 }
  0xea   :  { %v2915_v40 = vmax.f32 %v4684_v36, %v4673_v37  ;;  %v2865_v39 = vmax.f32 %v4686_v38, %v4678_v35  ;;  %v1892_v43 = vpop.f32.mrf.mxu0  ;;  %v2117_v44 = vpop.f32.mrf.mxu1 }
  0xeb   :  { %v4695_v45 = vmax.f32 %v1892_v43, %v2816_v54  ;;  %v4700_v46 = vmax.f32 %v2117_v44, %v2766_v53  ;;  %v4198_v53 = vld [vmem:[%s6596_s0 + $0x340] sm:$0xff]  ;;  %v4243_v54 = vld [vmem:[%s6596_s0 + $0x4a8] sm:$0xff] }
  0xf1   :  { %v4702_v3 = vpop.f32.mrf.mxu2  ;;  %v4704_v4 = vpop.f32.mrf.mxu3 }
  0xf2   :  { %v2916_v48 = vmax.f32 %v4702_v3, %v4695_v45  ;;  %v2866_v47 = vmax.f32 %v4704_v4, %v4700_v46  ;;  %v1895_v49 = vpop.f32.mrf.mxu0  ;;  %v2120_v50 = vpop.f32.mrf.mxu1 }
  0xf3   :  { %v4725_v51 = vmax.f32 %v1895_v49, %v2817_v62  ;;  %v4730_v52 = vmax.f32 %v2120_v50, %v2767_v61  ;;  %v4109_v49 = vld [vmem:[%s6596_s0 + $0x78] sm:$0xff]  ;;  %v4154_v50 = vld [vmem:[%s6596_s0 + $0x1e0] sm:$0xff] }
  0xf5   :  { %3928 = vmatmul.msk.bf16.gmra.mxu0 %vm1315_vm0, %v4108_v25  ;;  %3973 = vmatmul.msk.bf16.gmra.mxu1 %vm1315_vm0, %v4153_v26 }
  0xf6   :  { %4018 = vmatmul.msk.bf16.gmra.mxu2 %vm1315_vm0, %v4198_v53  ;;  %4063 = vmatmul.msk.bf16.gmra.mxu3 %vm1315_vm0, %v4243_v54 }
  0xf9   :  { %v4736_v43 = vpop.f32.mrf.mxu2  ;;  %v4738_v44 = vpop.f32.mrf.mxu3 }
  0xfa   :  { %v2917_v56 = vmax.f32 %v4736_v43, %v4725_v51  ;;  %v2867_v55 = vmax.f32 %v4738_v44, %v4730_v52  ;;  %v1897_v59 = vpop.f32.mrf.mxu0  ;;  %v2122_v60 = vpop.f32.mrf.mxu1 }
  0xfb   :  { %v4747_v61 = vmax.f32 %v1897_v59, %v2818_v6  ;;  %v4752_v62 = vmax.f32 %v2122_v60, %v2768_v5  ;;  %v4199_v5 = vld [vmem:[%s6596_s0 + $0x348] sm:$0xff]  ;;  %v4244_v6 = vld [vmem:[%s6596_s0 + $0x4b0] sm:$0xff] }
 0x101   :  { %v4754_v25 = vpop.f32.mrf.mxu2  ;;  %v4756_v26 = vpop.f32.mrf.mxu3 }
 0x102   :  { %v2918_v0 = vmax.f32 %v4754_v25, %v4747_v61  ;;  %v2868_v63 = vmax.f32 %v4756_v26, %v4752_v62  ;;  %v1900_v1 = vpop.f32.mrf.mxu0  ;;  %v2125_v2 = vpop.f32.mrf.mxu1 }
 0x103   :  { %v4777_v53 = vmax.f32 %v1900_v1, %v2819_v14  ;;  %v4782_v54 = vmax.f32 %v2125_v2, %v2769_v13  ;;  %v4110_v1 = vld [vmem:[%s6596_s0 + $0x80] sm:$0xff]  ;;  %v4155_v2 = vld [vmem:[%s6596_s0 + $0x1e8] sm:$0xff] }
 0x105   :  { %3929 = vmatmul.msk.bf16.gmra.mxu0 %vm1315_vm0, %v4109_v49  ;;  %3974 = vmatmul.msk.bf16.gmra.mxu1 %vm1315_vm0, %v4154_v50 }
 0x106   :  { %4019 = vmatmul.msk.bf16.gmra.mxu2 %vm1315_vm0, %v4199_v5  ;;  %4064 = vmatmul.msk.bf16.gmra.mxu3 %vm1315_vm0, %v4244_v6 }
 0x109   :  { %v4788_v59 = vpop.f32.mrf.mxu2  ;;  %v4790_v60 = vpop.f32.mrf.mxu3 }
 0x10a   :  { %v2919_v8 = vmax.f32 %v4788_v59, %v4777_v53  ;;  %v2869_v7 = vmax.f32 %v4790_v60, %v4782_v54  ;;  %v1902_v11 = vpop.f32.mrf.mxu0  ;;  %v2127_v12 = vpop.f32.mrf.mxu1 }
 0x10b   :  { %v4799_v13 = vmax.f32 %v1902_v11, %v2820_v22  ;;  %v4804_v14 = vmax.f32 %v2127_v12, %v2770_v21  ;;  %v4200_v21 = vld [vmem:[%s6596_s0 + $0x350] sm:$0xff]  ;;  %v4245_v22 = vld [vmem:[%s6596_s0 + $0x4b8] sm:$0xff] }
 0x111   :  { %v4806_v49 = vpop.f32.mrf.mxu2  ;;  %v4808_v50 = vpop.f32.mrf.mxu3 }
 0x112   :  { %v2920_v16 = vmax.f32 %v4806_v49, %v4799_v13  ;;  %v2870_v15 = vmax.f32 %v4808_v50, %v4804_v14  ;;  %v1905_v17 = vpop.f32.mrf.mxu0  ;;  %v2130_v18 = vpop.f32.mrf.mxu1 }
 0x113   :  { %v4829_v5 = vmax.f32 %v1905_v17, %v2821_v30  ;;  %v4834_v6 = vmax.f32 %v2130_v18, %v2771_v29  ;;  %v6599_v29 = vmax.f32 %v4608_v32, %v4612_v34  ;;  %v6602_v32 = vmax.f32 %v4624_v41, %v4638_v57 }
 0x115   :  { %3930 = vmatmul.msk.bf16.gmra.mxu0 %vm1315_vm0, %v4110_v1  ;;  %3975 = vmatmul.msk.bf16.gmra.mxu1 %vm1315_vm0, %v4155_v2  ;;  %v6600_v1 = vmax.f32 %v4606_v31, %v4610_v33 }
 0x116   :  { %4020 = vmatmul.msk.bf16.gmra.mxu2 %vm1315_vm0, %v4200_v21  ;;  %4065 = vmatmul.msk.bf16.gmra.mxu3 %vm1315_vm0, %v4245_v22  ;;  %v4111_v21 = vld [vmem:[%s6596_s0 + $0x88] sm:$0xff]  ;;  %v4156_v22 = vld [vmem:[%s6596_s0 + $0x1f0] sm:$0xff] }
 0x119   :  { %v4840_v11 = vpop.f32.mrf.mxu2  ;;  %v4842_v12 = vpop.f32.mrf.mxu3 }
 0x11a   :  { %v1907_v27 = vpop.f32.mrf.mxu0  ;;  %v2132_v28 = vpop.f32.mrf.mxu1 }
 0x11b   :  { %v4851_v30 = vmax.f32 %v1907_v27, %v6599_v29  ;;  %v4856_v2 = vmax.f32 %v2132_v28, %v6600_v1  ;;  %v4201_v27 = vld [vmem:[%s6596_s0 + $0x358] sm:$0xff]  ;;  %v4246_v28 = vld [vmem:[%s6596_s0 + $0x4c0] sm:$0xff]  ;;  %v6601_v29 = vmax.f32 %v4626_v42, %v4640_v58 }
 0x121   :  { %v4858_v17 = vpop.f32.mrf.mxu2  ;;  %v4860_v18 = vpop.f32.mrf.mxu3 }
 0x122   :  { %v1910_v33 = vpop.f32.mrf.mxu0  ;;  %v2135_v34 = vpop.f32.mrf.mxu1 }
 0x123   :  { %v4881_v1 = vmax.f32 %v1910_v33, %v6601_v29  ;;  %v4886_v24 = vmax.f32 %v2135_v34, %v6602_v32  ;;  %v6604_v32 = vmax.f32 %v4646_v9, %v4650_v19  ;;  %v4157_v29 = vld [vmem:[%s6596_s0 + $0x1f8] sm:$0xff] }
 0x125   :  { %3931 = vmatmul.msk.bf16.gmra.mxu0 %vm1315_vm0, %v4111_v21  ;;  %3976 = vmatmul.msk.bf16.gmra.mxu1 %vm1315_vm0, %v4156_v22  ;;  %v6603_v21 = vmax.f32 %v4648_v10, %v4652_v20 }
 0x126   :  { %4021 = vmatmul.msk.bf16.gmra.mxu2 %vm1315_vm0, %v4201_v27  ;;  %4066 = vmatmul.msk.bf16.gmra.mxu3 %vm1315_vm0, %v4246_v28  ;;  %v4112_v28 = vld [vmem:[%s6596_s0 + $0x90] sm:$0xff] }
 0x129   :  { %v4892_v31 = vpop.f32.mrf.mxu2  ;;  %v4894_v23 = vpop.f32.mrf.mxu3 }
 0x12a   :  { %v2923_v42 = vmax.f32 %v4892_v31, %v4881_v1  ;;  %v2873_v41 = vmax.f32 %v4894_v23, %v4886_v24  ;;  %v1912_v57 = vpop.f32.mrf.mxu0  ;;  %v2137_v58 = vpop.f32.mrf.mxu1 }
 0x12b   :  { %v4903_v22 = vmax.f32 %v1912_v57, %v6603_v21  ;;  %v4908_v33 = vmax.f32 %v2137_v58, %v6604_v32  ;;  %v4202_v57 = vld [vmem:[%s6596_s0 + $0x360] sm:$0xff]  ;;  %v4247_v58 = vld [vmem:[%s6596_s0 + $0x4c8] sm:$0xff] }
 0x131   :  { %v4910_v34 = vpop.f32.mrf.mxu2  ;;  %v4912_v27 = vpop.f32.mrf.mxu3 }
 0x132   :  { %v1915_v19 = vpop.f32.mrf.mxu0  ;;  %v2140_v20 = vpop.f32.mrf.mxu1 }
 0x133   :  { %v4933_v21 = vmax.f32 %v1915_v19, %v2865_v39  ;;  %v4938_v32 = vmax.f32 %v2140_v20, %v2915_v40  ;;  %v4113_v19 = vld [vmem:[%s6596_s0 + $0x98] sm:$0xff]  ;;  %v4158_v20 = vld [vmem:[%s6596_s0 + $0x200] sm:$0xff] }
 0x135   :  { %3932 = vmatmul.msk.bf16.gmra.mxu0 %vm1315_vm0, %v4112_v28  ;;  %3977 = vmatmul.msk.bf16.gmra.mxu1 %vm1315_vm0, %v4157_v29 }
 0x136   :  { %4022 = vmatmul.msk.bf16.gmra.mxu2 %vm1315_vm0, %v4202_v57  ;;  %4067 = vmatmul.msk.bf16.gmra.mxu3 %vm1315_vm0, %v4247_v58 }
 0x139   :  { %v4944_v10 = vpop.f32.mrf.mxu2  ;;  %v4946_v9 = vpop.f32.mrf.mxu3 }
 0x13a   :  { %v2785_v38 = vmax.f32 %v4944_v10, %v4933_v21  ;;  %v2835_v37 = vmax.f32 %v4946_v9, %v4938_v32  ;;  %v1917_v35 = vpop.f32.mrf.mxu0  ;;  %v2142_v36 = vpop.f32.mrf.mxu1 }
 0x13b   :  { %v4955_v40 = vmax.f32 %v1917_v35, %v2866_v47  ;;  %v4960_v39 = vmax.f32 %v2142_v36, %v2916_v48  ;;  %v4203_v48 = vld [vmem:[%s6596_s0 + $0x368] sm:$0xff]  ;;  %v4248_v47 = vld [vmem:[%s6596_s0 + $0x4d0] sm:$0xff] }
 0x141   :  { %v4962_v28 = vpop.f32.mrf.mxu2  ;;  %v4964_v29 = vpop.f32.mrf.mxu3 }
 0x142   :  { %v2786_v46 = vmax.f32 %v4962_v28, %v4955_v40  ;;  %v2836_v45 = vmax.f32 %v4964_v29, %v4960_v39  ;;  %v1920_v3 = vpop.f32.mrf.mxu0  ;;  %v2145_v4 = vpop.f32.mrf.mxu1 }
 0x143   :  { %v4985_v57 = vmax.f32 %v1920_v3, %v2867_v55  ;;  %v4990_v58 = vmax.f32 %v2145_v4, %v2917_v56  ;;  %v4114_v3 = vld [vmem:[%s6596_s0 + $0xa0] sm:$0xff]  ;;  %v4159_v4 = vld [vmem:[%s6596_s0 + $0x208] sm:$0xff] }
 0x145   :  { %3933 = vmatmul.msk.bf16.gmra.mxu0 %vm1315_vm0, %v4113_v19  ;;  %3978 = vmatmul.msk.bf16.gmra.mxu1 %vm1315_vm0, %v4158_v20 }
 0x146   :  { %4023 = vmatmul.msk.bf16.gmra.mxu2 %vm1315_vm0, %v4203_v48  ;;  %4068 = vmatmul.msk.bf16.gmra.mxu3 %vm1315_vm0, %v4248_v47 }
 0x149   :  { %v4996_v35 = vpop.f32.mrf.mxu2  ;;  %v4998_v36 = vpop.f32.mrf.mxu3 }
 0x14a   :  { %v2787_v52 = vmax.f32 %v4996_v35, %v4985_v57  ;;  %v2837_v51 = vmax.f32 %v4998_v36, %v4990_v58  ;;  %v1922_v43 = vpop.f32.mrf.mxu0  ;;  %v2147_v44 = vpop.f32.mrf.mxu1 }
 0x14b   :  { %v5007_v56 = vmax.f32 %v1922_v43, %v2868_v63  ;;  %v5012_v55 = vmax.f32 %v2147_v44, %v2918_v0  ;;  %v4204_v0 = vld [vmem:[%s6596_s0 + $0x370] sm:$0xff]  ;;  %v4249_v63 = vld [vmem:[%s6596_s0 + $0x4d8] sm:$0xff] }
 0x151   :  { %v5014_v19 = vpop.f32.mrf.mxu2  ;;  %v5016_v20 = vpop.f32.mrf.mxu3 }
 0x152   :  { %v2788_v62 = vmax.f32 %v5014_v19, %v5007_v56  ;;  %v2838_v61 = vmax.f32 %v5016_v20, %v5012_v55  ;;  %v1925_v25 = vpop.f32.mrf.mxu0  ;;  %v2150_v26 = vpop.f32.mrf.mxu1 }
 0x153   :  { %v5037_v48 = vmax.f32 %v1925_v25, %v2869_v7  ;;  %v5042_v47 = vmax.f32 %v2150_v26, %v2919_v8  ;;  %v4115_v25 = vld [vmem:[%s6596_s0 + $0xa8] sm:$0xff]  ;;  %v4160_v26 = vld [vmem:[%s6596_s0 + $0x210] sm:$0xff] }
 0x155   :  { %3934 = vmatmul.msk.bf16.gmra.mxu0 %vm1315_vm0, %v4114_v3  ;;  %3979 = vmatmul.msk.bf16.gmra.mxu1 %vm1315_vm0, %v4159_v4 }
 0x156   :  { %4024 = vmatmul.msk.bf16.gmra.mxu2 %vm1315_vm0, %v4204_v0  ;;  %4069 = vmatmul.msk.bf16.gmra.mxu3 %vm1315_vm0, %v4249_v63  ;;  %v6605_v0 = vmax.f32 %v4842_v12, %v4834_v6 }
 0x159   :  { %v5048_v43 = vpop.f32.mrf.mxu2  ;;  %v5050_v44 = vpop.f32.mrf.mxu3 }
 0x15a   :  { %v2789_v54 = vmax.f32 %v5048_v43, %v5037_v48  ;;  %v2839_v53 = vmax.f32 %v5050_v44, %v5042_v47  ;;  %v1927_v59 = vpop.f32.mrf.mxu0  ;;  %v2152_v60 = vpop.f32.mrf.mxu1 }
 0x15b   :  { %v5059_v8 = vmax.f32 %v1927_v59, %v2870_v15  ;;  %v5064_v7 = vmax.f32 %v2152_v60, %v2920_v16  ;;  %v4205_v16 = vld [vmem:[%s6596_s0 + $0x378] sm:$0xff]  ;;  %v4250_v15 = vld [vmem:[%s6596_s0 + $0x4e0] sm:$0xff]  ;;  %v6606_v59 = vmax.f32 %v4840_v11, %v4829_v5 }
 0x161   :  { %v5066_v3 = vpop.f32.mrf.mxu2  ;;  %v5068_v4 = vpop.f32.mrf.mxu3 }
 0x162   :  { %v1930_v49 = vpop.f32.mrf.mxu0  ;;  %v2155_v50 = vpop.f32.mrf.mxu1 }
 0x163   :  { %v5089_v63 = vmax.f32 %v1930_v49, %v6605_v0  ;;  %v5094_v60 = vmax.f32 %v2155_v50, %v6606_v59  ;;  %v6608_v49 = vmax.f32 %v4858_v17, %v4851_v30  ;;  %v4116_v0 = vld [vmem:[%s6596_s0 + $0xb0] sm:$0xff]  ;;  %v4161_v59 = vld [vmem:[%s6596_s0 + $0x218] sm:$0xff] }
 0x165   :  { %3935 = vmatmul.msk.bf16.gmra.mxu0 %vm1315_vm0, %v4115_v25  ;;  %3980 = vmatmul.msk.bf16.gmra.mxu1 %vm1315_vm0, %v4160_v26  ;;  %v6607_v25 = vmax.f32 %v4860_v18, %v4856_v2 }
 0x166   :  { %4025 = vmatmul.msk.bf16.gmra.mxu2 %vm1315_vm0, %v4205_v16  ;;  %4070 = vmatmul.msk.bf16.gmra.mxu3 %vm1315_vm0, %v4250_v15 }
 0x169   :  { %v5100_v14 = vpop.f32.mrf.mxu2  ;;  %v5102_v13 = vpop.f32.mrf.mxu3 }
 0x16a   :  { %v2791_v6 = vmax.f32 %v5100_v14, %v5089_v63  ;;  %v2841_v5 = vmax.f32 %v5102_v13, %v5094_v60  ;;  %v1932_v11 = vpop.f32.mrf.mxu0  ;;  %v2157_v12 = vpop.f32.mrf.mxu1 }
 0x16b   :  { %v5111_v26 = vmax.f32 %v1932_v11, %v6607_v25  ;;  %v5116_v50 = vmax.f32 %v2157_v12, %v6608_v49  ;;  %v4206_v11 = vld [vmem:[%s6596_s0 + $0x380] sm:$0xff]  ;;  %v4251_v12 = vld [vmem:[%s6596_s0 + $0x4e8] sm:$0xff] }
 0x171   :  { %v5118_v16 = vpop.f32.mrf.mxu2  ;;  %v5120_v15 = vpop.f32.mrf.mxu3 }
 0x172   :  { %v1935_v17 = vpop.f32.mrf.mxu0  ;;  %v2160_v18 = vpop.f32.mrf.mxu1 }
 0x173   :  { %v5141_v25 = vmax.f32 %v1935_v17, %v2873_v41  ;;  %v5146_v49 = vmax.f32 %v2160_v18, %v2923_v42  ;;  %v6609_v42 = vmax.f32 %v4912_v27, %v4908_v33 }
 0x175   :  { %3936 = vmatmul.msk.bf16.gmra.mxu0 %vm1315_vm0, %v4116_v0  ;;  %3981 = vmatmul.msk.bf16.gmra.mxu1 %vm1315_vm0, %v4161_v59  ;;  %v6610_v0 = vmax.f32 %v4910_v34, %v4903_v22 }
 0x176   :  { %4026 = vmatmul.msk.bf16.gmra.mxu2 %vm1315_vm0, %v4206_v11  ;;  %4071 = vmatmul.msk.bf16.gmra.mxu3 %vm1315_vm0, %v4251_v12  ;;  %v4117_v11 = vld [vmem:[%s6596_s0 + $0xb8] sm:$0xff]  ;;  %v4162_v12 = vld [vmem:[%s6596_s0 + $0x220] sm:$0xff] }
 0x179   :  { %v5152_v2 = vpop.f32.mrf.mxu2  ;;  %v5154_v30 = vpop.f32.mrf.mxu3 }
 0x17a   :  { %v2793_v24 = vmax.f32 %v5152_v2, %v5141_v25  ;;  %v2843_v23 = vmax.f32 %v5154_v30, %v5146_v49  ;;  %v1937_v31 = vpop.f32.mrf.mxu0  ;;  %v2162_v1 = vpop.f32.mrf.mxu1 }
 0x17b   :  { %v5163_v41 = vmax.f32 %v1937_v31, %v6609_v42  ;;  %v5168_v59 = vmax.f32 %v2162_v1, %v6610_v0  ;;  %v4207_v31 = vld [vmem:[%s6596_s0 + $0x388] sm:$0xff]  ;;  %v4252_v1 = vld [vmem:[%s6596_s0 + $0x4f0] sm:$0xff] }
 0x181   :  { %v5170_v17 = vpop.f32.mrf.mxu2  ;;  %v5172_v18 = vpop.f32.mrf.mxu3 }
 0x182   :  { %v1940_v34 = vpop.f32.mrf.mxu0  ;;  %v2165_v27 = vpop.f32.mrf.mxu1 }
 0x183   :  { %v5193_v42 = vmax.f32 %v1940_v34, %v2835_v37  ;;  %v5198_v0 = vmax.f32 %v2165_v27, %v2785_v38  ;;  %v4118_v34 = vld [vmem:[%s6596_s0 + $0xc0] sm:$0xff]  ;;  %v4163_v27 = vld [vmem:[%s6596_s0 + $0x228] sm:$0xff] }
 0x185   :  { %3937 = vmatmul.msk.bf16.gmra.mxu0 %vm1315_vm0, %v4117_v11  ;;  %3982 = vmatmul.msk.bf16.gmra.mxu1 %vm1315_vm0, %v4162_v12 }
 0x186   :  { %4027 = vmatmul.msk.bf16.gmra.mxu2 %vm1315_vm0, %v4207_v31  ;;  %4072 = vmatmul.msk.bf16.gmra.mxu3 %vm1315_vm0, %v4252_v1 }
 0x189   :  { %v5204_v33 = vpop.f32.mrf.mxu2  ;;  %v5206_v22 = vpop.f32.mrf.mxu3 }
 0x18a   :  { %v2795_v9 = vmax.f32 %v5204_v33, %v5193_v42  ;;  %v2845_v10 = vmax.f32 %v5206_v22, %v5198_v0  ;;  %v1942_v21 = vpop.f32.mrf.mxu0  ;;  %v2167_v32 = vpop.f32.mrf.mxu1 }
 0x18b   :  { %v5215_v38 = vmax.f32 %v1942_v21, %v2836_v45  ;;  %v5220_v37 = vmax.f32 %v2167_v32, %v2786_v46  ;;  %v4208_v46 = vld [vmem:[%s6596_s0 + $0x390] sm:$0xff]  ;;  %v4253_v45 = vld [vmem:[%s6596_s0 + $0x4f8] sm:$0xff] }
 0x191   :  { %v5222_v11 = vpop.f32.mrf.mxu2  ;;  %v5224_v12 = vpop.f32.mrf.mxu3 }
 0x192   :  { %v2796_v39 = vmax.f32 %v5222_v11, %v5215_v38  ;;  %v2846_v40 = vmax.f32 %v5224_v12, %v5220_v37  ;;  %v1945_v28 = vpop.f32.mrf.mxu0  ;;  %v2170_v29 = vpop.f32.mrf.mxu1 }
 0x193   :  { %v5245_v31 = vmax.f32 %v1945_v28, %v2837_v51  ;;  %v5250_v1 = vmax.f32 %v2170_v29, %v2787_v52  ;;  %v4119_v28 = vld [vmem:[%s6596_s0 + $0xc8] sm:$0xff]  ;;  %v4164_v29 = vld [vmem:[%s6596_s0 + $0x230] sm:$0xff] }
 0x195   :  { %3938 = vmatmul.msk.bf16.gmra.mxu0 %vm1315_vm0, %v4118_v34  ;;  %3983 = vmatmul.msk.bf16.gmra.mxu1 %vm1315_vm0, %v4163_v27 }
 0x196   :  { %4028 = vmatmul.msk.bf16.gmra.mxu2 %vm1315_vm0, %v4208_v46  ;;  %4073 = vmatmul.msk.bf16.gmra.mxu3 %vm1315_vm0, %v4253_v45 }
 0x199   :  { %v5256_v21 = vpop.f32.mrf.mxu2  ;;  %v5258_v32 = vpop.f32.mrf.mxu3 }
 0x19a   :  { %v2797_v58 = vmax.f32 %v5256_v21, %v5245_v31  ;;  %v2847_v57 = vmax.f32 %v5258_v32, %v5250_v1  ;;  %v1947_v35 = vpop.f32.mrf.mxu0  ;;  %v2172_v36 = vpop.f32.mrf.mxu1 }
 0x19b   :  { %v5267_v52 = vmax.f32 %v1947_v35, %v2838_v61  ;;  %v5272_v51 = vmax.f32 %v2172_v36, %v2788_v62  ;;  %v4209_v62 = vld [vmem:[%s6596_s0 + $0x398] sm:$0xff]  ;;  %v4254_v61 = vld [vmem:[%s6596_s0 + $0x500] sm:$0xff] }
 0x1a1   :  { %v5274_v34 = vpop.f32.mrf.mxu2  ;;  %v5276_v27 = vpop.f32.mrf.mxu3 }
 0x1a2   :  { %v2798_v55 = vmax.f32 %v5274_v34, %v5267_v52  ;;  %v2848_v56 = vmax.f32 %v5276_v27, %v5272_v51  ;;  %v1950_v19 = vpop.f32.mrf.mxu0  ;;  %v2175_v20 = vpop.f32.mrf.mxu1 }
 0x1a3   :  { %v5297_v46 = vmax.f32 %v1950_v19, %v2839_v53  ;;  %v5302_v45 = vmax.f32 %v2175_v20, %v2789_v54  ;;  %v6611_v54 = vmax.f32 %v5068_v4, %v5064_v7 }
 0x1a5   :  { %3939 = vmatmul.msk.bf16.gmra.mxu0 %vm1315_vm0, %v4119_v28  ;;  %3984 = vmatmul.msk.bf16.gmra.mxu1 %vm1315_vm0, %v4164_v29  ;;  %v6612_v28 = vmax.f32 %v5066_v3, %v5059_v8 }
 0x1a6   :  { %4029 = vmatmul.msk.bf16.gmra.mxu2 %vm1315_vm0, %v4209_v62  ;;  %4074 = vmatmul.msk.bf16.gmra.mxu3 %vm1315_vm0, %v4254_v61  ;;  %v4120_v62 = vld [vmem:[%s6596_s0 + $0xd0] sm:$0xff]  ;;  %v4165_v61 = vld [vmem:[%s6596_s0 + $0x238] sm:$0xff] }
 0x1a9   :  { %v5308_v35 = vpop.f32.mrf.mxu2  ;;  %v5310_v36 = vpop.f32.mrf.mxu3 }
 0x1aa   :  { %v2799_v47 = vmax.f32 %v5308_v35, %v5297_v46  ;;  %v2849_v48 = vmax.f32 %v5310_v36, %v5302_v45  ;;  %v1952_v43 = vpop.f32.mrf.mxu0  ;;  %v2177_v44 = vpop.f32.mrf.mxu1 }
 0x1ab   :  { %v5319_v53 = vmax.f32 %v1952_v43, %v6611_v54  ;;  %v5324_v29 = vmax.f32 %v2177_v44, %v6612_v28  ;;  %v4210_v43 = vld [vmem:[%s6596_s0 + $0x3a0] sm:$0xff]  ;;  %v4255_v44 = vld [vmem:[%s6596_s0 + $0x508] sm:$0xff] }
 0x1b1   :  { %v5326_v19 = vpop.f32.mrf.mxu2  ;;  %v5328_v20 = vpop.f32.mrf.mxu3 }
 0x1b2   :  { %v1955_v3 = vpop.f32.mrf.mxu0  ;;  %v2180_v4 = vpop.f32.mrf.mxu1 }
 0x1b3   :  { %v5349_v54 = vmax.f32 %v1955_v3, %v2841_v5  ;;  %v5354_v28 = vmax.f32 %v2180_v4, %v2791_v6  ;;  %v6613_v6 = vmax.f32 %v5120_v15, %v5116_v50 }
 0x1b5   :  { %3940 = vmatmul.msk.bf16.gmra.mxu0 %vm1315_vm0, %v4120_v62  ;;  %3985 = vmatmul.msk.bf16.gmra.mxu1 %vm1315_vm0, %v4165_v61  ;;  %v6614_v62 = vmax.f32 %v5118_v16, %v5111_v26 }
 0x1b6   :  { %4030 = vmatmul.msk.bf16.gmra.mxu2 %vm1315_vm0, %v4210_v43  ;;  %4075 = vmatmul.msk.bf16.gmra.mxu3 %vm1315_vm0, %v4255_v44  ;;  %v4121_v43 = vld [vmem:[%s6596_s0 + $0xd8] sm:$0xff]  ;;  %v4166_v44 = vld [vmem:[%s6596_s0 + $0x240] sm:$0xff] }
 0x1b9   :  { %v5360_v7 = vpop.f32.mrf.mxu2  ;;  %v5362_v8 = vpop.f32.mrf.mxu3 }
 0x1ba   :  { %v2801_v13 = vmax.f32 %v5360_v7, %v5349_v54  ;;  %v2851_v14 = vmax.f32 %v5362_v8, %v5354_v28  ;;  %v1957_v63 = vpop.f32.mrf.mxu0  ;;  %v2182_v60 = vpop.f32.mrf.mxu1 }
 0x1bb   :  { %v5371_v5 = vmax.f32 %v1957_v63, %v6613_v6  ;;  %v5376_v61 = vmax.f32 %v2182_v60, %v6614_v62  ;;  %v4211_v63 = vld [vmem:[%s6596_s0 + $0x3a8] sm:$0xff]  ;;  %v4256_v60 = vld [vmem:[%s6596_s0 + $0x510] sm:$0xff] }
 0x1c1   :  { %v5378_v3 = vpop.f32.mrf.mxu2  ;;  %v5380_v4 = vpop.f32.mrf.mxu3 }
 0x1c2   :  { %v1960_v16 = vpop.f32.mrf.mxu0  ;;  %v2185_v15 = vpop.f32.mrf.mxu1 }
 0x1c3   :  { %v5401_v6 = vmax.f32 %v1960_v16, %v2843_v23  ;;  %v5406_v62 = vmax.f32 %v2185_v15, %v2793_v24  ;;  %v6615_v24 = vmax.f32 %v5172_v18, %v5168_v59 }
 0x1c5   :  { %3941 = vmatmul.msk.bf16.gmra.mxu0 %vm1315_vm0, %v4121_v43  ;;  %3986 = vmatmul.msk.bf16.gmra.mxu1 %vm1315_vm0, %v4166_v44  ;;  %v6616_v43 = vmax.f32 %v5170_v17, %v5163_v41 }
 0x1c6   :  { %4031 = vmatmul.msk.bf16.gmra.mxu2 %vm1315_vm0, %v4211_v63  ;;  %4076 = vmatmul.msk.bf16.gmra.mxu3 %vm1315_vm0, %v4256_v60  ;;  %v4122_v63 = vld [vmem:[%s6596_s0 + $0xe0] sm:$0xff]  ;;  %v4167_v60 = vld [vmem:[%s6596_s0 + $0x248] sm:$0xff] }
 0x1c9   :  { %v5412_v50 = vpop.f32.mrf.mxu2  ;;  %v5414_v26 = vpop.f32.mrf.mxu3 }
 0x1ca   :  { %v2803_v30 = vmax.f32 %v5412_v50, %v5401_v6  ;;  %v2853_v2 = vmax.f32 %v5414_v26, %v5406_v62  ;;  %v1962_v25 = vpop.f32.mrf.mxu0  ;;  %v2187_v49 = vpop.f32.mrf.mxu1 }
 0x1cb   :  { %v5423_v23 = vmax.f32 %v1962_v25, %v6615_v24  ;;  %v5428_v44 = vmax.f32 %v2187_v49, %v6616_v43  ;;  %v4212_v25 = vld [vmem:[%s6596_s0 + $0x3b0] sm:$0xff]  ;;  %v4257_v49 = vld [vmem:[%s6596_s0 + $0x518] sm:$0xff] }
 0x1d1   :  { %v5430_v16 = vpop.f32.mrf.mxu2  ;;  %v5432_v15 = vpop.f32.mrf.mxu3 }
 0x1d2   :  { %v1965_v17 = vpop.f32.mrf.mxu0  ;;  %v2190_v18 = vpop.f32.mrf.mxu1 }
 0x1d3   :  { %v5453_v24 = vmax.f32 %v2845_v10, %v1965_v17  ;;  %v5458_v43 = vmax.f32 %v2190_v18, %v2795_v9  ;;  %v4123_v17 = vld [vmem:[%s6596_s0 + $0xe8] sm:$0xff]  ;;  %v4168_v18 = vld [vmem:[%s6596_s0 + $0x250] sm:$0xff] }
 0x1d5   :  { %3942 = vmatmul.msk.bf16.gmra.mxu0 %vm1315_vm0, %v4122_v63  ;;  %3987 = vmatmul.msk.bf16.gmra.mxu1 %vm1315_vm0, %v4167_v60 }
 0x1d6   :  { %4032 = vmatmul.msk.bf16.gmra.mxu2 %vm1315_vm0, %v4212_v25  ;;  %4077 = vmatmul.msk.bf16.gmra.mxu3 %vm1315_vm0, %v4257_v49 }
 0x1d9   :  { %v5464_v59 = vpop.f32.mrf.mxu2  ;;  %v5466_v41 = vpop.f32.mrf.mxu3 }
 0x1da   :  { %v2925_v22 = vmax.f32 %v5464_v59, %v5453_v24  ;;  %v3035_v33 = vmax.f32 %v5458_v43, %v5466_v41  ;;  %v1967_v42 = vpop.f32.mrf.mxu0  ;;  %v2192_v0 = vpop.f32.mrf.mxu1 }
 0x1db   :  { %v5475_v9 = vmax.f32 %v2846_v40, %v1967_v42  ;;  %v5480_v10 = vmax.f32 %v2192_v0, %v2796_v39  ;;  %v4213_v39 = vld [vmem:[%s6596_s0 + $0x3b8] sm:$0xff]  ;;  %v4258_v40 = vld [vmem:[%s6596_s0 + $0x520] sm:$0xff] }
 0x1e1   :  { %v5482_v63 = vpop.f32.mrf.mxu2  ;;  %v5484_v60 = vpop.f32.mrf.mxu3 }
 0x1e2   :  { %v2926_v37 = vmax.f32 %v5482_v63, %v5475_v9  ;;  %v3036_v38 = vmax.f32 %v5480_v10, %v5484_v60  ;;  %v1970_v11 = vpop.f32.mrf.mxu0  ;;  %v2195_v12 = vpop.f32.mrf.mxu1 }
 0x1e3   :  { %v5505_v25 = vmax.f32 %v2847_v57, %v1970_v11  ;;  %v5510_v49 = vmax.f32 %v2195_v12, %v2797_v58  ;;  %v4124_v11 = vld [vmem:[%s6596_s0 + $0xf0] sm:$0xff]  ;;  %v4169_v12 = vld [vmem:[%s6596_s0 + $0x258] sm:$0xff] }
 0x1e5   :  { %3943 = vmatmul.msk.bf16.gmra.mxu0 %vm1315_vm0, %v4123_v17  ;;  %3988 = vmatmul.msk.bf16.gmra.mxu1 %vm1315_vm0, %v4168_v18 }
 0x1e6   :  { %4033 = vmatmul.msk.bf16.gmra.mxu2 %vm1315_vm0, %v4213_v39  ;;  %4078 = vmatmul.msk.bf16.gmra.mxu3 %vm1315_vm0, %v4258_v40 }
 0x1e9   :  { %v5516_v42 = vpop.f32.mrf.mxu2  ;;  %v5518_v0 = vpop.f32.mrf.mxu3 }
 0x1ea   :  { %v2927_v1 = vmax.f32 %v5516_v42, %v5505_v25  ;;  %v3037_v31 = vmax.f32 %v5510_v49, %v5518_v0  ;;  %v1972_v21 = vpop.f32.mrf.mxu0  ;;  %v2197_v32 = vpop.f32.mrf.mxu1 }
 0x1eb   :  { %v5527_v58 = vmax.f32 %v2848_v56, %v1972_v21  ;;  %v5532_v57 = vmax.f32 %v2197_v32, %v2798_v55  ;;  %v4214_v55 = vld [vmem:[%s6596_s0 + $0x3c0] sm:$0xff]  ;;  %v4259_v56 = vld [vmem:[%s6596_s0 + $0x528] sm:$0xff] }
 0x1f1   :  { %v5534_v17 = vpop.f32.mrf.mxu2  ;;  %v5536_v18 = vpop.f32.mrf.mxu3 }
 0x1f2   :  { %v2928_v51 = vmax.f32 %v5534_v17, %v5527_v58  ;;  %v3038_v52 = vmax.f32 %v5532_v57, %v5536_v18  ;;  %v1975_v34 = vpop.f32.mrf.mxu0  ;;  %v2200_v27 = vpop.f32.mrf.mxu1 }
 0x1f3   :  { %v5557_v39 = vmax.f32 %v2849_v48, %v1975_v34  ;;  %v5562_v40 = vmax.f32 %v2200_v27, %v2799_v47  ;;  %v6617_v47 = vmax.f32 %v5328_v20, %v5324_v29 }
 0x1f5   :  { %3944 = vmatmul.msk.bf16.gmra.mxu0 %vm1315_vm0, %v4124_v11  ;;  %3989 = vmatmul.msk.bf16.gmra.mxu1 %vm1315_vm0, %v4169_v12  ;;  %v6618_v11 = vmax.f32 %v5326_v19, %v5319_v53 }
 0x1f6   :  { %4034 = vmatmul.msk.bf16.gmra.mxu2 %vm1315_vm0, %v4214_v55  ;;  %4079 = vmatmul.msk.bf16.gmra.mxu3 %vm1315_vm0, %v4259_v56  ;;  %v4125_v55 = vld [vmem:[%s6596_s0 + $0xf8] sm:$0xff]  ;;  %v4170_v56 = vld [vmem:[%s6596_s0 + $0x260] sm:$0xff] }
 0x1f9   :  { %v5568_v21 = vpop.f32.mrf.mxu2  ;;  %v5570_v32 = vpop.f32.mrf.mxu3 }
 0x1fa   :  { %v2929_v45 = vmax.f32 %v5568_v21, %v5557_v39  ;;  %v3039_v46 = vmax.f32 %v5562_v40, %v5570_v32  ;;  %v1977_v35 = vpop.f32.mrf.mxu0  ;;  %v2202_v36 = vpop.f32.mrf.mxu1 }
 0x1fb   :  { %v5579_v48 = vmax.f32 %v6617_v47, %v1977_v35  ;;  %v5584_v12 = vmax.f32 %v2202_v36, %v6618_v11  ;;  %v4215_v35 = vld [vmem:[%s6596_s0 + $0x3c8] sm:$0xff]  ;;  %v4260_v36 = vld [vmem:[%s6596_s0 + $0x530] sm:$0xff] }
 0x201   :  { %v5586_v34 = vpop.f32.mrf.mxu2  ;;  %v5588_v27 = vpop.f32.mrf.mxu3 }
 0x202   :  { %v1980_v19 = vpop.f32.mrf.mxu0  ;;  %v2205_v20 = vpop.f32.mrf.mxu1 }
 0x203   :  { %v5609_v47 = vmax.f32 %v2851_v14, %v1980_v19  ;;  %v5614_v11 = vmax.f32 %v2205_v20, %v2801_v13  ;;  %v6619_v13 = vmax.f32 %v5380_v4, %v5376_v61 }
 0x205   :  { %3945 = vmatmul.msk.bf16.gmra.mxu0 %vm1315_vm0, %v4125_v55  ;;  %3990 = vmatmul.msk.bf16.gmra.mxu1 %vm1315_vm0, %v4170_v56  ;;  %v6620_v55 = vmax.f32 %v5378_v3, %v5371_v5 }
 0x206   :  { %4035 = vmatmul.msk.bf16.gmra.mxu2 %vm1315_vm0, %v4215_v35  ;;  %4080 = vmatmul.msk.bf16.gmra.mxu3 %vm1315_vm0, %v4260_v36  ;;  %v4126_v35 = vld [vmem:[%s6596_s0 + $0x100] sm:$0xff]  ;;  %v4171_v36 = vld [vmem:[%s6596_s0 + $0x268] sm:$0xff] }
 0x209   :  { %v5620_v29 = vpop.f32.mrf.mxu2  ;;  %v5622_v53 = vpop.f32.mrf.mxu3 }
 0x20a   :  { %v2931_v8 = vmax.f32 %v5620_v29, %v5609_v47  ;;  %v3041_v7 = vmax.f32 %v5614_v11, %v5622_v53  ;;  %v1982_v54 = vpop.f32.mrf.mxu0  ;;  %v2207_v28 = vpop.f32.mrf.mxu1 }
 0x20b   :  { %v5631_v14 = vmax.f32 %v6619_v13, %v1982_v54  ;;  %v5636_v56 = vmax.f32 %v2207_v28, %v6620_v55  ;;  %v4216_v54 = vld [vmem:[%s6596_s0 + $0x3d0] sm:$0xff]  ;;  %v4261_v28 = vld [vmem:[%s6596_s0 + $0x538] sm:$0xff] }
 0x211   :  { %v5638_v19 = vpop.f32.mrf.mxu2  ;;  %v5640_v20 = vpop.f32.mrf.mxu3 }
 0x212   :  { %v1985_v3 = vpop.f32.mrf.mxu0  ;;  %v2210_v4 = vpop.f32.mrf.mxu1 }
 0x213   :  { %v5661_v13 = vmax.f32 %v2853_v2, %v1985_v3  ;;  %v5666_v55 = vmax.f32 %v2210_v4, %v2803_v30  ;;  %v6621_v30 = vmax.f32 %v5432_v15, %v5428_v44 }
 0x215   :  { %3946 = vmatmul.msk.bf16.gmra.mxu0 %vm1315_vm0, %v4126_v35  ;;  %3991 = vmatmul.msk.bf16.gmra.mxu1 %vm1315_vm0, %v4171_v36  ;;  %v6622_v35 = vmax.f32 %v5430_v16, %v5423_v23 }
 0x216   :  { %4036 = vmatmul.msk.bf16.gmra.mxu2 %vm1315_vm0, %v4216_v54  ;;  %4081 = vmatmul.msk.bf16.gmra.mxu3 %vm1315_vm0, %v4261_v28  ;;  %v4127_v54 = vld [vmem:[%s6596_s0 + $0x108] sm:$0xff]  ;;  %v4172_v28 = vld [vmem:[%s6596_s0 + $0x270] sm:$0xff] }
 0x219   :  { %v5672_v61 = vpop.f32.mrf.mxu2  ;;  %v5674_v5 = vpop.f32.mrf.mxu3 }
 0x21a   :  { %v2933_v26 = vmax.f32 %v5672_v61, %v5661_v13  ;;  %v3043_v50 = vmax.f32 %v5666_v55, %v5674_v5  ;;  %v1987_v6 = vpop.f32.mrf.mxu0  ;;  %v2212_v62 = vpop.f32.mrf.mxu1 }
 0x21b   :  { %v5683_v2 = vmax.f32 %v6621_v30, %v1987_v6  ;;  %v5688_v36 = vmax.f32 %v2212_v62, %v6622_v35  ;;  %v4217_v6 = vld [vmem:[%s6596_s0 + $0x3d8] sm:$0xff]  ;;  %v4262_v62 = vld [vmem:[%s6596_s0 + $0x540] sm:$0xff] }
 0x221   :  { %v5690_v3 = vpop.f32.mrf.mxu2  ;;  %v5692_v4 = vpop.f32.mrf.mxu3 }
 0x222   :  { %v1990_v16 = vpop.f32.mrf.mxu0  ;;  %v2215_v15 = vpop.f32.mrf.mxu1 }
 0x223   :  { %v5713_v30 = vmax.f32 %v1990_v16, %v3035_v33  ;;  %v5718_v35 = vmax.f32 %v2215_v15, %v2925_v22  ;;  %v4128_v16 = vld [vmem:[%s6596_s0 + $0x110] sm:$0xff]  ;;  %v4173_v15 = vld [vmem:[%s6596_s0 + $0x278] sm:$0xff] }
 0x225   :  { %3947 = vmatmul.msk.bf16.gmra.mxu0 %vm1315_vm0, %v4127_v54  ;;  %3992 = vmatmul.msk.bf16.gmra.mxu1 %vm1315_vm0, %v4172_v28 }
 0x226   :  { %4037 = vmatmul.msk.bf16.gmra.mxu2 %vm1315_vm0, %v4217_v6  ;;  %4082 = vmatmul.msk.bf16.gmra.mxu3 %vm1315_vm0, %v4262_v62 }
 0x229   :  { %v5724_v44 = vpop.f32.mrf.mxu2  ;;  %v5726_v23 = vpop.f32.mrf.mxu3 }
 0x22a   :  { %v3015_v41 = vmax.f32 %v5713_v30, %v5724_v44  ;;  %v2965_v59 = vmax.f32 %v5718_v35, %v5726_v23  ;;  %v1992_v24 = vpop.f32.mrf.mxu0  ;;  %v2217_v43 = vpop.f32.mrf.mxu1 }
 0x22b   :  { %v5735_v22 = vmax.f32 %v1992_v24, %v3036_v38  ;;  %v5740_v33 = vmax.f32 %v2217_v43, %v2926_v37  ;;  %v4218_v37 = vld [vmem:[%s6596_s0 + $0x3e0] sm:$0xff]  ;;  %v4263_v38 = vld [vmem:[%s6596_s0 + $0x548] sm:$0xff] }
 0x231   :  { %v5742_v54 = vpop.f32.mrf.mxu2  ;;  %v5744_v28 = vpop.f32.mrf.mxu3 }
 0x232   :  { %v3016_v10 = vmax.f32 %v5735_v22, %v5742_v54  ;;  %v2966_v9 = vmax.f32 %v5740_v33, %v5744_v28  ;;  %v1995_v63 = vpop.f32.mrf.mxu0  ;;  %v2220_v60 = vpop.f32.mrf.mxu1 }
 0x233   :  { %v5765_v6 = vmax.f32 %v1995_v63, %v3037_v31  ;;  %v5770_v62 = vmax.f32 %v2220_v60, %v2927_v1  ;;  %v4129_v63 = vld [vmem:[%s6596_s0 + $0x118] sm:$0xff]  ;;  %v4174_v60 = vld [vmem:[%s6596_s0 + $0x280] sm:$0xff] }
 0x235   :  { %3948 = vmatmul.msk.bf16.gmra.mxu0 %vm1315_vm0, %v4128_v16  ;;  %3993 = vmatmul.msk.bf16.gmra.mxu1 %vm1315_vm0, %v4173_v15 }
 0x236   :  { %4038 = vmatmul.msk.bf16.gmra.mxu2 %vm1315_vm0, %v4218_v37  ;;  %4083 = vmatmul.msk.bf16.gmra.mxu3 %vm1315_vm0, %v4263_v38 }
 0x239   :  { %v5776_v24 = vpop.f32.mrf.mxu2  ;;  %v5778_v43 = vpop.f32.mrf.mxu3 }
 0x23a   :  { %v3017_v49 = vmax.f32 %v5765_v6, %v5776_v24  ;;  %v2967_v25 = vmax.f32 %v5770_v62, %v5778_v43  ;;  %v1997_v42 = vpop.f32.mrf.mxu0  ;;  %v2222_v0 = vpop.f32.mrf.mxu1 }
 0x23b   :  { %v5787_v1 = vmax.f32 %v1997_v42, %v3038_v52  ;;  %v5792_v31 = vmax.f32 %v2222_v0, %v2928_v51  ;;  %v4219_v51 = vld [vmem:[%s6596_s0 + $0x3e8] sm:$0xff]  ;;  %v4264_v52 = vld [vmem:[%s6596_s0 + $0x550] sm:$0xff] }
 0x241   :  { %v5794_v16 = vpop.f32.mrf.mxu2  ;;  %v5796_v15 = vpop.f32.mrf.mxu3 }
 0x242   :  { %v3018_v57 = vmax.f32 %v5787_v1, %v5794_v16  ;;  %v2968_v58 = vmax.f32 %v5792_v31, %v5796_v15  ;;  %v2000_v17 = vpop.f32.mrf.mxu0  ;;  %v2225_v18 = vpop.f32.mrf.mxu1 }
 0x243   :  { %v5817_v37 = vmax.f32 %v2000_v17, %v3039_v46  ;;  %v5822_v38 = vmax.f32 %v2225_v18, %v2929_v45  ;;  %v6623_v45 = vmax.f32 %v5584_v12, %v5588_v27 }
 0x245   :  { %3949 = vmatmul.msk.bf16.gmra.mxu0 %vm1315_vm0, %v4129_v63  ;;  %3994 = vmatmul.msk.bf16.gmra.mxu1 %vm1315_vm0, %v4174_v60  ;;  %v6624_v63 = vmax.f32 %v5586_v34, %v5579_v48 }
 0x246   :  { %4039 = vmatmul.msk.bf16.gmra.mxu2 %vm1315_vm0, %v4219_v51  ;;  %4084 = vmatmul.msk.bf16.gmra.mxu3 %vm1315_vm0, %v4264_v52  ;;  %v4130_v51 = vld [vmem:[%s6596_s0 + $0x120] sm:$0xff]  ;;  %v4175_v52 = vld [vmem:[%s6596_s0 + $0x288] sm:$0xff] }
 0x249   :  { %v5828_v42 = vpop.f32.mrf.mxu2  ;;  %v5830_v0 = vpop.f32.mrf.mxu3 }
 0x24a   :  { %v3019_v40 = vmax.f32 %v5817_v37, %v5828_v42  ;;  %v2969_v39 = vmax.f32 %v5822_v38, %v5830_v0  ;;  %v2002_v21 = vpop.f32.mrf.mxu0  ;;  %v2227_v32 = vpop.f32.mrf.mxu1 }
 0x24b   :  { %v5839_v46 = vmax.f32 %v2002_v21, %v6623_v45  ;;  %v5844_v60 = vmax.f32 %v2227_v32, %v6624_v63  ;;  %v4220_v21 = vld [vmem:[%s6596_s0 + $0x3f0] sm:$0xff]  ;;  %v4265_v32 = vld [vmem:[%s6596_s0 + $0x558] sm:$0xff] }
 0x251   :  { %v5846_v17 = vpop.f32.mrf.mxu2  ;;  %v5848_v18 = vpop.f32.mrf.mxu3 }
 0x252   :  { %v2005_v34 = vpop.f32.mrf.mxu0  ;;  %v2230_v27 = vpop.f32.mrf.mxu1 }
 0x253   :  { %v5869_v45 = vmax.f32 %v2005_v34, %v3041_v7  ;;  %v5874_v63 = vmax.f32 %v2230_v27, %v2931_v8  ;;  %v6625_v8 = vmax.f32 %v5636_v56, %v5640_v20 }
 0x255   :  { %3950 = vmatmul.msk.bf16.gmra.mxu0 %vm1315_vm0, %v4130_v51  ;;  %3995 = vmatmul.msk.bf16.gmra.mxu1 %vm1315_vm0, %v4175_v52  ;;  %v6626_v51 = vmax.f32 %v5638_v19, %v5631_v14 }
 0x256   :  { %4040 = vmatmul.msk.bf16.gmra.mxu2 %vm1315_vm0, %v4220_v21  ;;  %4085 = vmatmul.msk.bf16.gmra.mxu3 %vm1315_vm0, %v4265_v32  ;;  %v4131_v21 = vld [vmem:[%s6596_s0 + $0x128] sm:$0xff]  ;;  %v4176_v32 = vld [vmem:[%s6596_s0 + $0x290] sm:$0xff] }
 0x259   :  { %v5880_v12 = vpop.f32.mrf.mxu2  ;;  %v5882_v48 = vpop.f32.mrf.mxu3 }
 0x25a   :  { %v3021_v53 = vmax.f32 %v5869_v45, %v5880_v12  ;;  %v2971_v29 = vmax.f32 %v5874_v63, %v5882_v48  ;;  %v2007_v47 = vpop.f32.mrf.mxu0  ;;  %v2232_v11 = vpop.f32.mrf.mxu1 }
 0x25b   :  { %v5891_v7 = vmax.f32 %v2007_v47, %v6625_v8  ;;  %v5896_v52 = vmax.f32 %v2232_v11, %v6626_v51  ;;  %v4221_v47 = vld [vmem:[%s6596_s0 + $0x3f8] sm:$0xff]  ;;  %v4266_v11 = vld [vmem:[%s6596_s0 + $0x560] sm:$0xff] }
 0x261   :  { %v5898_v34 = vpop.f32.mrf.mxu2  ;;  %v5900_v27 = vpop.f32.mrf.mxu3 }
 0x262   :  { %v2010_v19 = vpop.f32.mrf.mxu0  ;;  %v2235_v20 = vpop.f32.mrf.mxu1 }
 0x263   :  { %v5921_v8 = vmax.f32 %v2010_v19, %v3043_v50  ;;  %v5926_v51 = vmax.f32 %v2235_v20, %v2933_v26  ;;  %v6627_v26 = vmax.f32 %v5688_v36, %v5692_v4 }
 0x265   :  { %3951 = vmatmul.msk.bf16.gmra.mxu0 %vm1315_vm0, %v4131_v21  ;;  %3996 = vmatmul.msk.bf16.gmra.mxu1 %vm1315_vm0, %v4176_v32  ;;  %v6628_v21 = vmax.f32 %v5690_v3, %v5683_v2 }
 0x266   :  { %4041 = vmatmul.msk.bf16.gmra.mxu2 %vm1315_vm0, %v4221_v47  ;;  %4086 = vmatmul.msk.bf16.gmra.mxu3 %vm1315_vm0, %v4266_v11  ;;  %v4132_v47 = vld [vmem:[%s6596_s0 + $0x130] sm:$0xff]  ;;  %v4177_v11 = vld [vmem:[%s6596_s0 + $0x298] sm:$0xff] }
 0x269   :  { %v5932_v56 = vpop.f32.mrf.mxu2  ;;  %v5934_v14 = vpop.f32.mrf.mxu3 }
 0x26a   :  { %v3023_v5 = vmax.f32 %v5921_v8, %v5932_v56  ;;  %v2973_v61 = vmax.f32 %v5926_v51, %v5934_v14  ;;  %v2012_v13 = vpop.f32.mrf.mxu0  ;;  %v2237_v55 = vpop.f32.mrf.mxu1 }
 0x26b   :  { %v5943_v50 = vmax.f32 %v2012_v13, %v6627_v26  ;;  %v5948_v32 = vmax.f32 %v2237_v55, %v6628_v21  ;;  %v4222_v13 = vld [vmem:[%s6596_s0 + $0x400] sm:$0xff]  ;;  %v4267_v55 = vld [vmem:[%s6596_s0 + $0x568] sm:$0xff] }
 0x271   :  { %v5950_v19 = vpop.f32.mrf.mxu2  ;;  %v5952_v20 = vpop.f32.mrf.mxu3 }
 0x272   :  { %v2015_v3 = vpop.f32.mrf.mxu0  ;;  %v2240_v4 = vpop.f32.mrf.mxu1 }
 0x273   :  { %v5973_v26 = vmax.f32 %v2015_v3, %v2965_v59  ;;  %v5978_v21 = vmax.f32 %v2240_v4, %v3015_v41  ;;  %v4133_v3 = vld [vmem:[%s6596_s0 + $0x138] sm:$0xff]  ;;  %v4178_v4 = vld [vmem:[%s6596_s0 + $0x2a0] sm:$0xff] }
 0x275   :  { %3952 = vmatmul.msk.bf16.gmra.mxu0 %vm1315_vm0, %v4132_v47  ;;  %3997 = vmatmul.msk.bf16.gmra.mxu1 %vm1315_vm0, %v4177_v11 }
 0x276   :  { %4042 = vmatmul.msk.bf16.gmra.mxu2 %vm1315_vm0, %v4222_v13  ;;  %4087 = vmatmul.msk.bf16.gmra.mxu3 %vm1315_vm0, %v4267_v55 }
 0x279   :  { %v5984_v36 = vpop.f32.mrf.mxu2  ;;  %v5986_v2 = vpop.f32.mrf.mxu3 }
 0x27a   :  { %v2885_v23 = vmax.f32 %v5984_v36, %v5973_v26  ;;  %v2995_v44 = vmax.f32 %v5978_v21, %v5986_v2  ;;  %v2017_v30 = vpop.f32.mrf.mxu0  ;;  %v2242_v35 = vpop.f32.mrf.mxu1 }
 0x27b   :  { %v5995_v41 = vmax.f32 %v2017_v30, %v2966_v9  ;;  %v6000_v59 = vmax.f32 %v2242_v35, %v3016_v10  ;;  %v4223_v10 = vld [vmem:[%s6596_s0 + $0x408] sm:$0xff]  ;;  %v4268_v9 = vld [vmem:[%s6596_s0 + $0x570] sm:$0xff] }
 0x281   :  { %v6002_v47 = vpop.f32.mrf.mxu2  ;;  %v6004_v11 = vpop.f32.mrf.mxu3 }
 0x282   :  { %v2886_v33 = vmax.f32 %v6002_v47, %v5995_v41  ;;  %v2996_v22 = vmax.f32 %v6000_v59, %v6004_v11  ;;  %v2020_v54 = vpop.f32.mrf.mxu0  ;;  %v2245_v28 = vpop.f32.mrf.mxu1 }
 0x283   :  { %v6025_v13 = vmax.f32 %v2020_v54, %v2967_v25  ;;  %v6030_v55 = vmax.f32 %v2245_v28, %v3017_v49  ;;  %v4134_v54 = vld [vmem:[%s6596_s0 + $0x140] sm:$0xff]  ;;  %v4179_v28 = vld [vmem:[%s6596_s0 + $0x2a8] sm:$0xff] }
 0x285   :  { %3953 = vmatmul.msk.bf16.gmra.mxu0 %vm1315_vm0, %v4133_v3  ;;  %3998 = vmatmul.msk.bf16.gmra.mxu1 %vm1315_vm0, %v4178_v4 }
 0x286   :  { %4043 = vmatmul.msk.bf16.gmra.mxu2 %vm1315_vm0, %v4223_v10  ;;  %4088 = vmatmul.msk.bf16.gmra.mxu3 %vm1315_vm0, %v4268_v9 }
 0x289   :  { %v6036_v30 = vpop.f32.mrf.mxu2  ;;  %v6038_v35 = vpop.f32.mrf.mxu3 }
 0x28a   :  { %v2887_v62 = vmax.f32 %v6036_v30, %v6025_v13  ;;  %v2997_v6 = vmax.f32 %v6030_v55, %v6038_v35  ;;  %v2022_v24 = vpop.f32.mrf.mxu0  ;;  %v2247_v43 = vpop.f32.mrf.mxu1 }
 0x28b   :  { %v6047_v49 = vmax.f32 %v2022_v24, %v2968_v58  ;;  %v6052_v25 = vmax.f32 %v2247_v43, %v3018_v57  ;;  %v4224_v57 = vld [vmem:[%s6596_s0 + $0x410] sm:$0xff]  ;;  %v4269_v58 = vld [vmem:[%s6596_s0 + $0x578] sm:$0xff] }
 0x291   :  { %v6054_v3 = vpop.f32.mrf.mxu2  ;;  %v6056_v4 = vpop.f32.mrf.mxu3 }
 0x292   :  { %v2888_v31 = vmax.f32 %v6054_v3, %v6047_v49  ;;  %v2998_v1 = vmax.f32 %v6052_v25, %v6056_v4  ;;  %v2025_v16 = vpop.f32.mrf.mxu0  ;;  %v2250_v15 = vpop.f32.mrf.mxu1 }
 0x293   :  { %v6077_v10 = vmax.f32 %v2025_v16, %v2969_v39  ;;  %v6082_v9 = vmax.f32 %v2250_v15, %v3019_v40  ;;  %v6629_v40 = vmax.f32 %v5844_v60, %v5848_v18 }
 0x295   :  { %3954 = vmatmul.msk.bf16.gmra.mxu0 %vm1315_vm0, %v4134_v54  ;;  %3999 = vmatmul.msk.bf16.gmra.mxu1 %vm1315_vm0, %v4179_v28  ;;  %v6630_v54 = vmax.f32 %v5839_v46, %v5846_v17 }
 0x296   :  { %4044 = vmatmul.msk.bf16.gmra.mxu2 %vm1315_vm0, %v4224_v57  ;;  %4089 = vmatmul.msk.bf16.gmra.mxu3 %vm1315_vm0, %v4269_v58  ;;  %v4135_v57 = vld [vmem:[%s6596_s0 + $0x148] sm:$0xff]  ;;  %v4180_v58 = vld [vmem:[%s6596_s0 + $0x2b0] sm:$0xff] }
 0x299   :  { %v6088_v24 = vpop.f32.mrf.mxu2  ;;  %v6090_v43 = vpop.f32.mrf.mxu3 }
 0x29a   :  { %v2889_v38 = vmax.f32 %v6088_v24, %v6077_v10  ;;  %v2999_v37 = vmax.f32 %v6082_v9, %v6090_v43  ;;  %v2027_v42 = vpop.f32.mrf.mxu0  ;;  %v2252_v0 = vpop.f32.mrf.mxu1 }
 0x29b   :  { %v6099_v39 = vmax.f32 %v2027_v42, %v6629_v40  ;;  %v6104_v28 = vmax.f32 %v2252_v0, %v6630_v54  ;;  %v4225_v42 = vld [vmem:[%s6596_s0 + $0x418] sm:$0xff]  ;;  %v4270_v0 = vld [vmem:[%s6596_s0 + $0x580] sm:$0xff] }
 0x2a1   :  { %v6106_v16 = vpop.f32.mrf.mxu2  ;;  %v6108_v15 = vpop.f32.mrf.mxu3 }
 0x2a2   :  { %v2030_v17 = vpop.f32.mrf.mxu0  ;;  %v2255_v18 = vpop.f32.mrf.mxu1  ;;  %v6635_v9 = vmax.f32 %v6104_v28, %v6108_v15  ;;  %v6636_v10 = vmax.f32 %v6106_v16, %v6099_v39 }
 0x2a3   :  { %v6129_v40 = vmax.f32 %v2030_v17, %v2971_v29  ;;  %v6134_v54 = vmax.f32 %v2255_v18, %v3021_v53  ;;  %v6631_v53 = vmax.f32 %v5896_v52, %v5900_v27 }
 0x2a5   :  { %3955 = vmatmul.msk.bf16.gmra.mxu0 %vm1315_vm0, %v4135_v57  ;;  %4000 = vmatmul.msk.bf16.gmra.mxu1 %vm1315_vm0, %v4180_v58  ;;  %v6632_v57 = vmax.f32 %v5891_v7, %v5898_v34 }
 0x2a6   :  { %4045 = vmatmul.msk.bf16.gmra.mxu2 %vm1315_vm0, %v4225_v42  ;;  %4090 = vmatmul.msk.bf16.gmra.mxu3 %vm1315_vm0, %v4270_v0  ;;  %v4136_v42 = vld [vmem:[%s6596_s0 + $0x150] sm:$0xff]  ;;  %v4181_v0 = vld [vmem:[%s6596_s0 + $0x2b8] sm:$0xff] }
 0x2a9   :  { %v6140_v60 = vpop.f32.mrf.mxu2  ;;  %v6142_v46 = vpop.f32.mrf.mxu3 }
 0x2aa   :  { %v2891_v48 = vmax.f32 %v6140_v60, %v6129_v40  ;;  %v3001_v12 = vmax.f32 %v6134_v54, %v6142_v46  ;;  %v2032_v45 = vpop.f32.mrf.mxu0  ;;  %v2257_v63 = vpop.f32.mrf.mxu1 }
 0x2ab   :  { %v6151_v29 = vmax.f32 %v2032_v45, %v6631_v53  ;;  %v6156_v58 = vmax.f32 %v2257_v63, %v6632_v57  ;;  %v4226_v45 = vld [vmem:[%s6596_s0 + $0x420] sm:$0xff]  ;;  %v4271_v63 = vld [vmem:[%s6596_s0 + $0x588] sm:$0xff] }
 0x2b1   :  { %v6158_v17 = vpop.f32.mrf.mxu2  ;;  %v6160_v18 = vpop.f32.mrf.mxu3 }
 0x2b2   :  { %v2035_v34 = vpop.f32.mrf.mxu0  ;;  %v2260_v27 = vpop.f32.mrf.mxu1  ;;  %v6637_v46 = vmax.f32 %v6156_v58, %v6160_v18  ;;  %v6638_v60 = vmax.f32 %v6158_v17, %v6151_v29 }
 0x2b3   :  { %v6181_v53 = vmax.f32 %v2035_v34, %v2973_v61  ;;  %v6186_v57 = vmax.f32 %v2260_v27, %v3023_v5  ;;  %v6633_v5 = vmax.f32 %v5948_v32, %v5952_v20 }
 0x2b5   :  { %3956 = vmatmul.msk.bf16.gmra.mxu0 %vm1315_vm0, %v4136_v42  ;;  %4001 = vmatmul.msk.bf16.gmra.mxu1 %vm1315_vm0, %v4181_v0  ;;  %v6634_v42 = vmax.f32 %v5943_v50, %v5950_v19 }
 0x2b6   :  { %4046 = vmatmul.msk.bf16.gmra.mxu2 %vm1315_vm0, %v4226_v45  ;;  %4091 = vmatmul.msk.bf16.gmra.mxu3 %vm1315_vm0, %v4271_v63  ;;  %v4137_v45 = vld [vmem:[%s6596_s0 + $0x158] sm:$0xff]  ;;  %v4182_v63 = vld [vmem:[%s6596_s0 + $0x2c0] sm:$0xff] }
 0x2b9   :  { %v6192_v52 = vpop.f32.mrf.mxu2  ;;  %v6194_v7 = vpop.f32.mrf.mxu3 }
 0x2ba   :  { %v2893_v14 = vmax.f32 %v6192_v52, %v6181_v53  ;;  %v3003_v56 = vmax.f32 %v6186_v57, %v6194_v7  ;;  %v2037_v8 = vpop.f32.mrf.mxu0  ;;  %v2262_v51 = vpop.f32.mrf.mxu1 }
 0x2bb   :  { %v6203_v61 = vmax.f32 %v2037_v8, %v6633_v5  ;;  %v6208_v0 = vmax.f32 %v2262_v51, %v6634_v42  ;;  %v4227_v8 = vld [vmem:[%s6596_s0 + $0x428] sm:$0xff]  ;;  %v4272_v51 = vld [vmem:[%s6596_s0 + $0x590] sm:$0xff] }
 0x2c1   :  { %v6210_v34 = vpop.f32.mrf.mxu2  ;;  %v6212_v27 = vpop.f32.mrf.mxu3 }
 0x2c2   :  { %v2040_v19 = vpop.f32.mrf.mxu0  ;;  %v2265_v20 = vpop.f32.mrf.mxu1  ;;  %v6639_v7 = vmax.f32 %v6208_v0, %v6212_v27  ;;  %v6640_v52 = vmax.f32 %v6210_v34, %v6203_v61  ;;  %v6439_v34 = vld [vmem:[%s6597_s2] ss:$0 sm:$0xff] }
 0x2c3   :  { %v6233_v5 = vmax.f32 %v2995_v44, %v2040_v19  ;;  %v6238_v42 = vmax.f32 %v2885_v23, %v2265_v20  ;;  %v4138_v19 = vld [vmem:[%s6596_s0 + $0x160] sm:$0xff]  ;;  %v4183_v20 = vld [vmem:[%s6596_s0 + $0x2c8] sm:$0xff] }
 0x2c5   :  { %3957 = vmatmul.msk.bf16.gmra.mxu0 %vm1315_vm0, %v4137_v45  ;;  %4002 = vmatmul.msk.bf16.gmra.mxu1 %vm1315_vm0, %v4182_v63 }
 0x2c6   :  { %4047 = vmatmul.msk.bf16.gmra.mxu2 %vm1315_vm0, %v4227_v8  ;;  %4092 = vmatmul.msk.bf16.gmra.mxu3 %vm1315_vm0, %v4272_v51 }
 0x2c9   :  { %v6244_v32 = vpop.f32.mrf.mxu2  ;;  %v6246_v50 = vpop.f32.mrf.mxu3 }
 0x2ca   :  { %v2935_v2 = vmax.f32 %v6244_v32, %v6233_v5  ;;  %v3045_v36 = vmax.f32 %v6246_v50, %v6238_v42  ;;  %v2042_v26 = vpop.f32.mrf.mxu0  ;;  %v2267_v21 = vpop.f32.mrf.mxu1 }
 0x2cb   :  { %v6255_v23 = vmax.f32 %v2996_v22, %v2042_v26  ;;  %v6260_v44 = vmax.f32 %v2886_v33, %v2267_v21  ;;  %v4228_v33 = vld [vmem:[%s6596_s0 + $0x430] sm:$0xff]  ;;  %v4273_v22 = vld [vmem:[%s6596_s0 + $0x598] sm:$0xff] }
 0x2d1   :  { %v6262_v45 = vpop.f32.mrf.mxu2  ;;  %v6264_v63 = vpop.f32.mrf.mxu3 }
 0x2d2   :  { %v2936_v59 = vmax.f32 %v6262_v45, %v6255_v23  ;;  %v3046_v41 = vmax.f32 %v6264_v63, %v6260_v44  ;;  %v2045_v47 = vpop.f32.mrf.mxu0  ;;  %v2270_v11 = vpop.f32.mrf.mxu1 }
 0x2d3   :  { %v6285_v8 = vmax.f32 %v2997_v6, %v2045_v47  ;;  %v6290_v51 = vmax.f32 %v2887_v62, %v2270_v11 }
 0x2d5   :  { %3958 = vmatmul.msk.bf16.gmra.mxu0 %vm1315_vm0, %v4138_v19  ;;  %4003 = vmatmul.msk.bf16.gmra.mxu1 %vm1315_vm0, %v4183_v20 }
 0x2d6   :  { %4048 = vmatmul.msk.bf16.gmra.mxu2 %vm1315_vm0, %v4228_v33  ;;  %4093 = vmatmul.msk.bf16.gmra.mxu3 %vm1315_vm0, %v4273_v22 }
 0x2d9   :  { %v6296_v26 = vpop.f32.mrf.mxu2  ;;  %v6298_v21 = vpop.f32.mrf.mxu3 }
 0x2da   :  { %v2937_v55 = vmax.f32 %v6296_v26, %v6285_v8  ;;  %v3047_v13 = vmax.f32 %v6298_v21, %v6290_v51  ;;  %v2047_v30 = vpop.f32.mrf.mxu0  ;;  %v2272_v35 = vpop.f32.mrf.mxu1 }
 0x2db   :  { %v6307_v62 = vmax.f32 %v2998_v1, %v2047_v30  ;;  %v6312_v6 = vmax.f32 %v2888_v31, %v2272_v35 }
 0x2e1   :  { %v6314_v19 = vpop.f32.mrf.mxu2  ;;  %v6316_v20 = vpop.f32.mrf.mxu3 }
 0x2e2   :  { %v2938_v47 = vmax.f32 %v6314_v19, %v6307_v62  ;;  %v3048_v11 = vmax.f32 %v6316_v20, %v6312_v6  ;;  %v2050_v33 = vpop.f32.mrf.mxu0  ;;  %v2275_v22 = vpop.f32.mrf.mxu1 }
 0x2e3   :  { %v6325_v25 = vmax.f32 %v2999_v37, %v2050_v33  ;;  %v6330_v49 = vmax.f32 %v2889_v38, %v2275_v22 }
 0x2e9   :  { %v6332_v3 = vpop.f32.mrf.mxu2  ;;  %v6334_v4 = vpop.f32.mrf.mxu3 }
 0x2ea   :  { %v2052_v30 = vpop.f32.mrf.mxu0  ;;  %v2277_v35 = vpop.f32.mrf.mxu1  ;;  %v6641_v62 = vmax.f32 %v6334_v4, %v6330_v49 }
 0x2eb   :  { %v6343_v43 = vmax.f32 %v6635_v9, %v2052_v30  ;;  %v6348_v24 = vmax.f32 %v6636_v10, %v2277_v35 }
 0x2f1   :  { %v6350_v38 = vpop.f32.mrf.mxu2  ;;  %v6352_v37 = vpop.f32.mrf.mxu3 }
 0x2f2   :  { %v2940_v33 = vmax.f32 %v6350_v38, %v6343_v43  ;;  %v3050_v22 = vmax.f32 %v6352_v37, %v6348_v24  ;;  %v2055_v31 = vpop.f32.mrf.mxu0  ;;  %v2280_v1 = vpop.f32.mrf.mxu1 }
 0x2f3   :  { %v6361_v28 = vmax.f32 %v3001_v12, %v2055_v31  ;;  %v6366_v39 = vmax.f32 %v2891_v48, %v2280_v1 }
 0x2f9   :  { %v6368_v16 = vpop.f32.mrf.mxu2  ;;  %v6370_v15 = vpop.f32.mrf.mxu3 }
 0x2fa   :  { %v2057_v9 = vpop.f32.mrf.mxu0  ;;  %v2282_v10 = vpop.f32.mrf.mxu1  ;;  %v6643_v43 = vmax.f32 %v6370_v15, %v6366_v39 }
 0x2fb   :  { %v6379_v54 = vmax.f32 %v6637_v46, %v2057_v9  ;;  %v6384_v40 = vmax.f32 %v6638_v60, %v2282_v10 }
 0x301   :  { %v6386_v48 = vpop.f32.mrf.mxu2  ;;  %v6388_v12 = vpop.f32.mrf.mxu3 }
 0x302   :  { %v2942_v31 = vmax.f32 %v6386_v48, %v6379_v54  ;;  %v3052_v1 = vmax.f32 %v6388_v12, %v6384_v40  ;;  %v2060_v30 = vpop.f32.mrf.mxu0  ;;  %v2285_v35 = vpop.f32.mrf.mxu1 }
 0x303   :  { %v6397_v58 = vmax.f32 %v3003_v56, %v2060_v30  ;;  %v6402_v29 = vmax.f32 %v2893_v14, %v2285_v35 }
 0x309   :  { %v6404_v17 = vpop.f32.mrf.mxu2  ;;  %v6406_v18 = vpop.f32.mrf.mxu3 }
 0x30a   :  { %v2062_v46 = vpop.f32.mrf.mxu0  ;;  %v2287_v60 = vpop.f32.mrf.mxu1  ;;  %v6645_v54 = vmax.f32 %v6406_v18, %v6402_v29 }
 0x30b   :  { %v6415_v57 = vmax.f32 %v6639_v7, %v2062_v46  ;;  %v6420_v53 = vmax.f32 %v6640_v52, %v2287_v60 }
 0x311   :  { %v6422_v14 = vpop.f32.mrf.mxu2  ;;  %v6424_v56 = vpop.f32.mrf.mxu3 }
 0x312   :  { %v2065_v9 = vpop.f32.mrf.mxu0  ;;  %v2290_v10 = vpop.f32.mrf.mxu1 }
 0x313   :  { %v3065_v0 = vmax.f32 %v2065_v9, %v3045_v36  ;;  %v3075_v61 = vmax.f32 %v2290_v10, %v2935_v2 }
 0x319   :  { %v2515_v27 = vpop.f32.mrf.mxu2  ;;  %v2740_v46 = vpop.f32.mrf.mxu3 }
 0x31a   :  { %v3085_v60 = vmax.f32 %v3065_v0, %v2515_v27  ;;  %v3095_v7 = vmax.f32 %v3075_v61, %v2740_v46  ;;  %v2067_v52 = vpop.f32.mrf.mxu0  ;;  %v2292_v30 = vpop.f32.mrf.mxu1 }
 0x31b   :  { %v3066_v32 = vmax.f32 %v2067_v52, %v3046_v41  ;;  %v3076_v5 = vmax.f32 %v2292_v30, %v2936_v59 }
 0x31c   :  { %v3109_v35 = vadd.f32 %v6439_v34, %v3085_v60  ;;  %v3119_v50 = vadd.f32 %v6439_v34, %v3095_v7 }
 0x31e   :  { %v3129_v42 = vmax.f32 %v3109_v35, 0.0  ;;  %v3139_v36 = vmax.f32 %v3119_v50, 0.0 }
 0x320   :  { %3150 = vst.msk [vmem:[%s6598_s3] sm:$0xff] %vm3149_vm1, %v3129_v42 }
 0x321   :  { %3160 = vst.msk [vmem:[%s6598_s3 + $0x50] sm:$0xff] %vm3149_vm1, %v3139_v36  ;;  %v2517_v2 = vpop.f32.mrf.mxu2  ;;  %v2742_v9 = vpop.f32.mrf.mxu3 }
 0x322   :  { %v3086_v10 = vmax.f32 %v3066_v32, %v2517_v2  ;;  %v3096_v35 = vmax.f32 %v3076_v5, %v2742_v9  ;;  %v2070_v0 = vpop.f32.mrf.mxu0  ;;  %v2295_v61 = vpop.f32.mrf.mxu1 }
 0x323   :  { %v3067_v23 = vmax.f32 %v2070_v0, %v3047_v13  ;;  %v3077_v45 = vmax.f32 %v2295_v61, %v2937_v55 }
 0x324   :  { %v3110_v27 = vadd.f32 %v6439_v34, %v3086_v10  ;;  %v3120_v44 = vadd.f32 %v6439_v34, %v3096_v35 }
 0x326   :  { %v3130_v63 = vmax.f32 %v3110_v27, 0.0  ;;  %v3140_v41 = vmax.f32 %v3120_v44, 0.0 }
 0x328   :  { %3151 = vst.msk [vmem:[%s6598_s3 + $0x8] sm:$0xff] %vm3149_vm1, %v3130_v63 }
 0x329   :  { %3161 = vst.msk [vmem:[%s6598_s3 + $0x58] sm:$0xff] %vm3149_vm1, %v3140_v41  ;;  %v2520_v59 = vpop.f32.mrf.mxu2  ;;  %v2745_v30 = vpop.f32.mrf.mxu3 }
 0x32a   :  { %v3087_v46 = vmax.f32 %v3067_v23, %v2520_v59  ;;  %v3097_v60 = vmax.f32 %v3077_v45, %v2745_v30  ;;  %v2072_v7 = vpop.f32.mrf.mxu0  ;;  %v2297_v52 = vpop.f32.mrf.mxu1 }
 0x32b   :  { %v3068_v8 = vmax.f32 %v2072_v7, %v3048_v11  ;;  %v3078_v26 = vmax.f32 %v2297_v52, %v2938_v47  ;;  %v6642_v47 = vmax.f32 %v6332_v3, %v6325_v25 }
 0x32c   :  { %v3111_v50 = vadd.f32 %v6439_v34, %v3087_v46  ;;  %v3121_v51 = vadd.f32 %v6439_v34, %v3097_v60 }
 0x32e   :  { %v3131_v21 = vmax.f32 %v3111_v50, 0.0  ;;  %v3141_v13 = vmax.f32 %v3121_v51, 0.0 }
 0x330   :  { %3152 = vst.msk [vmem:[%s6598_s3 + $0x10] sm:$0xff] %vm3149_vm1, %v3131_v21 }
 0x331   :  { %3162 = vst.msk [vmem:[%s6598_s3 + $0x60] sm:$0xff] %vm3149_vm1, %v3141_v13  ;;  %v2522_v55 = vpop.f32.mrf.mxu2  ;;  %v2747_v42 = vpop.f32.mrf.mxu3 }
 0x332   :  { %v3088_v36 = vmax.f32 %v3068_v8, %v2522_v55  ;;  %v3098_v32 = vmax.f32 %v3078_v26, %v2747_v42  ;;  %v2075_v5 = vpop.f32.mrf.mxu0  ;;  %v2300_v2 = vpop.f32.mrf.mxu1 }
 0x333   :  { %v3069_v19 = vmax.f32 %v2075_v5, %v6641_v62  ;;  %v3079_v10 = vmax.f32 %v2300_v2, %v6642_v47 }
 0x334   :  { %v3112_v9 = vadd.f32 %v6439_v34, %v3088_v36  ;;  %v3122_v6 = vadd.f32 %v6439_v34, %v3098_v32 }
 0x336   :  { %v3132_v20 = vmax.f32 %v3112_v9, 0.0  ;;  %v3142_v11 = vmax.f32 %v3122_v6, 0.0 }
 0x338   :  { %3153 = vst.msk [vmem:[%s6598_s3 + $0x18] sm:$0xff] %vm3149_vm1, %v3132_v20 }
 0x339   :  { %3163 = vst.msk [vmem:[%s6598_s3 + $0x68] sm:$0xff] %vm3149_vm1, %v3142_v11  ;;  %v2525_v35 = vpop.f32.mrf.mxu2  ;;  %v2750_v0 = vpop.f32.mrf.mxu3 }
 0x33a   :  { %v3089_v61 = vmax.f32 %v3069_v19, %v2525_v35  ;;  %v3099_v27 = vmax.f32 %v3079_v10, %v2750_v0  ;;  %v2077_v44 = vpop.f32.mrf.mxu0  ;;  %v2302_v63 = vpop.f32.mrf.mxu1 }
 0x33b   :  { %v3070_v25 = vmax.f32 %v2077_v44, %v3050_v22  ;;  %v3080_v3 = vmax.f32 %v2302_v63, %v2940_v33  ;;  %v6644_v33 = vmax.f32 %v6368_v16, %v6361_v28  ;;  %v6648_v63 = vmax.f32 %v6422_v14, %v6415_v57 }
 0x33c   :  { %v3113_v41 = vadd.f32 %v6439_v34, %v3089_v61  ;;  %v3123_v49 = vadd.f32 %v6439_v34, %v3099_v27 }
 0x33e   :  { %v3133_v4 = vmax.f32 %v3113_v41, 0.0  ;;  %v3143_v23 = vmax.f32 %v3123_v49, 0.0 }
 0x340   :  { %3154 = vst.msk [vmem:[%s6598_s3 + $0x20] sm:$0xff] %vm3149_vm1, %v3133_v4 }
 0x341   :  { %3164 = vst.msk [vmem:[%s6598_s3 + $0x70] sm:$0xff] %vm3149_vm1, %v3143_v23  ;;  %v2527_v45 = vpop.f32.mrf.mxu2  ;;  %v2752_v59 = vpop.f32.mrf.mxu3 }
 0x342   :  { %v3090_v30 = vmax.f32 %v3070_v25, %v2527_v45  ;;  %v3100_v46 = vmax.f32 %v3080_v3, %v2752_v59  ;;  %v2080_v60 = vpop.f32.mrf.mxu0  ;;  %v2305_v7 = vpop.f32.mrf.mxu1 }
 0x343   :  { %v3071_v38 = vmax.f32 %v2080_v60, %v6643_v43  ;;  %v3081_v50 = vmax.f32 %v2305_v7, %v6644_v33 }
 0x344   :  { %v3114_v52 = vadd.f32 %v6439_v34, %v3090_v30  ;;  %v3124_v24 = vadd.f32 %v6439_v34, %v3100_v46 }
 0x346   :  { %v3134_v37 = vmax.f32 %v3114_v52, 0.0  ;;  %v3144_v22 = vmax.f32 %v3124_v24, 0.0 }
 0x348   :  { %3155 = vst.msk [vmem:[%s6598_s3 + $0x28] sm:$0xff] %vm3149_vm1, %v3134_v37 }
 0x349   :  { %3165 = vst.msk [vmem:[%s6598_s3 + $0x78] sm:$0xff] %vm3149_vm1, %v3144_v22  ;;  %v2530_v51 = vpop.f32.mrf.mxu2  ;;  %v2755_v21 = vpop.f32.mrf.mxu3 }
 0x34a   :  { %v3091_v13 = vmax.f32 %v3071_v38, %v2530_v51  ;;  %v3101_v8 = vmax.f32 %v3081_v50, %v2755_v21  ;;  %v2082_v26 = vpop.f32.mrf.mxu0  ;;  %v2307_v55 = vpop.f32.mrf.mxu1 }
 0x34b   :  { %v3072_v28 = vmax.f32 %v2082_v26, %v3052_v1  ;;  %v3082_v16 = vmax.f32 %v2307_v55, %v2942_v31  ;;  %v6646_v31 = vmax.f32 %v6404_v17, %v6397_v58  ;;  %v6647_v58 = vmax.f32 %v6424_v56, %v6420_v53 }
 0x34c   :  { %v3115_v42 = vadd.f32 %v6439_v34, %v3091_v13  ;;  %v3125_v39 = vadd.f32 %v6439_v34, %v3101_v8 }
 0x34e   :  { %v3135_v15 = vmax.f32 %v3115_v42, 0.0  ;;  %v3145_v36 = vmax.f32 %v3125_v39, 0.0 }
 0x350   :  { %3156 = vst.msk [vmem:[%s6598_s3 + $0x30] sm:$0xff] %vm3149_vm1, %v3135_v15 }
 0x351   :  { %3166 = vst.msk [vmem:[%s6598_s3 + $0x80] sm:$0xff] %vm3149_vm1, %v3145_v36  ;;  %v2532_v32 = vpop.f32.mrf.mxu2  ;;  %v2757_v5 = vpop.f32.mrf.mxu3 }
 0x352   :  { %v3092_v2 = vmax.f32 %v3072_v28, %v2532_v32  ;;  %v3102_v9 = vmax.f32 %v3082_v16, %v2757_v5  ;;  %v2085_v6 = vpop.f32.mrf.mxu0  ;;  %v2310_v20 = vpop.f32.mrf.mxu1 }
 0x353   :  { %v3073_v48 = vmax.f32 %v2085_v6, %v6645_v54  ;;  %v3083_v62 = vmax.f32 %v2310_v20, %v6646_v31 }
 0x354   :  { %v3116_v11 = vadd.f32 %v6439_v34, %v3092_v2  ;;  %v3126_v40 = vadd.f32 %v6439_v34, %v3102_v9 }
 0x356   :  { %v3136_v12 = vmax.f32 %v3116_v11, 0.0  ;;  %v3146_v1 = vmax.f32 %v3126_v40, 0.0 }
 0x358   :  { %3157 = vst.msk [vmem:[%s6598_s3 + $0x38] sm:$0xff] %vm3149_vm1, %v3136_v12 }
 0x359   :  { %3167 = vst.msk [vmem:[%s6598_s3 + $0x88] sm:$0xff] %vm3149_vm1, %v3146_v1  ;;  %v2535_v19 = vpop.f32.mrf.mxu2  ;;  %v2760_v47 = vpop.f32.mrf.mxu3 }
 0x35a   :  { %v3093_v10 = vmax.f32 %v3073_v48, %v2535_v19  ;;  %v3103_v35 = vmax.f32 %v3083_v62, %v2760_v47  ;;  %v2087_v27 = vpop.f32.mrf.mxu0  ;;  %v2312_v29 = vpop.f32.mrf.mxu1 }
 0x35b   :  { %v3074_v17 = vmax.f32 %v2087_v27, %v6647_v58  ;;  %v3084_v41 = vmax.f32 %v2312_v29, %v6648_v63 }
 0x35c   :  { %v3117_v0 = vadd.f32 %v6439_v34, %v3093_v10  ;;  %v3127_v61 = vadd.f32 %v6439_v34, %v3103_v35 }
 0x35e   :  { %v3137_v18 = vmax.f32 %v3117_v0, 0.0  ;;  %v3147_v44 = vmax.f32 %v3127_v61, 0.0 }
 0x360   :  { %3158 = vst.msk [vmem:[%s6598_s3 + $0x40] sm:$0xff] %vm3149_vm1, %v3137_v18 }
 0x361   :  { %3168 = vst.msk [vmem:[%s6598_s3 + $0x90] sm:$0xff] %vm3149_vm1, %v3147_v44  ;;  %v2537_v49 = vpop.f32.mrf.mxu2  ;;  %v2762_v4 = vpop.f32.mrf.mxu3 }
 0x362   :  { %v3094_v23 = vmax.f32 %v3074_v17, %v2537_v49  ;;  %v3104_v25 = vmax.f32 %v3084_v41, %v2762_v4 }
 0x364   :  { %v3118_v3 = vadd.f32 %v6439_v34, %v3094_v23  ;;  %v3128_v45 = vadd.f32 %v6439_v34, %v3104_v25 }
 0x366   :  { %v3138_v59 = vmax.f32 %v3118_v3, 0.0  ;;  %v3148_v53 = vmax.f32 %v3128_v45, 0.0 }
 0x368   :  { %3159 = vst.msk [vmem:[%s6598_s3 + $0x48] sm:$0xff] %vm3149_vm1, %v3138_v59 }
 0x369   :  { %3169 = vst.msk [vmem:[%s6598_s3 + $0x98] sm:$0xff] %vm3149_vm1, %v3148_v53 }

// kernel: forward.3
= control target key start
LH: loop header
LB: loop body
LE: loop exit
PB: predicated region body
PF: predicated region fallthrough
CT: control target
= control target key end

     0   :  { %vm2554_vm0 = vcmask 1041408   ;;  %vm2584_vm4 = vcmask 1024   ;;  %s6284_s1 = inlined_call_operand.vmem [shape: bf16[2560,256], index: 1, kind: input, shape index: {}]   ;;  %s6285_s0 = inlined_call_operand.vmem [shape: f32[2,2560], index: 0, kind: input, shape index: {}]   ;;  %s6286_s2 = inlined_call_operand.vmem [shape: f32[1,256], index: 2, kind: input, shape index: {}]   ;;  %s6287_s4 = inlined_call_operand.<no memory space> [shape: f32[1,1], index: 4, kind: input, shape index: {}]   ;;  %s6288_s3 = inlined_call_operand.vmem [shape: f32[1,256], index: 3, kind: input, shape index: {}]   ;;  %s6289_s5 = inlined_call_operand.vmem [shape: f32[2,1], index: 5, kind: output, shape index: {}]  }
   0x1   :  { %v2648_v0 = vld [vmem:[%s6284_s1 + $0x70] sm:$0xf]  ;;  %v3885_v1 = vld [vmem:[%s6284_s1 + $0x74] sm:$0xf0]  ;;  %v2640_v11 = vld [vmem:[%s6284_s1 + $0x60] sm:$0xf] }
   0x2   :  { %v2712_v2 = vld [vmem:[%s6284_s1 + $0xf0] sm:$0xf]  ;;  %v2649_v3 = vor.u32 %v3885_v1, %v2648_v0  ;;  %v3901_v4 = vld [vmem:[%s6284_s1 + $0xf4] sm:$0xf0]  ;;  %v3883_v13 = vld [vmem:[%s6284_s1 + $0x64] sm:$0xf0] }
   0x3   :  { %v2776_v5 = vld [vmem:[%s6284_s1 + $0x170] sm:$0xf]  ;;  %v3917_v6 = vld [vmem:[%s6284_s1 + $0x174] sm:$0xf0]  ;;  %v2713_v7 = vor.u32 %v3901_v4, %v2712_v2  ;;  %v2704_v14 = vld [vmem:[%s6284_s1 + $0xe0] sm:$0xf]  ;;  %v2641_v16 = vor.u32 %v3883_v13, %v2640_v11 }
   0x4   :  { %v2777_v8 = vor.u32 %v3917_v6, %v2776_v5  ;;  %v2840_v9 = vld [vmem:[%s6284_s1 + $0x1f0] sm:$0xf]  ;;  %v3933_v10 = vld [vmem:[%s6284_s1 + $0x1f4] sm:$0xf0]  ;;  %2024 = vmatpush.bf16.msra.mxu0 %v2649_v3  ;;  %v3899_v15 = vld [vmem:[%s6284_s1 + $0xe4] sm:$0xf0] }
   0x5   :  { %v2841_v12 = vor.u32 %v3933_v10, %v2840_v9  ;;  %2037 = vmatpush.bf16.msra.mxu1 %v2713_v7  ;;  %v2705_v17 = vor.u32 %v3899_v15, %v2704_v14  ;;  %v2768_v18 = vld [vmem:[%s6284_s1 + $0x160] sm:$0xf]  ;;  %v3915_v19 = vld [vmem:[%s6284_s1 + $0x164] sm:$0xf0]  ;;  %v2632_v23 = vld [vmem:[%s6284_s1 + $0x50] sm:$0xf] }
   0x6   :  { %2050 = vmatpush.bf16.msra.mxu2 %v2777_v8  ;;  %v2832_v20 = vld [vmem:[%s6284_s1 + $0x1e0] sm:$0xf]  ;;  %v2769_v21 = vor.u32 %v3915_v19, %v2768_v18  ;;  %v3931_v22 = vld [vmem:[%s6284_s1 + $0x1e4] sm:$0xf0]  ;;  %v3881_v24 = vld [vmem:[%s6284_s1 + $0x54] sm:$0xf0] }
   0x7   :  { %2063 = vmatpush.bf16.msra.mxu3 %v2841_v12  ;;  %v2833_v25 = vor.u32 %v3931_v22, %v2832_v20  ;;  %v2696_v26 = vld [vmem:[%s6284_s1 + $0xd0] sm:$0xf]  ;;  %v3897_v27 = vld [vmem:[%s6284_s1 + $0xd4] sm:$0xf0]  ;;  %v2633_v29 = vor.u32 %v3881_v24, %v2632_v23  ;;  %v2624_v35 = vld [vmem:[%s6284_s1 + $0x40] sm:$0xf] }
   0x8   :  { %v2760_v28 = vld [vmem:[%s6284_s1 + $0x150] sm:$0xf]  ;;  %2025 = vmatpush.bf16.msra.mxu0 %v2641_v16  ;;  %v3913_v30 = vld [vmem:[%s6284_s1 + $0x154] sm:$0xf0]  ;;  %v2697_v33 = vor.u32 %v3897_v27, %v2696_v26  ;;  %v3879_v36 = vld [vmem:[%s6284_s1 + $0x44] sm:$0xf0] }
   0x9   :  { %v2824_v31 = vld [vmem:[%s6284_s1 + $0x1d0] sm:$0xf]  ;;  %v3929_v32 = vld [vmem:[%s6284_s1 + $0x1d4] sm:$0xf0]  ;;  %2038 = vmatpush.bf16.msra.mxu1 %v2705_v17  ;;  %v2761_v34 = vor.u32 %v3913_v30, %v2760_v28  ;;  %v2688_v37 = vld [vmem:[%s6284_s1 + $0xc0] sm:$0xf]  ;;  %v2625_v44 = vor.u32 %v3879_v36, %v2624_v35 }
   0xa   :  { %2051 = vmatpush.bf16.msra.mxu2 %v2769_v21  ;;  %v2825_v38 = vor.u32 %v3929_v32, %v2824_v31  ;;  %v3895_v39 = vld [vmem:[%s6284_s1 + $0xc4] sm:$0xf0]  ;;  %v2752_v40 = vld [vmem:[%s6284_s1 + $0x140] sm:$0xf]  ;;  %v2616_v47 = vld [vmem:[%s6284_s1 + $0x30] sm:$0xf] }
   0xb   :  { %2064 = vmatpush.bf16.msra.mxu3 %v2833_v25  ;;  %v3911_v41 = vld [vmem:[%s6284_s1 + $0x144] sm:$0xf0]  ;;  %v2816_v42 = vld [vmem:[%s6284_s1 + $0x1c0] sm:$0xf]  ;;  %v2689_v45 = vor.u32 %v3895_v39, %v2688_v37  ;;  %v3877_v48 = vld [vmem:[%s6284_s1 + $0x34] sm:$0xf0] }
   0xc   :  { %v3927_v43 = vld [vmem:[%s6284_s1 + $0x1c4] sm:$0xf0]  ;;  %2026 = vmatpush.bf16.msra.mxu0 %v2633_v29  ;;  %v2753_v46 = vor.u32 %v3911_v41, %v2752_v40  ;;  %v2680_v49 = vld [vmem:[%s6284_s1 + $0xb0] sm:$0xf]  ;;  %v3893_v51 = vld [vmem:[%s6284_s1 + $0xb4] sm:$0xf0]  ;;  %v2617_v56 = vor.u32 %v3877_v48, %v2616_v47 }
   0xd   :  { %2039 = vmatpush.bf16.msra.mxu1 %v2697_v33  ;;  %v2817_v50 = vor.u32 %v3927_v43, %v2816_v42  ;;  %v2744_v52 = vld [vmem:[%s6284_s1 + $0x130] sm:$0xf]  ;;  %v3909_v53 = vld [vmem:[%s6284_s1 + $0x134] sm:$0xf0]  ;;  %v2681_v57 = vor.u32 %v3893_v51, %v2680_v49  ;;  %v2608_v59 = vld [vmem:[%s6284_s1 + $0x20] sm:$0xf] }
   0xe   :  { %2052 = vmatpush.bf16.msra.mxu2 %v2761_v34  ;;  %v2808_v54 = vld [vmem:[%s6284_s1 + $0x1b0] sm:$0xf]  ;;  %v3925_v55 = vld [vmem:[%s6284_s1 + $0x1b4] sm:$0xf0]  ;;  %v2745_v58 = vor.u32 %v3909_v53, %v2744_v52  ;;  %v3875_v60 = vld [vmem:[%s6284_s1 + $0x24] sm:$0xf0] }
   0xf   :  { %2065 = vmatpush.bf16.msra.mxu3 %v2825_v38  ;;  %v2672_v61 = vld [vmem:[%s6284_s1 + $0xa0] sm:$0xf]  ;;  %v2809_v62 = vor.u32 %v3925_v55, %v2808_v54  ;;  %v3891_v63 = vld [vmem:[%s6284_s1 + $0xa4] sm:$0xf0]  ;;  %v2609_v4 = vor.u32 %v3875_v60, %v2608_v59  ;;  %v2600_v7 = vld [vmem:[%s6284_s1 + $0x10] sm:$0xf] }
  0x10   :  { %2027 = vmatpush.bf16.msra.mxu0 %v2625_v44  ;;  %v2736_v0 = vld [vmem:[%s6284_s1 + $0x120] sm:$0xf]  ;;  %v3907_v1 = vld [vmem:[%s6284_s1 + $0x124] sm:$0xf0]  ;;  %v2673_v5 = vor.u32 %v3891_v63, %v2672_v61  ;;  %v3873_v8 = vld [vmem:[%s6284_s1 + $0x14] sm:$0xf0] }
  0x11   :  { %2040 = vmatpush.bf16.msra.mxu1 %v2689_v45  ;;  %v2800_v2 = vld [vmem:[%s6284_s1 + $0x1a0] sm:$0xf]  ;;  %v3923_v3 = vld [vmem:[%s6284_s1 + $0x1a4] sm:$0xf0]  ;;  %v2737_v6 = vor.u32 %v3907_v1, %v2736_v0  ;;  %v2664_v9 = vld [vmem:[%s6284_s1 + $0x90] sm:$0xf]  ;;  %v2601_v16 = vor.u32 %v3873_v8, %v2600_v7 }
  0x12   :  { %2053 = vmatpush.bf16.msra.mxu2 %v2753_v46  ;;  %v2801_v10 = vor.u32 %v3923_v3, %v2800_v2  ;;  %v3889_v11 = vld [vmem:[%s6284_s1 + $0x94] sm:$0xf0]  ;;  %v2728_v12 = vld [vmem:[%s6284_s1 + $0x110] sm:$0xf]  ;;  %v2592_v17 = vld [vmem:[%s6284_s1] sm:$0xf] }
  0x13   :  { %2066 = vmatpush.bf16.msra.mxu3 %v2817_v50  ;;  %v3905_v13 = vld [vmem:[%s6284_s1 + $0x114] sm:$0xf0]  ;;  %v2792_v14 = vld [vmem:[%s6284_s1 + $0x190] sm:$0xf]  ;;  %v3871_v18 = vld [vmem:[%s6284_s1 + $0x4] sm:$0xf0]  ;;  %v2665_v19 = vor.u32 %v3889_v11, %v2664_v9 }
  0x14   :  { %2028 = vmatpush.bf16.msra.mxu0 %v2617_v56  ;;  %v3921_v15 = vld [vmem:[%s6284_s1 + $0x194] sm:$0xf0]  ;;  %v2729_v20 = vor.u32 %v3905_v13, %v2728_v12  ;;  %v2656_v21 = vld [vmem:[%s6284_s1 + $0x80] sm:$0xf]  ;;  %v3887_v22 = vld [vmem:[%s6284_s1 + $0x84] sm:$0xf0]  ;;  %v2593_v31 = vor.u32 %v3871_v18, %v2592_v17 }
  0x15   :  { %2041 = vmatpush.bf16.msra.mxu1 %v2681_v57  ;;  %v2720_v23 = vld [vmem:[%s6284_s1 + $0x100] sm:$0xf]  ;;  %v2793_v24 = vor.u32 %v3921_v15, %v2792_v14  ;;  %v3903_v25 = vld [vmem:[%s6284_s1 + $0x104] sm:$0xf0]  ;;  %v2904_v28 = vld [vmem:[%s6284_s1 + $0x270] sm:$0xf]  ;;  %v2657_v35 = vor.u32 %v3887_v22, %v2656_v21 }
  0x16   :  { %2054 = vmatpush.bf16.msra.mxu2 %v2745_v58  ;;  %v2784_v26 = vld [vmem:[%s6284_s1 + $0x180] sm:$0xf]  ;;  %v3919_v27 = vld [vmem:[%s6284_s1 + $0x184] sm:$0xf0]  ;;  %v3949_v29 = vld [vmem:[%s6284_s1 + $0x274] sm:$0xf0]  ;;  %v2721_v36 = vor.u32 %v3903_v25, %v2720_v23 }
  0x17   :  { %2067 = vmatpush.bf16.msra.mxu3 %v2809_v62  ;;  %v2968_v30 = vld [vmem:[%s6284_s1 + $0x2f0] sm:$0xf]  ;;  %v3965_v32 = vld [vmem:[%s6284_s1 + $0x2f4] sm:$0xf0]  ;;  %v2785_v39 = vor.u32 %v3919_v27, %v2784_v26  ;;  %v2905_v40 = vor.u32 %v3949_v29, %v2904_v28  ;;  %v2896_v43 = vld [vmem:[%s6284_s1 + $0x260] sm:$0xf] }
  0x18   :  { %2029 = vmatpush.bf16.msra.mxu0 %v2609_v4  ;;  %v3032_v33 = vld [vmem:[%s6284_s1 + $0x370] sm:$0xf]  ;;  %v3981_v34 = vld [vmem:[%s6284_s1 + $0x374] sm:$0xf0]  ;;  %v2969_v41 = vor.u32 %v3965_v32, %v2968_v30  ;;  %v3947_v44 = vld [vmem:[%s6284_s1 + $0x264] sm:$0xf0] }
  0x19   :  { %2042 = vmatpush.bf16.msra.mxu1 %v2673_v5  ;;  %v3096_v37 = vld [vmem:[%s6284_s1 + $0x3f0] sm:$0xf]  ;;  %v3997_v38 = vld [vmem:[%s6284_s1 + $0x3f4] sm:$0xf0]  ;;  %v3033_v42 = vor.u32 %v3981_v34, %v3032_v33  ;;  %v2960_v45 = vld [vmem:[%s6284_s1 + $0x2e0] sm:$0xf]  ;;  %v2897_v52 = vor.u32 %v3947_v44, %v2896_v43 }
  0x1a   :  { %2055 = vmatpush.bf16.msra.mxu2 %v2737_v6  ;;  %v3097_v46 = vor.u32 %v3997_v38, %v3096_v37  ;;  %v3963_v47 = vld [vmem:[%s6284_s1 + $0x2e4] sm:$0xf0]  ;;  %v3024_v48 = vld [vmem:[%s6284_s1 + $0x360] sm:$0xf]  ;;  %v2888_v55 = vld [vmem:[%s6284_s1 + $0x250] sm:$0xf] }
  0x1b   :  { %2068 = vmatpush.bf16.msra.mxu3 %v2801_v10  ;;  %v3979_v49 = vld [vmem:[%s6284_s1 + $0x364] sm:$0xf0]  ;;  %v3088_v50 = vld [vmem:[%s6284_s1 + $0x3e0] sm:$0xf]  ;;  %v2961_v53 = vor.u32 %v3963_v47, %v2960_v45  ;;  %v3945_v56 = vld [vmem:[%s6284_s1 + $0x254] sm:$0xf0] }
  0x1c   :  { %2030 = vmatpush.bf16.msra.mxu0 %v2601_v16  ;;  %v3995_v51 = vld [vmem:[%s6284_s1 + $0x3e4] sm:$0xf0]  ;;  %v3025_v54 = vor.u32 %v3979_v49, %v3024_v48  ;;  %v2952_v57 = vld [vmem:[%s6284_s1 + $0x2d0] sm:$0xf]  ;;  %v3961_v59 = vld [vmem:[%s6284_s1 + $0x2d4] sm:$0xf0]  ;;  %v2889_v0 = vor.u32 %v3945_v56, %v2888_v55 }
  0x1d   :  { %2043 = vmatpush.bf16.msra.mxu1 %v2665_v19  ;;  %v3089_v58 = vor.u32 %v3995_v51, %v3088_v50  ;;  %v3016_v60 = vld [vmem:[%s6284_s1 + $0x350] sm:$0xf]  ;;  %v3977_v61 = vld [vmem:[%s6284_s1 + $0x354] sm:$0xf0]  ;;  %v2880_v1 = vld [vmem:[%s6284_s1 + $0x240] sm:$0xf]  ;;  %v2953_v3 = vor.u32 %v3961_v59, %v2952_v57 }
  0x1e   :  { %2056 = vmatpush.bf16.msra.mxu2 %v2729_v20  ;;  %v3080_v62 = vld [vmem:[%s6284_s1 + $0x3d0] sm:$0xf]  ;;  %v3993_v63 = vld [vmem:[%s6284_s1 + $0x3d4] sm:$0xf0]  ;;  %v22_v2 = vld [vmem:[%s6285_s0] sm:$0xff]  ;;  %v3017_v4 = vor.u32 %v3977_v61, %v3016_v60 }
  0x1f   :  { %2069 = vmatpush.bf16.msra.mxu3 %v2793_v24  ;;  %v3943_v5 = vld [vmem:[%s6284_s1 + $0x244] sm:$0xf0]  ;;  %v2944_v6 = vld [vmem:[%s6284_s1 + $0x2c0] sm:$0xf]  ;;  %32 = vst [vmem:[#allocation1] ss:$4 sm:$0xff] %v22_v2  ;;  %v3081_v7 = vor.u32 %v3993_v63, %v3080_v62 }
  0x20   :  { %2031 = vmatpush.bf16.msra.mxu0 %v2593_v31  ;;  %v3959_v8 = vld [vmem:[%s6284_s1 + $0x2c4] sm:$0xf0]  ;;  %v3008_v9 = vld [vmem:[%s6284_s1 + $0x340] sm:$0xf]  ;;  %v2881_v13 = vor.u32 %v3943_v5, %v2880_v1  ;;  %v2872_v14 = vld [vmem:[%s6284_s1 + $0x230] sm:$0xf] }
  0x21   :  { %2044 = vmatpush.bf16.msra.mxu1 %v2657_v35  ;;  %v3975_v10 = vld [vmem:[%s6284_s1 + $0x344] sm:$0xf0]  ;;  %v3072_v11 = vld [vmem:[%s6284_s1 + $0x3c0] sm:$0xf]  ;;  %v3941_v15 = vld [vmem:[%s6284_s1 + $0x234] sm:$0xf0]  ;;  %v2945_v16 = vor.u32 %v3959_v8, %v2944_v6 }
  0x22   :  { %2057 = vmatpush.bf16.msra.mxu2 %v2721_v36  ;;  %v3991_v12 = vld [vmem:[%s6284_s1 + $0x3c4] sm:$0xf0]  ;;  %v3009_v17 = vor.u32 %v3975_v10, %v3008_v9  ;;  %v2936_v18 = vld [vmem:[%s6284_s1 + $0x2b0] sm:$0xf]  ;;  %v3957_v19 = vld [vmem:[%s6284_s1 + $0x2b4] sm:$0xf0]  ;;  %v2873_v28 = vor.u32 %v3941_v15, %v2872_v14 }
  0x23   :  { %2070 = vmatpush.bf16.msra.mxu3 %v2785_v39  ;;  %v3000_v20 = vld [vmem:[%s6284_s1 + $0x330] sm:$0xf]  ;;  %v3073_v21 = vor.u32 %v3991_v12, %v3072_v11  ;;  %v3973_v22 = vld [vmem:[%s6284_s1 + $0x334] sm:$0xf0]  ;;  %v2864_v25 = vld [vmem:[%s6284_s1 + $0x220] sm:$0xf]  ;;  %v2937_v29 = vor.u32 %v3957_v19, %v2936_v18 }
  0x24   :  { %2076 = vmatpush.bf16.msrb.mxu0 %v2905_v40  ;;  %v3064_v23 = vld [vmem:[%s6284_s1 + $0x3b0] sm:$0xf]  ;;  %v3989_v24 = vld [vmem:[%s6284_s1 + $0x3b4] sm:$0xf0]  ;;  %v3939_v26 = vld [vmem:[%s6284_s1 + $0x224] sm:$0xf0]  ;;  %v3001_v34 = vor.u32 %v3973_v22, %v3000_v20 }
  0x25   :  { %2089 = vmatpush.bf16.msrb.mxu1 %v2969_v41  ;;  %v24_v27 = vld [vmem:[%s6285_s0 + $0x10] sm:$0xff]  ;;  %v2928_v30 = vld [vmem:[%s6284_s1 + $0x2a0] sm:$0xf]  ;;  %v3955_v31 = vld [vmem:[%s6284_s1 + $0x2a4] sm:$0xf0]  ;;  %v3065_v39 = vor.u32 %v3989_v24, %v3064_v23 }
  0x26   :  { %2102 = vmatpush.bf16.msrb.mxu2 %v3033_v42  ;;  %v37_v32 = vld.sshfl [vmem:[#allocation1 + $0x10] sm:$0xff pattern:$0x73625140]  ;;  %v35_v33 = vld.sshfl [vmem:[#allocation1] sm:$0xff pattern:$0x73625140]  ;;  %v2929_v49 = vor.u32 %v3955_v31, %v2928_v30 }
  0x27   :  { %2115 = vmatpush.bf16.msrb.mxu3 %v3097_v46  ;;  %v4556_v35 = vpack.c.bf16 %v37_v32, %v37_v32  ;;  %v4558_v36 = vpack.c.bf16 %v35_v33, %v35_v33  ;;  %v38_v37 = vld.sshfl [vmem:[#allocation1 + $0x18] sm:$0xff pattern:$0x73625140]  ;;  %v36_v38 = vld.sshfl [vmem:[#allocation1 + $0x8] sm:$0xff pattern:$0x73625140]  ;;  %v2865_v46 = vor.u32 %v3939_v26, %v2864_v25 }
  0x28   :  { %2077 = vmatpush.bf16.msrb.mxu0 %v2897_v52  ;;  %v2992_v40 = vld [vmem:[%s6284_s1 + $0x320] sm:$0xf]  ;;  %v3971_v41 = vld [vmem:[%s6284_s1 + $0x324] sm:$0xf0]  ;;  %v4566_v42 = vpack.c.bf16 %v38_v37, %v38_v37  ;;  %43 = vst [vmem:[#allocation1] ss:$4 sm:$0xff] %v24_v27  ;;  %v4568_v43 = vpack.c.bf16 %v36_v38, %v36_v38 }
  0x29   :  { %2090 = vmatpush.bf16.msrb.mxu1 %v2961_v53  ;;  %v3056_v44 = vld [vmem:[%s6284_s1 + $0x3a0] sm:$0xf]  ;;  %v3987_v45 = vld [vmem:[%s6284_s1 + $0x3a4] sm:$0xf0]  ;;  %2058 = vmatmul.bf16.vlgmr.msra.gmra.mxu2 %v4556_v35  ;;  %v2856_v47 = vld [vmem:[%s6284_s1 + $0x210] sm:$0xf]  ;;  %v2993_v50 = vor.u32 %v3971_v41, %v2992_v40 }
  0x2a   :  { %2103 = vmatpush.bf16.msrb.mxu2 %v3025_v54  ;;  %2032 = vmatmul.bf16.vlgmr.msra.gmra.mxu0 %v4558_v36  ;;  %v3937_v48 = vld [vmem:[%s6284_s1 + $0x214] sm:$0xf0]  ;;  %v2920_v51 = vld [vmem:[%s6284_s1 + $0x290] sm:$0xf]  ;;  %v3057_v54 = vor.u32 %v3987_v45, %v3056_v44  ;;  %v23_v57 = vld [vmem:[%s6285_s0 + $0x8] sm:$0xff] }
  0x2b   :  { %2116 = vmatpush.bf16.msrb.mxu3 %v3089_v58  ;;  %v3953_v52 = vld [vmem:[%s6284_s1 + $0x294] sm:$0xf0]  ;;  %v2984_v53 = vld [vmem:[%s6284_s1 + $0x310] sm:$0xf]  ;;  %2045 = vmatmul.bf16.vlgmr.msra.gmra.mxu1 %v4568_v43  ;;  %v2848_v59 = vld [vmem:[%s6284_s1 + $0x200] sm:$0xf]  ;;  %v2857_v60 = vor.u32 %v3937_v48, %v2856_v47 }
  0x2c   :  { %2078 = vmatpush.bf16.msrb.mxu0 %v2889_v0  ;;  %2071 = vmatmul.bf16.vlgmr.msra.gmra.mxu3 %v4566_v42  ;;  %v3969_v55 = vld [vmem:[%s6284_s1 + $0x314] sm:$0xf0]  ;;  %v3048_v56 = vld [vmem:[%s6284_s1 + $0x390] sm:$0xf]  ;;  %34 = vst [vmem:[#allocation1 + $0x20] ss:$4 sm:$0xff] %v23_v57  ;;  %v2921_v0 = vor.u32 %v3953_v52, %v2920_v51 }
  0x2d   :  { %2091 = vmatpush.bf16.msrb.mxu1 %v2953_v3  ;;  %v3985_v58 = vld [vmem:[%s6284_s1 + $0x394] sm:$0xf0]  ;;  %v3935_v61 = vld [vmem:[%s6284_s1 + $0x204] sm:$0xf0]  ;;  %v2912_v62 = vld [vmem:[%s6284_s1 + $0x280] sm:$0xf]  ;;  %v2985_v1 = vor.u32 %v3969_v55, %v2984_v53 }
  0x2e   :  { %2104 = vmatpush.bf16.msrb.mxu2 %v3017_v4  ;;  %v3951_v63 = vld [vmem:[%s6284_s1 + $0x284] sm:$0xf0]  ;;  %v2976_v2 = vld [vmem:[%s6284_s1 + $0x300] sm:$0xf]  ;;  %v3049_v5 = vor.u32 %v3985_v58, %v3048_v56  ;;  %v4013_v8 = vld [vmem:[%s6284_s1 + $0x474] sm:$0xf0]  ;;  %v2849_v12 = vor.u32 %v3935_v61, %v2848_v59 }
  0x2f   :  { %2117 = vmatpush.bf16.msrb.mxu3 %v3081_v7  ;;  %v3967_v3 = vld [vmem:[%s6284_s1 + $0x304] sm:$0xf0]  ;;  %v3040_v4 = vld [vmem:[%s6284_s1 + $0x380] sm:$0xf]  ;;  %v3160_v7 = vld [vmem:[%s6284_s1 + $0x470] sm:$0xf] }
  0x30   :  { %2079 = vmatpush.bf16.msrb.mxu0 %v2881_v13  ;;  %v3983_v6 = vld [vmem:[%s6284_s1 + $0x384] sm:$0xf0]  ;;  %v3224_v9 = vld [vmem:[%s6284_s1 + $0x4f0] sm:$0xf]  ;;  %v4029_v10 = vld [vmem:[%s6284_s1 + $0x4f4] sm:$0xf0]  ;;  %v3161_v22 = vor.u32 %v4013_v8, %v3160_v7 }
  0x31   :  { %2092 = vmatpush.bf16.msrb.mxu1 %v2945_v16  ;;  %v3288_v11 = vld [vmem:[%s6284_s1 + $0x570] sm:$0xf]  ;;  %v4045_v13 = vld [vmem:[%s6284_s1 + $0x574] sm:$0xf0]  ;;  %v2913_v16 = vor.u32 %v3951_v63, %v2912_v62  ;;  %v3152_v18 = vld [vmem:[%s6284_s1 + $0x460] sm:$0xf]  ;;  %v3225_v27 = vor.u32 %v4029_v10, %v3224_v9 }
  0x32   :  { %2105 = vmatpush.bf16.msrb.mxu2 %v3009_v17  ;;  %v3352_v14 = vld [vmem:[%s6284_s1 + $0x5f0] sm:$0xf]  ;;  %v4061_v15 = vld [vmem:[%s6284_s1 + $0x5f4] sm:$0xf0]  ;;  %v2977_v17 = vor.u32 %v3967_v3, %v2976_v2  ;;  %v4011_v19 = vld [vmem:[%s6284_s1 + $0x464] sm:$0xf0] }
  0x33   :  { %2118 = vmatpush.bf16.msrb.mxu3 %v3073_v21  ;;  %v25_v20 = vld [vmem:[%s6285_s0 + $0x18] sm:$0xff]  ;;  %v3041_v21 = vor.u32 %v3983_v6, %v3040_v4  ;;  %v3216_v23 = vld [vmem:[%s6284_s1 + $0x4e0] sm:$0xf]  ;;  %v4027_v24 = vld [vmem:[%s6284_s1 + $0x4e4] sm:$0xf0]  ;;  %v3353_v31 = vor.u32 %v4061_v15, %v3352_v14  ;;  %v3153_v41 = vor.u32 %v4011_v19, %v3152_v18 }
  0x34   :  { %2080 = vmatpush.bf16.msrb.mxu0 %v2873_v28  ;;  %v41_v25 = vld.sshfl [vmem:[#allocation1 + $0x30] sm:$0xff pattern:$0x73625140]  ;;  %v39_v26 = vld.sshfl [vmem:[#allocation1 + $0x20] sm:$0xff pattern:$0x73625140]  ;;  %v3289_v28 = vor.u32 %v4045_v13, %v3288_v11  ;;  %v3217_v45 = vor.u32 %v4027_v24, %v3216_v23 }
  0x35   :  { %2093 = vmatpush.bf16.msrb.mxu1 %v2937_v29  ;;  %v42_v29 = vld.sshfl [vmem:[#allocation1 + $0x38] sm:$0xff pattern:$0x73625140]  ;;  %v40_v30 = vld.sshfl [vmem:[#allocation1 + $0x28] sm:$0xff pattern:$0x73625140] }
  0x36   :  { %2106 = vmatpush.bf16.msrb.mxu2 %v3001_v34  ;;  %v3280_v32 = vld [vmem:[%s6284_s1 + $0x560] sm:$0xf]  ;;  %v4043_v33 = vld [vmem:[%s6284_s1 + $0x564] sm:$0xf0]  ;;  %v4676_v34 = vpack.c.bf16 %v41_v25, %v41_v25  ;;  %44 = vst [vmem:[#allocation1 + $0x20] ss:$4 sm:$0xff] %v25_v20  ;;  %v4686_v40 = vpack.c.bf16 %v42_v29, %v42_v29  ;;  %v4688_v44 = vpack.c.bf16 %v40_v30, %v40_v30 }
  0x37   :  { %2119 = vmatpush.bf16.msrb.mxu3 %v3065_v39  ;;  %v3344_v37 = vld [vmem:[%s6284_s1 + $0x5e0] sm:$0xf]  ;;  %v4059_v38 = vld [vmem:[%s6284_s1 + $0x5e4] sm:$0xf0]  ;;  %v4684_v39 = vpack.c.bf16 %v39_v26, %v39_v26  ;;  %v3144_v47 = vld [vmem:[%s6284_s1 + $0x450] sm:$0xf] }
  0x38   :  { %2081 = vmatpush.bf16.msrb.mxu0 %v2865_v46  ;;  %v3281_v46 = vor.u32 %v4043_v33, %v3280_v32  ;;  %v4009_v48 = vld [vmem:[%s6284_s1 + $0x454] sm:$0xf0]  ;;  %v3272_v52 = vld [vmem:[%s6284_s1 + $0x550] sm:$0xf]  ;;  %v3136_v59 = vld [vmem:[%s6284_s1 + $0x440] sm:$0xf] }
  0x39   :  { %2094 = vmatpush.bf16.msrb.mxu1 %v2929_v49  ;;  %v3208_v49 = vld [vmem:[%s6284_s1 + $0x4d0] sm:$0xf]  ;;  %v4025_v51 = vld [vmem:[%s6284_s1 + $0x4d4] sm:$0xf0]  ;;  %v3145_v56 = vor.u32 %v4009_v48, %v3144_v47  ;;  %v3200_v61 = vld [vmem:[%s6284_s1 + $0x4c0] sm:$0xf] }
  0x3a   :  { %2107 = vmatpush.bf16.msrb.mxu2 %v2993_v50  ;;  %v3345_v50 = vor.u32 %v4059_v38, %v3344_v37  ;;  %v4041_v53 = vld [vmem:[%s6284_s1 + $0x554] sm:$0xf0]  ;;  %v3209_v57 = vor.u32 %v4025_v51, %v3208_v49  ;;  %v4023_v63 = vld [vmem:[%s6284_s1 + $0x4c4] sm:$0xf0]  ;;  %v3328_v2 = vld [vmem:[%s6284_s1 + $0x5c0] sm:$0xf] }
  0x3b   :  { %2120 = vmatpush.bf16.msrb.mxu3 %v3057_v54  ;;  %v3336_v54 = vld [vmem:[%s6284_s1 + $0x5d0] sm:$0xf]  ;;  %v4057_v55 = vld [vmem:[%s6284_s1 + $0x5d4] sm:$0xf0]  ;;  %v3273_v58 = vor.u32 %v4041_v53, %v3272_v52  ;;  %v4055_v3 = vld [vmem:[%s6284_s1 + $0x5c4] sm:$0xf0]  ;;  %v3201_v8 = vor.u32 %v4023_v63, %v3200_v61 }
  0x3c   :  { %2082 = vmatpush.bf16.msrb.mxu0 %v2857_v60  ;;  %v4007_v60 = vld [vmem:[%s6284_s1 + $0x444] sm:$0xf0]  ;;  %v3337_v62 = vor.u32 %v4057_v55, %v3336_v54  ;;  %v26_v4 = vld [vmem:[%s6285_s0 + $0x20] sm:$0xff]  ;;  %v3128_v6 = vld [vmem:[%s6284_s1 + $0x430] sm:$0xf]  ;;  %v3329_v13 = vor.u32 %v4055_v3, %v3328_v2 }
  0x3d   :  { %2095 = vmatpush.bf16.msrb.mxu1 %v2921_v0  ;;  %v3264_v0 = vld [vmem:[%s6284_s1 + $0x540] sm:$0xf]  ;;  %v4005_v7 = vld [vmem:[%s6284_s1 + $0x434] sm:$0xf0]  ;;  %v3192_v10 = vld [vmem:[%s6284_s1 + $0x4b0] sm:$0xf] }
  0x3e   :  { %2108 = vmatpush.bf16.msrb.mxu2 %v2985_v1  ;;  %v4039_v1 = vld [vmem:[%s6284_s1 + $0x544] sm:$0xf0]  ;;  %v4021_v11 = vld [vmem:[%s6284_s1 + $0x4b4] sm:$0xf0]  ;;  %v3320_v15 = vld [vmem:[%s6284_s1 + $0x5b0] sm:$0xf]  ;;  %v3129_v20 = vor.u32 %v4005_v7, %v3128_v6 }
  0x3f   :  { %2121 = vmatpush.bf16.msrb.mxu3 %v3049_v5  ;;  %v3137_v5 = vor.u32 %v4007_v60, %v3136_v59  ;;  %v3265_v9 = vor.u32 %v4039_v1, %v3264_v0  ;;  %v4037_v14 = vld [vmem:[%s6284_s1 + $0x534] sm:$0xf0]  ;;  %v4772_v18 = vld.sshfl [vmem:[#allocation1] sm:$0xff pattern:$0x73625140]  ;;  %v3193_v23 = vor.u32 %v4021_v11, %v3192_v10 }
  0x40   :  { %2083 = vmatpush.bf16.msrb.mxu0 %v2849_v12  ;;  %v3256_v12 = vld [vmem:[%s6284_s1 + $0x530] sm:$0xf]  ;;  %v4003_v25 = vld [vmem:[%s6284_s1 + $0x424] sm:$0xf0]  ;;  %v3184_v26 = vld [vmem:[%s6284_s1 + $0x4a0] sm:$0xf] }
  0x41   :  { %2096 = vmatpush.bf16.msrb.mxu1 %v2913_v16  ;;  %v4053_v16 = vld [vmem:[%s6284_s1 + $0x5b4] sm:$0xf0]  ;;  %v4774_v19 = vld.sshfl [vmem:[#allocation1 + $0x10] sm:$0xff pattern:$0x73625140]  ;;  %v3257_v24 = vor.u32 %v4037_v14, %v3256_v12 }
  0x42   :  { %2109 = vmatpush.bf16.msrb.mxu2 %v2977_v17  ;;  %v3120_v17 = vld [vmem:[%s6284_s1 + $0x420] sm:$0xf]  ;;  %v4035_v30 = vld [vmem:[%s6284_s1 + $0x524] sm:$0xf0]  ;;  %v4017_v48 = vld [vmem:[%s6284_s1 + $0x494] sm:$0xf0] }
  0x43   :  { %2122 = vmatpush.bf16.msrb.mxu3 %v3041_v21  ;;  %2084 = vmatmul.bf16.vlgmr.msrb.gmra.mxu0 %v4684_v39  ;;  %v4776_v21 = vld.sshfl [vmem:[#allocation1 + $0x8] sm:$0xff pattern:$0x73625140]  ;;  %v3248_v29 = vld [vmem:[%s6284_s1 + $0x520] sm:$0xf]  ;;  %v3121_v33 = vor.u32 %v4003_v25, %v3120_v17 }
  0x44   :  { %2128 = vmatpush.bf16.msra.mxu0 %v3161_v22  ;;  %2097 = vmatmul.bf16.vlgmr.msrb.gmra.mxu1 %v4688_v44  ;;  %v4778_v22 = vld.sshfl [vmem:[#allocation1 + $0x18] sm:$0xff pattern:$0x73625140]  ;;  %v4051_v32 = vld [vmem:[%s6284_s1 + $0x5a4] sm:$0xf0]  ;;  %v3249_v38 = vor.u32 %v4035_v30, %v3248_v29 }
  0x45   :  { %2141 = vmatpush.bf16.msra.mxu1 %v3225_v27  ;;  %2110 = vmatmul.bf16.vlgmr.msrb.gmra.mxu2 %v4676_v34  ;;  %53 = vst [vmem:[#allocation1] ss:$4 sm:$0xff] %v26_v4  ;;  %v3321_v27 = vor.u32 %v4053_v16, %v3320_v15  ;;  %v3240_v49 = vld [vmem:[%s6284_s1 + $0x510] sm:$0xf]  ;;  %v4049_v52 = vld [vmem:[%s6284_s1 + $0x594] sm:$0xf0] }
  0x46   :  { %2154 = vmatpush.bf16.msra.mxu2 %v3289_v28  ;;  %2123 = vmatmul.bf16.vlgmr.msrb.gmra.mxu3 %v4686_v40  ;;  %v4019_v28 = vld [vmem:[%s6284_s1 + $0x4a4] sm:$0xf0]  ;;  %v3304_v51 = vld [vmem:[%s6284_s1 + $0x590] sm:$0xf]  ;;  %v3104_v54 = vld [vmem:[%s6284_s1 + $0x400] sm:$0xf] }
  0x47   :  { %2167 = vmatpush.bf16.msra.mxu3 %v3353_v31  ;;  %v3312_v31 = vld [vmem:[%s6284_s1 + $0x5a0] sm:$0xf]  ;;  %v3185_v37 = vor.u32 %v4019_v28, %v3184_v26  ;;  %v3999_v55 = vld [vmem:[%s6284_s1 + $0x404] sm:$0xf0]  ;;  %v3305_v61 = vor.u32 %v4049_v52, %v3304_v51  ;;  %v3416_v1 = vld [vmem:[%s6284_s1 + $0x670] sm:$0xf]  ;;  %v4897_v28 = vpack.c.bf16 %v4774_v19, %v4774_v19 }
  0x48   :  { %2129 = vmatpush.bf16.msra.mxu0 %v3153_v41  ;;  %v3112_v41 = vld [vmem:[%s6284_s1 + $0x410] sm:$0xf]  ;;  %v3313_v47 = vor.u32 %v4051_v32, %v3312_v31  ;;  %v4015_v59 = vld [vmem:[%s6284_s1 + $0x484] sm:$0xf0]  ;;  %v3232_v60 = vld [vmem:[%s6284_s1 + $0x500] sm:$0xf]  ;;  %v3105_v4 = vor.u32 %v3999_v55, %v3104_v54  ;;  %v4911_v31 = vpack.c.bf16 %v4778_v22, %v4778_v22 }
  0x49   :  { %2142 = vmatpush.bf16.msra.mxu1 %v3217_v45  ;;  %v4001_v45 = vld [vmem:[%s6284_s1 + $0x414] sm:$0xf0]  ;;  %v3296_v63 = vld [vmem:[%s6284_s1 + $0x580] sm:$0xf]  ;;  %v4047_v0 = vld [vmem:[%s6284_s1 + $0x584] sm:$0xf0] }
  0x4a   :  { %2155 = vmatpush.bf16.msra.mxu2 %v3281_v46  ;;  %v3176_v46 = vld [vmem:[%s6284_s1 + $0x490] sm:$0xf]  ;;  %v3113_v53 = vor.u32 %v4001_v45, %v3112_v41  ;;  %v4077_v2 = vld [vmem:[%s6284_s1 + $0x674] sm:$0xf0]  ;;  %v3297_v12 = vor.u32 %v4047_v0, %v3296_v63  ;;  %v3408_v16 = vld [vmem:[%s6284_s1 + $0x660] sm:$0xf] }
  0x4b   :  { %2168 = vmatpush.bf16.msra.mxu3 %v3345_v50  ;;  %v4033_v50 = vld [vmem:[%s6284_s1 + $0x514] sm:$0xf0]  ;;  %v3480_v3 = vld [vmem:[%s6284_s1 + $0x6f0] sm:$0xf]  ;;  %v4075_v17 = vld [vmem:[%s6284_s1 + $0x664] sm:$0xf0] }
  0x4c   :  { %2130 = vmatpush.bf16.msra.mxu0 %v3145_v56  ;;  %v3177_v56 = vor.u32 %v4017_v48, %v3176_v46  ;;  %v3544_v6 = vld [vmem:[%s6284_s1 + $0x770] sm:$0xf]  ;;  %v4109_v7 = vld [vmem:[%s6284_s1 + $0x774] sm:$0xf0]  ;;  %v4091_v25 = vld [vmem:[%s6284_s1 + $0x6e4] sm:$0xf0]  ;;  %v3409_v19 = vor.u32 %v4075_v17, %v3408_v16 }
  0x4d   :  { %2143 = vmatpush.bf16.msra.mxu1 %v3209_v57  ;;  %v3241_v57 = vor.u32 %v4033_v50, %v3240_v49  ;;  %v3608_v10 = vld [vmem:[%s6284_s1 + $0x7f0] sm:$0xf]  ;;  %v4125_v11 = vld [vmem:[%s6284_s1 + $0x7f4] sm:$0xf0]  ;;  %v3545_v15 = vor.u32 %v4109_v7, %v3544_v6  ;;  %v3536_v26 = vld [vmem:[%s6284_s1 + $0x760] sm:$0xf] }
  0x4e   :  { %2156 = vmatpush.bf16.msra.mxu2 %v3273_v58  ;;  %v3168_v58 = vld [vmem:[%s6284_s1 + $0x480] sm:$0xf]  ;;  %v4123_v30 = vld [vmem:[%s6284_s1 + $0x7e4] sm:$0xf0]  ;;  %v4089_v41 = vld [vmem:[%s6284_s1 + $0x6d4] sm:$0xf0] }
  0x4f   :  { %2169 = vmatpush.bf16.msra.mxu3 %v3337_v62  ;;  %v4031_v62 = vld [vmem:[%s6284_s1 + $0x504] sm:$0xf0]  ;;  %v3600_v29 = vld [vmem:[%s6284_s1 + $0x7e0] sm:$0xf]  ;;  %v3528_v45 = vld [vmem:[%s6284_s1 + $0x750] sm:$0xf] }
  0x50   :  { %2131 = vmatpush.bf16.msra.mxu0 %v3137_v5  ;;  %v4093_v5 = vld [vmem:[%s6284_s1 + $0x6f4] sm:$0xf0]  ;;  %v3601_v22 = vor.u32 %v4123_v30, %v3600_v29  ;;  %v3392_v52 = vld [vmem:[%s6284_s1 + $0x640] sm:$0xf]  ;;  %v3384_v0 = vld [vmem:[%s6284_s1 + $0x630] sm:$0xf] }
  0x51   :  { %2144 = vmatpush.bf16.msra.mxu1 %v3201_v8  ;;  %v3169_v8 = vor.u32 %v4015_v59, %v3168_v58  ;;  %v3481_v14 = vor.u32 %v4093_v5, %v3480_v3  ;;  %v4105_v46 = vld [vmem:[%s6284_s1 + $0x754] sm:$0xf0]  ;;  %v3456_v54 = vld [vmem:[%s6284_s1 + $0x6c0] sm:$0xf]  ;;  %v4103_v58 = vld [vmem:[%s6284_s1 + $0x744] sm:$0xf0] }
  0x52   :  { %2157 = vmatpush.bf16.msra.mxu2 %v3265_v9  ;;  %v3233_v9 = vor.u32 %v4031_v62, %v3232_v60  ;;  %v4121_v48 = vld [vmem:[%s6284_s1 + $0x7d4] sm:$0xf0]  ;;  %v3529_v51 = vor.u32 %v4105_v46, %v3528_v45  ;;  %v3584_v59 = vld [vmem:[%s6284_s1 + $0x7c0] sm:$0xf]  ;;  %v4119_v60 = vld [vmem:[%s6284_s1 + $0x7c4] sm:$0xf0] }
  0x53   :  { %2170 = vmatpush.bf16.msra.mxu3 %v3329_v13  ;;  %v3417_v13 = vor.u32 %v4077_v2, %v3416_v1  ;;  %v4069_v1 = vld [vmem:[%s6284_s1 + $0x634] sm:$0xf0]  ;;  %v3448_v2 = vld [vmem:[%s6284_s1 + $0x6b0] sm:$0xf]  ;;  %v3585_v3 = vor.u32 %v4119_v60, %v3584_v59  ;;  %v4083_v16 = vld [vmem:[%s6284_s1 + $0x6a4] sm:$0xf0] }
  0x54   :  { %2132 = vmatpush.bf16.msra.mxu0 %v3129_v20  ;;  %v3472_v20 = vld [vmem:[%s6284_s1 + $0x6e0] sm:$0xf]  ;;  %v3512_v5 = vld [vmem:[%s6284_s1 + $0x730] sm:$0xf]  ;;  %v4101_v6 = vld [vmem:[%s6284_s1 + $0x734] sm:$0xf0] }
  0x55   :  { %2145 = vmatpush.bf16.msra.mxu1 %v3193_v23  ;;  %v3609_v23 = vor.u32 %v4125_v11, %v3608_v10  ;;  %v3473_v32 = vor.u32 %v4091_v25, %v3472_v20  ;;  %v3576_v7 = vld [vmem:[%s6284_s1 + $0x7b0] sm:$0xf]  ;;  %v3513_v11 = vor.u32 %v4101_v6, %v3512_v5  ;;  %v3504_v17 = vld [vmem:[%s6284_s1 + $0x720] sm:$0xf]  ;;  %v4099_v20 = vld [vmem:[%s6284_s1 + $0x724] sm:$0xf0] }
  0x56   :  { %2158 = vmatpush.bf16.msra.mxu2 %v3257_v24  ;;  %v4884_v24 = vpack.c.bf16 %v4772_v18, %v4772_v18  ;;  %v4901_v18 = vpack.c.bf16 %v4776_v21, %v4776_v21  ;;  %v4115_v25 = vld [vmem:[%s6284_s1 + $0x7a4] sm:$0xf0]  ;;  %v3505_v29 = vor.u32 %v4099_v20, %v3504_v17  ;;  %v3368_v30 = vld [vmem:[%s6284_s1 + $0x610] sm:$0xf]  ;;  %v3360_v45 = vld [vmem:[%s6284_s1 + $0x600] sm:$0xf] }
  0x57   :  { %2171 = vmatpush.bf16.msra.mxu3 %v3321_v27  ;;  %v4107_v27 = vld [vmem:[%s6284_s1 + $0x764] sm:$0xf0]  ;;  %v3736_v59 = vld [vmem:[%s6284_s1 + $0x8f0] sm:$0xf]  ;;  %v4157_v60 = vld [vmem:[%s6284_s1 + $0x8f4] sm:$0xf0] }
  0x58   :  { %2133 = vmatpush.bf16.msra.mxu0 %v3121_v33  ;;  %v3537_v21 = vor.u32 %v4107_v27, %v3536_v26  ;;  %v3400_v33 = vld [vmem:[%s6284_s1 + $0x650] sm:$0xf]  ;;  %v4155_v17 = vld [vmem:[%s6284_s1 + $0x8e4] sm:$0xf0]  ;;  %v3792_v20 = vld [vmem:[%s6284_s1 + $0x960] sm:$0xf] }
  0x59   :  { %2146 = vmatpush.bf16.msra.mxu1 %v3185_v37  ;;  %v4073_v37 = vld [vmem:[%s6284_s1 + $0x654] sm:$0xf0]  ;;  %v51_v5 = vld.sshfl [vmem:[#allocation1 + $0x30] sm:$0xff pattern:$0x73625140] }
  0x5a   :  { %2159 = vmatpush.bf16.msra.mxu2 %v3249_v38  ;;  %v3464_v38 = vld [vmem:[%s6284_s1 + $0x6d0] sm:$0xf]  ;;  %v3401_v49 = vor.u32 %v4073_v37, %v3400_v33  ;;  %v4081_v33 = vld [vmem:[%s6284_s1 + $0x694] sm:$0xf0] }
  0x5b   :  { %2172 = vmatpush.bf16.msra.mxu3 %v3313_v47  ;;  %v3592_v47 = vld [vmem:[%s6284_s1 + $0x7d0] sm:$0xf]  ;;  %v3465_v50 = vor.u32 %v4089_v41, %v3464_v38  ;;  %v4097_v38 = vld [vmem:[%s6284_s1 + $0x714] sm:$0xf0] }
  0x5c   :  { %2134 = vmatpush.bf16.msra.mxu0 %v3113_v53  ;;  %v4071_v53 = vld [vmem:[%s6284_s1 + $0x644] sm:$0xf0]  ;;  %v3593_v55 = vor.u32 %v4121_v48, %v3592_v47  ;;  %v3496_v37 = vld [vmem:[%s6284_s1 + $0x710] sm:$0xf]  ;;  %v4113_v41 = vld [vmem:[%s6284_s1 + $0x794] sm:$0xf0] }
  0x5d   :  { %2147 = vmatpush.bf16.msra.mxu1 %v3177_v56  ;;  %v4087_v56 = vld [vmem:[%s6284_s1 + $0x6c4] sm:$0xf0]  ;;  %v3424_v48 = vld [vmem:[%s6284_s1 + $0x680] sm:$0xf] }
  0x5e   :  { %2160 = vmatpush.bf16.msra.mxu2 %v3241_v57  ;;  %v3520_v57 = vld [vmem:[%s6284_s1 + $0x740] sm:$0xf]  ;;  %v3457_v62 = vor.u32 %v4087_v56, %v3456_v54  ;;  %v4063_v47 = vld [vmem:[%s6284_s1 + $0x604] sm:$0xf0] }
  0x5f   :  { %2173 = vmatpush.bf16.msra.mxu3 %v3305_v61  ;;  %v3393_v61 = vor.u32 %v4071_v53, %v3392_v52  ;;  %v3521_v63 = vor.u32 %v4103_v58, %v3520_v57  ;;  %v3488_v52 = vld [vmem:[%s6284_s1 + $0x700] sm:$0xf]  ;;  %v4095_v53 = vld [vmem:[%s6284_s1 + $0x704] sm:$0xf0]  ;;  %v3672_v57 = vld [vmem:[%s6284_s1 + $0x870] sm:$0xf] }
  0x60   :  { %2135 = vmatpush.bf16.msra.mxu0 %v3105_v4  ;;  %v4085_v4 = vld [vmem:[%s6284_s1 + $0x6b4] sm:$0xf0]  ;;  %v3552_v54 = vld [vmem:[%s6284_s1 + $0x780] sm:$0xf]  ;;  %v4111_v56 = vld [vmem:[%s6284_s1 + $0x784] sm:$0xf0] }
  0x61   :  { %2148 = vmatpush.bf16.msra.mxu1 %v3169_v8  ;;  %v4117_v8 = vld [vmem:[%s6284_s1 + $0x7b4] sm:$0xf0]  ;;  %v3449_v10 = vor.u32 %v4085_v4, %v3448_v2  ;;  %v49_v4 = vld.sshfl [vmem:[#allocation1 + $0x20] sm:$0xff pattern:$0x73625140]  ;;  %v3553_v6 = vor.u32 %v4111_v56, %v3552_v54 }
  0x62   :  { %2161 = vmatpush.bf16.msra.mxu2 %v3233_v9  ;;  %v3385_v9 = vor.u32 %v4069_v1, %v3384_v0  ;;  %v4141_v58 = vld [vmem:[%s6284_s1 + $0x874] sm:$0xf0]  ;;  %v3864_v0 = vld [vmem:[%s6284_s1 + $0x9f0] sm:$0xf]  ;;  %v3712_v54 = vld [vmem:[%s6284_s1 + $0x8c0] sm:$0xf] }
  0x63   :  { %2174 = vmatpush.bf16.msra.mxu3 %v3297_v12  ;;  %2136 = vmatmul.bf16.vlgmr.msra.gmra.mxu0 %v4884_v24  ;;  %v3376_v12 = vld [vmem:[%s6284_s1 + $0x620] sm:$0xf]  ;;  %v4189_v1 = vld [vmem:[%s6284_s1 + $0x9f4] sm:$0xf0]  ;;  %v4151_v56 = vld [vmem:[%s6284_s1 + $0x8c4] sm:$0xf0] }
  0x64   :  { %2180 = vmatpush.bf16.msrb.mxu0 %v3417_v13  ;;  %2149 = vmatmul.bf16.vlgmr.msra.gmra.mxu1 %v4901_v18  ;;  %v4067_v13 = vld [vmem:[%s6284_s1 + $0x624] sm:$0xf0] }
  0x65   :  { %2193 = vmatpush.bf16.msrb.mxu1 %v3481_v14  ;;  %2162 = vmatmul.bf16.vlgmr.msra.gmra.mxu2 %v4897_v28  ;;  %v3440_v14 = vld [vmem:[%s6284_s1 + $0x6a0] sm:$0xf]  ;;  %v3377_v26 = vor.u32 %v4067_v13, %v3376_v12  ;;  %v4139_v13 = vld [vmem:[%s6284_s1 + $0x864] sm:$0xf0] }
  0x66   :  { %2206 = vmatpush.bf16.msrb.mxu2 %v3545_v15  ;;  %2175 = vmatmul.bf16.vlgmr.msra.gmra.mxu3 %v4911_v31  ;;  %v3577_v15 = vor.u32 %v4117_v8, %v3576_v7  ;;  %v3441_v27 = vor.u32 %v4083_v16, %v3440_v14  ;;  %v3673_v7 = vor.u32 %v4141_v58, %v3672_v57  ;;  %v50_v8 = vld.sshfl [vmem:[#allocation1 + $0x28] sm:$0xff pattern:$0x73625140]  ;;  %v3664_v12 = vld [vmem:[%s6284_s1 + $0x860] sm:$0xf] }
  0x67   :  { %2219 = vmatpush.bf16.msrb.mxu3 %v3609_v23  ;;  %v3568_v23 = vld [vmem:[%s6284_s1 + $0x7a0] sm:$0xf]  ;;  %v5094_v16 = vpack.c.bf16 %v49_v4, %v49_v4  ;;  %v4167_v58 = vld [vmem:[%s6284_s1 + $0x944] sm:$0xf0]  ;;  %v4149_v4 = vld [vmem:[%s6284_s1 + $0x8b4] sm:$0xf0] }
  0x68   :  { %2181 = vmatpush.bf16.msrb.mxu0 %v3409_v19  ;;  %v4065_v19 = vld [vmem:[%s6284_s1 + $0x614] sm:$0xf0]  ;;  %v3728_v14 = vld [vmem:[%s6284_s1 + $0x8e0] sm:$0xf] }
  0x69   :  { %2194 = vmatpush.bf16.msrb.mxu1 %v3473_v32  ;;  %v3432_v32 = vld [vmem:[%s6284_s1 + $0x690] sm:$0xf]  ;;  %v3369_v46 = vor.u32 %v4065_v19, %v3368_v30  ;;  %v3665_v19 = vor.u32 %v4139_v13, %v3664_v12  ;;  %v3776_v57 = vld [vmem:[%s6284_s1 + $0x940] sm:$0xf]  ;;  %v4131_v13 = vld [vmem:[%s6284_s1 + $0x824] sm:$0xf0] }
  0x6a   :  { %2207 = vmatpush.bf16.msrb.mxu2 %v3537_v21  ;;  %v3569_v21 = vor.u32 %v4115_v25, %v3568_v23  ;;  %v4171_v23 = vld [vmem:[%s6284_s1 + $0x964] sm:$0xf0]  ;;  %v5105_v25 = vpack.c.bf16 %v51_v5, %v51_v5  ;;  %v3768_v5 = vld [vmem:[%s6284_s1 + $0x930] sm:$0xf]  ;;  %v3632_v12 = vld [vmem:[%s6284_s1 + $0x820] sm:$0xf] }
  0x6b   :  { %2220 = vmatpush.bf16.msrb.mxu3 %v3601_v22  ;;  %v3560_v22 = vld [vmem:[%s6284_s1 + $0x790] sm:$0xf] }
  0x6c   :  { %2182 = vmatpush.bf16.msrb.mxu0 %v3401_v49  ;;  %v4079_v49 = vld [vmem:[%s6284_s1 + $0x684] sm:$0xf0] }
  0x6d   :  { %2195 = vmatpush.bf16.msrb.mxu1 %v3465_v50  ;;  %v3433_v50 = vor.u32 %v4081_v33, %v3432_v32  ;;  %v3425_v2 = vor.u32 %v4079_v49, %v3424_v48  ;;  %v3729_v32 = vor.u32 %v4155_v17, %v3728_v14  ;;  %v3656_v33 = vld [vmem:[%s6284_s1 + $0x850] sm:$0xf]  ;;  %v4185_v48 = vld [vmem:[%s6284_s1 + $0x9d4] sm:$0xf0]  ;;  %v3696_v14 = vld [vmem:[%s6284_s1 + $0x8a0] sm:$0xf] }
  0x6e   :  { %2208 = vmatpush.bf16.msrb.mxu2 %v3529_v51  ;;  %v3497_v51 = vor.u32 %v4097_v38, %v3496_v37  ;;  %v4137_v37 = vld [vmem:[%s6284_s1 + $0x854] sm:$0xf0]  ;;  %v3720_v38 = vld [vmem:[%s6284_s1 + $0x8d0] sm:$0xf]  ;;  %v4147_v17 = vld [vmem:[%s6284_s1 + $0x8a4] sm:$0xf0] }
  0x6f   :  { %2221 = vmatpush.bf16.msrb.mxu3 %v3593_v55  ;;  %v3561_v55 = vor.u32 %v4113_v41, %v3560_v22  ;;  %v4153_v41 = vld [vmem:[%s6284_s1 + $0x8d4] sm:$0xf0]  ;;  %v3657_v49 = vor.u32 %v4137_v37, %v3656_v33  ;;  %v3624_v33 = vld [vmem:[%s6284_s1 + $0x810] sm:$0xf] }
  0x70   :  { %2183 = vmatpush.bf16.msrb.mxu0 %v3393_v61  ;;  %v3800_v61 = vld [vmem:[%s6284_s1 + $0x970] sm:$0xf]  ;;  %v4129_v37 = vld [vmem:[%s6284_s1 + $0x814] sm:$0xf0] }
  0x71   :  { %2196 = vmatpush.bf16.msrb.mxu1 %v3457_v62  ;;  %v3361_v62 = vor.u32 %v4063_v47, %v3360_v45  ;;  %v3784_v45 = vld [vmem:[%s6284_s1 + $0x950] sm:$0xf] }
  0x72   :  { %2209 = vmatpush.bf16.msrb.mxu2 %v3521_v63  ;;  %v4173_v63 = vld [vmem:[%s6284_s1 + $0x974] sm:$0xf0]  ;;  %v3848_v47 = vld [vmem:[%s6284_s1 + $0x9d0] sm:$0xf] }
  0x73   :  { %2222 = vmatpush.bf16.msrb.mxu3 %v3585_v3  ;;  %v3489_v3 = vor.u32 %v4095_v53, %v3488_v52  ;;  %v3648_v52 = vld [vmem:[%s6284_s1 + $0x840] sm:$0xf]  ;;  %v4135_v53 = vld [vmem:[%s6284_s1 + $0x844] sm:$0xf0] }
  0x74   :  { %2184 = vmatpush.bf16.msrb.mxu0 %v3385_v9  ;;  %v52_v9 = vld.sshfl [vmem:[#allocation1 + $0x38] sm:$0xff pattern:$0x73625140] }
  0x75   :  { %2197 = vmatpush.bf16.msrb.mxu1 %v3449_v10  ;;  %v3737_v10 = vor.u32 %v4157_v60, %v3736_v59  ;;  %v5115_v30 = vpack.c.bf16 %v52_v9, %v52_v9  ;;  %v3840_v59 = vld [vmem:[%s6284_s1 + $0x9c0] sm:$0xf]  ;;  %v4183_v60 = vld [vmem:[%s6284_s1 + $0x9c4] sm:$0xf0] }
  0x76   :  { %2210 = vmatpush.bf16.msrb.mxu2 %v3513_v11  ;;  %v3801_v11 = vor.u32 %v4173_v63, %v3800_v61  ;;  %v3649_v61 = vor.u32 %v4135_v53, %v3648_v52  ;;  %v3777_v63 = vor.u32 %v4167_v58, %v3776_v57  ;;  %v3680_v52 = vld [vmem:[%s6284_s1 + $0x880] sm:$0xf]  ;;  %v4143_v53 = vld [vmem:[%s6284_s1 + $0x884] sm:$0xf0] }
  0x77   :  { %2223 = vmatpush.bf16.msrb.mxu3 %v3577_v15  ;;  %v3865_v15 = vor.u32 %v4189_v1, %v3864_v0  ;;  %v3640_v0 = vld [vmem:[%s6284_s1 + $0x830] sm:$0xf]  ;;  %v4133_v1 = vld [vmem:[%s6284_s1 + $0x834] sm:$0xf0]  ;;  %v4159_v57 = vld [vmem:[%s6284_s1 + $0x904] sm:$0xf0] }
  0x78   :  { %2185 = vmatpush.bf16.msrb.mxu0 %v3377_v26  ;;  %v5107_v26 = vpack.c.bf16 %v50_v8, %v50_v8  ;;  %v4181_v8 = vld [vmem:[%s6284_s1 + $0x9b4] sm:$0xf0]  ;;  %v3641_v9 = vor.u32 %v4133_v1, %v3640_v0  ;;  %v3808_v58 = vld [vmem:[%s6284_s1 + $0x980] sm:$0xf]  ;;  %v2714_v0 = vld [vmem:[%s6284_s1 + $0xf8] sm:$0xf0] }
  0x79   :  { %2198 = vmatpush.bf16.msrb.mxu1 %v3441_v27  ;;  %v3856_v27 = vld [vmem:[%s6284_s1 + $0x9e0] sm:$0xf]  ;;  %v3916_v1 = vld [vmem:[%s6284_s1 + $0x174] sm:$0xf] }
  0x7a   :  { %2211 = vmatpush.bf16.msrb.mxu2 %v3505_v29  ;;  %v4187_v29 = vld [vmem:[%s6284_s1 + $0x9e4] sm:$0xf0] }
  0x7b   :  { %2224 = vmatpush.bf16.msrb.mxu3 %v3569_v21  ;;  %v3793_v21 = vor.u32 %v4171_v23, %v3792_v20  ;;  %v3857_v22 = vor.u32 %v4187_v29, %v3856_v27  ;;  %v3760_v20 = vld [vmem:[%s6284_s1 + $0x920] sm:$0xf]  ;;  %v4163_v23 = vld [vmem:[%s6284_s1 + $0x924] sm:$0xf0] }
  0x7c   :  { %2186 = vmatpush.bf16.msrb.mxu0 %v3369_v46  ;;  %v4169_v46 = vld [vmem:[%s6284_s1 + $0x954] sm:$0xf0]  ;;  %v3824_v27 = vld [vmem:[%s6284_s1 + $0x9a0] sm:$0xf]  ;;  %v4179_v29 = vld [vmem:[%s6284_s1 + $0x9a4] sm:$0xf0] }
  0x7d   :  { %2199 = vmatpush.bf16.msrb.mxu1 %v3433_v50  ;;  %v3721_v50 = vor.u32 %v4153_v41, %v3720_v38  ;;  %v3688_v38 = vld [vmem:[%s6284_s1 + $0x890] sm:$0xf]  ;;  %v4145_v41 = vld [vmem:[%s6284_s1 + $0x894] sm:$0xf0] }
  0x7e   :  { %2212 = vmatpush.bf16.msrb.mxu2 %v3497_v51  ;;  %v3785_v51 = vor.u32 %v4169_v46, %v3784_v45  ;;  %v3752_v45 = vld [vmem:[%s6284_s1 + $0x910] sm:$0xf]  ;;  %v4161_v46 = vld [vmem:[%s6284_s1 + $0x914] sm:$0xf0] }
  0x7f   :  { %2225 = vmatpush.bf16.msrb.mxu3 %v3561_v55  ;;  %v3849_v55 = vor.u32 %v4185_v48, %v3848_v47  ;;  %v3816_v47 = vld [vmem:[%s6284_s1 + $0x990] sm:$0xf]  ;;  %v4177_v48 = vld [vmem:[%s6284_s1 + $0x994] sm:$0xf0] }
  0x80   :  { %2187 = vmatpush.bf16.msrb.mxu0 %v3361_v62  ;;  %v3713_v62 = vor.u32 %v4151_v56, %v3712_v54  ;;  %v3689_v54 = vor.u32 %v4145_v41, %v3688_v38  ;;  %v3744_v56 = vld [vmem:[%s6284_s1 + $0x900] sm:$0xf]  ;;  %v3930_v38 = vld [vmem:[%s6284_s1 + $0x1e4] sm:$0xf] }
  0x81   :  { %2200 = vmatpush.bf16.msrb.mxu1 %v3425_v2  ;;  %v3704_v2 = vld [vmem:[%s6284_s1 + $0x8b0] sm:$0xf] }
  0x82   :  { %2213 = vmatpush.bf16.msrb.mxu2 %v3489_v3  ;;  %v3841_v3 = vor.u32 %v4183_v60, %v3840_v59  ;;  %v3817_v59 = vor.u32 %v4177_v48, %v3816_v47  ;;  %v4175_v60 = vld [vmem:[%s6284_s1 + $0x984] sm:$0xf0]  ;;  %v3880_v48 = vld [vmem:[%s6284_s1 + $0x54] sm:$0xf] }
  0x83   :  { %2226 = vmatpush.bf16.msrb.mxu3 %v3553_v6  ;;  %2188 = vmatmul.bf16.vlgmr.msrb.gmra.mxu0 %v5094_v16  ;;  %v4165_v6 = vld [vmem:[%s6284_s1 + $0x934] sm:$0xf0] }
  0x84   :  { %2232 = vmatpush.bf16.msra.mxu0 %v3673_v7  ;;  %2201 = vmatmul.bf16.vlgmr.msrb.gmra.mxu1 %v5107_v26  ;;  %v3832_v7 = vld [vmem:[%s6284_s1 + $0x9b0] sm:$0xf] }
  0x85   :  { %2245 = vmatpush.bf16.msra.mxu1 %v3737_v10  ;;  %2214 = vmatmul.bf16.vlgmr.msrb.gmra.mxu2 %v5105_v25  ;;  %v3705_v10 = vor.u32 %v4149_v4, %v3704_v2  ;;  %v3932_v4 = vld [vmem:[%s6284_s1 + $0x1f4] sm:$0xf] }
  0x86   :  { %2258 = vmatpush.bf16.msra.mxu2 %v3801_v11  ;;  %2227 = vmatmul.bf16.vlgmr.msrb.gmra.mxu3 %v5115_v30  ;;  %v3769_v11 = vor.u32 %v4165_v6, %v3768_v5  ;;  %v2842_v5 = vld [vmem:[%s6284_s1 + $0x1f8] sm:$0xf0]  ;;  %v3681_v6 = vor.u32 %v4143_v53, %v3680_v52  ;;  %v3912_v53 = vld [vmem:[%s6284_s1 + $0x154] sm:$0xf] }
  0x87   :  { %2271 = vmatpush.bf16.msra.mxu3 %v3865_v15  ;;  %v3833_v15 = vor.u32 %v4181_v8, %v3832_v7  ;;  %v3745_v7 = vor.u32 %v4159_v57, %v3744_v56  ;;  %v54_v8 = vld.sshfl [vmem:[#allocation1] sm:$0xff pattern:$0x73625140]  ;;  %v2698_v52 = vld [vmem:[%s6284_s1 + $0xd8] sm:$0xf0] }
  0x88   :  { %2233 = vmatpush.bf16.msra.mxu0 %v3665_v19  ;;  %v3633_v19 = vor.u32 %v4131_v13, %v3632_v12  ;;  %v55_v12 = vld.sshfl [vmem:[#allocation1 + $0x8] sm:$0xff pattern:$0x73625140]  ;;  %v57_v13 = vld.sshfl [vmem:[#allocation1 + $0x18] sm:$0xff pattern:$0x73625140] }
  0x89   :  { %2246 = vmatpush.bf16.msra.mxu1 %v3729_v32  ;;  %v3697_v32 = vor.u32 %v4147_v17, %v3696_v14  ;;  %v3882_v17 = vld [vmem:[%s6284_s1 + $0x64] sm:$0xf]  ;;  %v5319_v41 = vpack.c.bf16 %v57_v13, %v57_v13  ;;  %v2826_v56 = vld [vmem:[%s6284_s1 + $0x1d8] sm:$0xf0]  ;;  %v3908_v13 = vld [vmem:[%s6284_s1 + $0x134] sm:$0xf] }
  0x8a   :  { %2259 = vmatpush.bf16.msra.mxu2 %v3793_v21  ;;  %v3761_v21 = vor.u32 %v4163_v23, %v3760_v20  ;;  %v2642_v20 = vld [vmem:[%s6284_s1 + $0x68] sm:$0xf0]  ;;  %v3898_v23 = vld [vmem:[%s6284_s1 + $0xe4] sm:$0xf] }
  0x8b   :  { %2272 = vmatpush.bf16.msra.mxu3 %v3857_v22  ;;  %v3825_v22 = vor.u32 %v4179_v29, %v3824_v27  ;;  %v2845_v27 = vor.u32 %v3932_v4, %v2842_v5  ;;  %v5298_v29 = vpack.c.bf16 %v54_v8, %v54_v8  ;;  %v2818_v4 = vld [vmem:[%s6284_s1 + $0x1c8] sm:$0xf0]  ;;  %v3876_v8 = vld [vmem:[%s6284_s1 + $0x34] sm:$0xf] }
  0x8c   :  { %2234 = vmatpush.bf16.msra.mxu0 %v3657_v49  ;;  %v3616_v49 = vld [vmem:[%s6284_s1 + $0x800] sm:$0xf] }
  0x8d   :  { %2247 = vmatpush.bf16.msra.mxu1 %v3721_v50  ;;  %v3625_v50 = vor.u32 %v4129_v37, %v3624_v33  ;;  %v5311_v37 = vpack.c.bf16 %v55_v12, %v55_v12  ;;  %v2682_v12 = vld [vmem:[%s6284_s1 + $0xb8] sm:$0xf0] }
  0x8e   :  { %2260 = vmatpush.bf16.msra.mxu2 %v3785_v51  ;;  %v4127_v51 = vld [vmem:[%s6284_s1 + $0x804] sm:$0xf0] }
  0x8f   :  { %2273 = vmatpush.bf16.msra.mxu3 %v3849_v55  ;;  %v3753_v55 = vor.u32 %v4161_v46, %v3752_v45  ;;  %v3617_v2 = vor.u32 %v4127_v51, %v3616_v49  ;;  %v2645_v45 = vor.u32 %v3882_v17, %v2642_v20  ;;  %v2634_v49 = vld [vmem:[%s6284_s1 + $0x58] sm:$0xf0] }
  0x90   :  { %2235 = vmatpush.bf16.msra.mxu0 %v3649_v61  ;;  %v3884_v61 = vld [vmem:[%s6284_s1 + $0x74] sm:$0xf]  ;;  %v2637_v57 = vor.u32 %v3880_v48, %v2634_v49  ;;  %v2810_v17 = vld [vmem:[%s6284_s1 + $0x1b8] sm:$0xf0]  ;;  %v3922_v48 = vld [vmem:[%s6284_s1 + $0x1a4] sm:$0xf] }
  0x91   :  { %2248 = vmatpush.bf16.msra.mxu1 %v3713_v62  ;;  %v2650_v62 = vld [vmem:[%s6284_s1 + $0x78] sm:$0xf0]  ;;  %v2802_v49 = vld [vmem:[%s6284_s1 + $0x1a8] sm:$0xf0] }
  0x92   :  { %2261 = vmatpush.bf16.msra.mxu2 %v3777_v63  ;;  %v3900_v63 = vld [vmem:[%s6284_s1 + $0xf4] sm:$0xf] }
  0x93   :  { %2274 = vmatpush.bf16.msra.mxu3 %v3841_v3  ;;  %v2778_v3 = vld [vmem:[%s6284_s1 + $0x178] sm:$0xf0]  ;;  %v2717_v14 = vor.u32 %v3900_v63, %v2714_v0  ;;  %v2690_v0 = vld [vmem:[%s6284_s1 + $0xc8] sm:$0xf0] }
  0x94   :  { %2236 = vmatpush.bf16.msra.mxu0 %v3641_v9  ;;  %v56_v9 = vld.sshfl [vmem:[#allocation1 + $0x10] sm:$0xff pattern:$0x73625140] }
  0x95   :  { %2249 = vmatpush.bf16.msra.mxu1 %v3705_v10  ;;  %v3809_v10 = vor.u32 %v4175_v60, %v3808_v58  ;;  %v5309_v33 = vpack.c.bf16 %v56_v9, %v56_v9  ;;  %v3878_v60 = vld [vmem:[%s6284_s1 + $0x44] sm:$0xf]  ;;  %v2618_v9 = vld [vmem:[%s6284_s1 + $0x38] sm:$0xf0] }
  0x96   :  { %2262 = vmatpush.bf16.msra.mxu2 %v3769_v11  ;;  %v2653_v11 = vor.u32 %v3884_v61, %v2650_v62  ;;  %v2626_v61 = vld [vmem:[%s6284_s1 + $0x48] sm:$0xf0]  ;;  %v3894_v62 = vld [vmem:[%s6284_s1 + $0xc4] sm:$0xf]  ;;  %v2621_v20 = vor.u32 %v3876_v8, %v2618_v9 }
  0x97   :  { %2275 = vmatpush.bf16.msra.mxu3 %v3833_v15  ;;  %v2781_v15 = vor.u32 %v3916_v1, %v2778_v3  ;;  %v3910_v1 = vld [vmem:[%s6284_s1 + $0x144] sm:$0xf]  ;;  %v2629_v5 = vor.u32 %v3878_v60, %v2626_v61  ;;  %v2730_v60 = vld [vmem:[%s6284_s1 + $0x118] sm:$0xf0]  ;;  %v3920_v61 = vld [vmem:[%s6284_s1 + $0x194] sm:$0xf] }
  0x98   :  { %2237 = vmatpush.bf16.msra.mxu0 %v3633_v19  ;;  %v2706_v19 = vld [vmem:[%s6284_s1 + $0xe8] sm:$0xf0]  ;;  %v3926_v3 = vld [vmem:[%s6284_s1 + $0x1c4] sm:$0xf] }
  0x99   :  { %2250 = vmatpush.bf16.msra.mxu1 %v3697_v32  ;;  %v3914_v32 = vld [vmem:[%s6284_s1 + $0x164] sm:$0xf]  ;;  %v2709_v46 = vor.u32 %v3898_v23, %v2706_v19 }
  0x9a   :  { %2263 = vmatpush.bf16.msra.mxu2 %v3761_v21  ;;  %v2770_v21 = vld [vmem:[%s6284_s1 + $0x168] sm:$0xf0]  ;;  %v3874_v23 = vld [vmem:[%s6284_s1 + $0x24] sm:$0xf] }
  0x9b   :  { %2276 = vmatpush.bf16.msra.mxu3 %v3825_v22  ;;  %v2834_v22 = vld [vmem:[%s6284_s1 + $0x1e8] sm:$0xf0]  ;;  %v2773_v47 = vor.u32 %v3914_v32, %v2770_v21  ;;  %v3890_v21 = vld [vmem:[%s6284_s1 + $0xa4] sm:$0xf] }
  0x9c   :  { %2238 = vmatpush.bf16.msra.mxu0 %v3625_v50  ;;  %v3896_v50 = vld [vmem:[%s6284_s1 + $0xd4] sm:$0xf]  ;;  %v2837_v51 = vor.u32 %v3930_v38, %v2834_v22  ;;  %v2610_v32 = vld [vmem:[%s6284_s1 + $0x28] sm:$0xf0] }
  0x9d   :  { %2251 = vmatpush.bf16.msra.mxu1 %v3689_v54  ;;  %v2762_v54 = vld [vmem:[%s6284_s1 + $0x158] sm:$0xf0]  ;;  %v2701_v58 = vor.u32 %v3896_v50, %v2698_v52  ;;  %v2674_v38 = vld [vmem:[%s6284_s1 + $0xa8] sm:$0xf0]  ;;  %v2613_v50 = vor.u32 %v3874_v23, %v2610_v32 }
  0x9e   :  { %2264 = vmatpush.bf16.msra.mxu2 %v3753_v55  ;;  %v3928_v55 = vld [vmem:[%s6284_s1 + $0x1d4] sm:$0xf]  ;;  %v2677_v52 = vor.u32 %v3890_v21, %v2674_v38  ;;  %v2970_v23 = vld [vmem:[%s6284_s1 + $0x2f8] sm:$0xf0] }
  0x9f   :  { %2277 = vmatpush.bf16.msra.mxu3 %v3817_v59  ;;  %v2765_v59 = vor.u32 %v3912_v53, %v2762_v54  ;;  %v2829_v63 = vor.u32 %v3928_v55, %v2826_v56  ;;  %v2602_v54 = vld [vmem:[%s6284_s1 + $0x18] sm:$0xf0]  ;;  %v3888_v55 = vld [vmem:[%s6284_s1 + $0x94] sm:$0xf] }
  0xa0   :  { %2239 = vmatpush.bf16.msra.mxu0 %v3617_v2  ;;  %v2754_v2 = vld [vmem:[%s6284_s1 + $0x148] sm:$0xf0] }
  0xa1   :  { %2252 = vmatpush.bf16.msra.mxu1 %v3681_v6  ;;  %v2693_v6 = vor.u32 %v3894_v62, %v2690_v0  ;;  %v2794_v62 = vld [vmem:[%s6284_s1 + $0x198] sm:$0xf0]  ;;  %v3870_v0 = vld [vmem:[%s6284_s1 + $0x4] sm:$0xf] }
  0xa2   :  { %2265 = vmatpush.bf16.msra.mxu2 %v3745_v7  ;;  %v2757_v7 = vor.u32 %v3910_v1, %v2754_v2  ;;  %v2594_v1 = vld [vmem:[%s6284_s1 + $0x8] sm:$0xf0]  ;;  %v2797_v9 = vor.u32 %v3920_v61, %v2794_v62  ;;  %v3994_v61 = vld [vmem:[%s6284_s1 + $0x3e4] sm:$0xf] }
  0xa3   :  { %2278 = vmatpush.bf16.msra.mxu3 %v3809_v10  ;;  %2240 = vmatmul.bf16.vlgmr.msra.gmra.mxu0 %v5298_v29  ;;  %v3892_v10 = vld [vmem:[%s6284_s1 + $0xb4] sm:$0xf]  ;;  %v3090_v62 = vld [vmem:[%s6284_s1 + $0x3e8] sm:$0xf0] }
  0xa4   :  { %2284 = vmatpush.bf16.msrb.mxu0 %v2653_v11  ;;  %2253 = vmatmul.bf16.vlgmr.msra.gmra.mxu1 %v5311_v37  ;;  %v2821_v11 = vor.u32 %v3926_v3, %v2818_v4 }
  0xa5   :  { %2297 = vmatpush.bf16.msrb.mxu1 %v2717_v14  ;;  %2266 = vmatmul.bf16.vlgmr.msra.gmra.mxu2 %v5309_v33  ;;  %v2746_v14 = vld [vmem:[%s6284_s1 + $0x138] sm:$0xf0] }
  0xa6   :  { %2310 = vmatpush.bf16.msrb.mxu2 %v2781_v15  ;;  %2279 = vmatmul.bf16.vlgmr.msra.gmra.mxu3 %v5319_v41  ;;  %v3924_v15 = vld [vmem:[%s6284_s1 + $0x1b4] sm:$0xf]  ;;  %v2749_v19 = vor.u32 %v3908_v13, %v2746_v14  ;;  %v2906_v14 = vld [vmem:[%s6284_s1 + $0x278] sm:$0xf0] }
  0xa7   :  { %2323 = vmatpush.bf16.msrb.mxu3 %v2845_v27  ;;  %v2685_v27 = vor.u32 %v3892_v10, %v2682_v12  ;;  %v2813_v22 = vor.u32 %v3924_v15, %v2810_v17  ;;  %v2033_v2 = vpop.f32.mrf.mxu0  ;;  %v2722_v10 = vld [vmem:[%s6284_s1 + $0x108] sm:$0xf0]  ;;  %v3948_v13 = vld [vmem:[%s6284_s1 + $0x274] sm:$0xf] }
  0xa8   :  { %2285 = vmatpush.bf16.msrb.mxu0 %v2645_v45  ;;  %v3906_v45 = vld [vmem:[%s6284_s1 + $0x124] sm:$0xf]  ;;  %v2786_v12 = vld [vmem:[%s6284_s1 + $0x188] sm:$0xf0]  ;;  %v3964_v15 = vld [vmem:[%s6284_s1 + $0x2f4] sm:$0xf]  ;;  %v2046_v17 = vpop.f32.mrf.mxu1 }
  0xa9   :  { %2298 = vmatpush.bf16.msrb.mxu1 %v2709_v46  ;;  %v2738_v46 = vld [vmem:[%s6284_s1 + $0x128] sm:$0xf0] }
  0xaa   :  { %2311 = vmatpush.bf16.msrb.mxu2 %v2773_v47  ;;  %v418_v47 = vld [vmem:[%s6286_s2] sm:$0x3]  ;;  %v2741_v53 = vor.u32 %v3906_v45, %v2738_v46  ;;  %v3098_v45 = vld [vmem:[%s6284_s1 + $0x3f8] sm:$0xf0] }
  0xab   :  { %2324 = vmatpush.bf16.msrb.mxu3 %v2837_v51  ;;  %v3872_v51 = vld [vmem:[%s6284_s1 + $0x14] sm:$0xf]  ;;  %v420_v56 = vperm.slane %v418_v47, 0  ;;  %v2909_v47 = vor.u32 %v3948_v13, %v2906_v14 }
  0xac   :  { %2286 = vmatpush.bf16.msrb.mxu0 %v2637_v57  ;;  %v2805_v57 = vor.u32 %v3922_v48, %v2802_v49  ;;  %v2059_v48 = vpop.f32.mrf.mxu2  ;;  %v2973_v49 = vor.u32 %v3964_v15, %v2970_v23 }
  0xad   :  { %2299 = vmatpush.bf16.msrb.mxu1 %v2701_v58  ;;  %v2666_v58 = vld [vmem:[%s6284_s1 + $0x98] sm:$0xf0]  ;;  %v2034_v8 = vadd.f32 %v2033_v2, %v420_v56 }
  0xae   :  { %2312 = vmatpush.bf16.msrb.mxu2 %v2765_v59  ;;  %v3904_v59 = vld [vmem:[%s6284_s1 + $0x114] sm:$0xf]  ;;  %v2669_v3 = vor.u32 %v3888_v55, %v2666_v58  ;;  %v3978_v58 = vld [vmem:[%s6284_s1 + $0x364] sm:$0xf] }
  0xaf   :  { %2325 = vmatpush.bf16.msrb.mxu3 %v2829_v63  ;;  %v2605_v63 = vor.u32 %v3872_v51, %v2602_v54  ;;  %v2733_v4 = vor.u32 %v3904_v59, %v2730_v60  ;;  %v2047_v32 = vadd.f32 %v2046_v17, %v2034_v8  ;;  %v3946_v51 = vld [vmem:[%s6284_s1 + $0x264] sm:$0xf]  ;;  %v2072_v55 = vpop.f32.mrf.mxu3  ;;  %v3026_v59 = vld [vmem:[%s6284_s1 + $0x368] sm:$0xf0]  ;;  %v2035_v60 = vpop.f32.mrf.mxu0  ;;  %v2954_v8 = vld [vmem:[%s6284_s1 + $0x2d8] sm:$0xf0] }
  0xb0   :  { %2287 = vmatpush.bf16.msrb.mxu0 %v2629_v5  ;;  %v3886_v5 = vld [vmem:[%s6284_s1 + $0x84] sm:$0xf]  ;;  %v3029_v2 = vor.u32 %v3978_v58, %v3026_v59 }
  0xb1   :  { %2300 = vmatpush.bf16.msrb.mxu1 %v2693_v6  ;;  %v2658_v6 = vld [vmem:[%s6284_s1 + $0x88] sm:$0xf0]  ;;  %v2060_v54 = vadd.f32 %v2059_v48, %v2047_v32  ;;  %v3942_v17 = vld [vmem:[%s6284_s1 + $0x244] sm:$0xf]  ;;  %v2874_v48 = vld [vmem:[%s6284_s1 + $0x238] sm:$0xf0] }
  0xb2   :  { %2313 = vmatpush.bf16.msrb.mxu2 %v2757_v7  ;;  %v3902_v7 = vld [vmem:[%s6284_s1 + $0x104] sm:$0xf]  ;;  %v2661_v21 = vor.u32 %v3886_v5, %v2658_v6  ;;  %v3960_v5 = vld [vmem:[%s6284_s1 + $0x2d4] sm:$0xf]  ;;  %v2048_v6 = vpop.f32.mrf.mxu1 }
  0xb3   :  { %2326 = vmatpush.bf16.msrb.mxu3 %v2821_v11  ;;  %v3918_v11 = vld [vmem:[%s6284_s1 + $0x184] sm:$0xf]  ;;  %v2725_v38 = vor.u32 %v3902_v7, %v2722_v10  ;;  %v3093_v7 = vor.u32 %v3994_v61, %v3090_v62  ;;  %v3018_v10 = vld [vmem:[%s6284_s1 + $0x358] sm:$0xf0] }
  0xb4   :  { %2288 = vmatpush.bf16.msrb.mxu0 %v2621_v20  ;;  %v2597_v20 = vor.u32 %v3870_v0, %v2594_v1  ;;  %v2789_v46 = vor.u32 %v3918_v11, %v2786_v12  ;;  %v3992_v11 = vld [vmem:[%s6284_s1 + $0x3d4] sm:$0xf]  ;;  %v3082_v12 = vld [vmem:[%s6284_s1 + $0x3d8] sm:$0xf0]  ;;  %v2061_v14 = vpop.f32.mrf.mxu2  ;;  %v3990_v32 = vld [vmem:[%s6284_s1 + $0x3c4] sm:$0xf] }
  0xb5   :  { %2301 = vmatpush.bf16.msrb.mxu1 %v2685_v27  ;;  %v3980_v27 = vld [vmem:[%s6284_s1 + $0x374] sm:$0xf]  ;;  %v3085_v23 = vor.u32 %v3992_v11, %v3082_v12  ;;  %v3938_v62 = vld [vmem:[%s6284_s1 + $0x224] sm:$0xf] }
  0xb6   :  { %2314 = vmatpush.bf16.msrb.mxu2 %v2749_v19  ;;  %v3034_v19 = vld [vmem:[%s6284_s1 + $0x378] sm:$0xf0] }
  0xb7   :  { %2327 = vmatpush.bf16.msrb.mxu3 %v2813_v22  ;;  %v3996_v22 = vld [vmem:[%s6284_s1 + $0x3f4] sm:$0xf] }
  0xb8   :  { %2289 = vmatpush.bf16.msrb.mxu0 %v2613_v50  ;;  %v3037_v50 = vor.u32 %v3980_v27, %v3034_v19  ;;  %v3101_v56 = vor.u32 %v3996_v22, %v3098_v45  ;;  %v3974_v27 = vld [vmem:[%s6284_s1 + $0x344] sm:$0xf]  ;;  %v3010_v19 = vld [vmem:[%s6284_s1 + $0x348] sm:$0xf0] }
  0xb9   :  { %2302 = vmatpush.bf16.msrb.mxu1 %v2677_v52  ;;  %v2898_v52 = vld [vmem:[%s6284_s1 + $0x268] sm:$0xf0] }
  0xba   :  { %2315 = vmatpush.bf16.msrb.mxu2 %v2741_v53  ;;  %v3962_v53 = vld [vmem:[%s6284_s1 + $0x2e4] sm:$0xf]  ;;  %v2901_v0 = vor.u32 %v3946_v51, %v2898_v52 }
  0xbb   :  { %2328 = vmatpush.bf16.msrb.mxu3 %v2805_v57  ;;  %v2962_v57 = vld [vmem:[%s6284_s1 + $0x2e8] sm:$0xf0] }
  0xbc   :  { %2290 = vmatpush.bf16.msrb.mxu0 %v2605_v63  ;;  %v2073_v63 = vadd.f32 %v2072_v55, %v2060_v54  ;;  %v2965_v1 = vor.u32 %v3962_v53, %v2962_v57  ;;  %v2938_v53 = vld [vmem:[%s6284_s1 + $0x2b8] sm:$0xf0]  ;;  %v3972_v54 = vld [vmem:[%s6284_s1 + $0x334] sm:$0xf] }
  0xbd   :  { %2303 = vmatpush.bf16.msrb.mxu1 %v2669_v3  ;;  %v3944_v3 = vld [vmem:[%s6284_s1 + $0x254] sm:$0xf]  ;;  %v3002_v55 = vld [vmem:[%s6284_s1 + $0x338] sm:$0xf0] }
  0xbe   :  { %2316 = vmatpush.bf16.msrb.mxu2 %v2733_v4  ;;  %v2890_v4 = vld [vmem:[%s6284_s1 + $0x258] sm:$0xf0]  ;;  %v3005_v61 = vor.u32 %v3972_v54, %v3002_v55  ;;  %v4012_v55 = vld [vmem:[%s6284_s1 + $0x474] sm:$0xf] }
  0xbf   :  { %2329 = vmatpush.bf16.msrb.mxu3 %v2797_v9  ;;  %v3976_v9 = vld [vmem:[%s6284_s1 + $0x354] sm:$0xf]  ;;  %v2893_v13 = vor.u32 %v3944_v3, %v2890_v4  ;;  %v3066_v57 = vld [vmem:[%s6284_s1 + $0x3b8] sm:$0xf0]  ;;  %v2930_v3 = vld [vmem:[%s6284_s1 + $0x2a8] sm:$0xf0] }
  0xc0   :  { %2291 = vmatpush.bf16.msrb.mxu0 %v2597_v20  ;;  %v3021_v15 = vor.u32 %v3976_v9, %v3018_v10  ;;  %v2882_v20 = vld [vmem:[%s6284_s1 + $0x248] sm:$0xf0]  ;;  %v2085_v22 = vpop.f32.mrf.mxu0  ;;  %v3970_v4 = vld [vmem:[%s6284_s1 + $0x324] sm:$0xf] }
  0xc1   :  { %2304 = vmatpush.bf16.msrb.mxu1 %v2661_v21  ;;  %v3074_v21 = vld [vmem:[%s6284_s1 + $0x3c8] sm:$0xf0]  ;;  %v2098_v51 = vpop.f32.mrf.mxu1 }
  0xc2   :  { %2317 = vmatpush.bf16.msrb.mxu2 %v2725_v38  ;;  %v2885_v38 = vor.u32 %v3942_v17, %v2882_v20  ;;  %v3077_v52 = vor.u32 %v3990_v32, %v3074_v21  ;;  %v3058_v9 = vld [vmem:[%s6284_s1 + $0x3a8] sm:$0xf0]  ;;  %v3952_v17 = vld [vmem:[%s6284_s1 + $0x294] sm:$0xf]  ;;  %v3934_v21 = vld [vmem:[%s6284_s1 + $0x204] sm:$0xf] }
  0xc3   :  { %2330 = vmatpush.bf16.msrb.mxu3 %v2789_v46  ;;  %2292 = vmatmul.bf16.vlgmr.msrb.gmra.mxu0 %v4558_v36  ;;  %v3958_v36 = vld [vmem:[%s6284_s1 + $0x2c4] sm:$0xf]  ;;  %v3013_v46 = vor.u32 %v3974_v27, %v3010_v19  ;;  %v3984_v27 = vld [vmem:[%s6284_s1 + $0x394] sm:$0xf]  ;;  %v3050_v19 = vld [vmem:[%s6284_s1 + $0x398] sm:$0xf0] }
  0xc4   :  { %2336 = vmatpush.bf16.msra.mxu0 %v2909_v47  ;;  %2305 = vmatmul.bf16.vlgmr.msrb.gmra.mxu1 %v4568_v43  ;;  %v2946_v43 = vld [vmem:[%s6284_s1 + $0x2c8] sm:$0xf0]  ;;  %v3940_v47 = vld [vmem:[%s6284_s1 + $0x234] sm:$0xf] }
  0xc5   :  { %2349 = vmatpush.bf16.msra.mxu1 %v2973_v49  ;;  %2318 = vmatmul.bf16.vlgmr.msrb.gmra.mxu2 %v4556_v35  ;;  %v2957_v35 = vor.u32 %v3960_v5, %v2954_v8  ;;  %v2949_v45 = vor.u32 %v3958_v36, %v2946_v43  ;;  %v3956_v49 = vld [vmem:[%s6284_s1 + $0x2b4] sm:$0xf]  ;;  %v2877_v59 = vor.u32 %v3940_v47, %v2874_v48  ;;  %v2994_v5 = vld [vmem:[%s6284_s1 + $0x328] sm:$0xf0]  ;;  %v3986_v8 = vld [vmem:[%s6284_s1 + $0x3a4] sm:$0xf] }
  0xc6   :  { %2362 = vmatpush.bf16.msra.mxu2 %v3037_v50  ;;  %2331 = vmatmul.bf16.vlgmr.msrb.gmra.mxu3 %v4566_v42  ;;  %v2074_v42 = vpop.f32.mrf.mxu3  ;;  %v2086_v50 = vadd.f32 %v2085_v22, %v2073_v63  ;;  %v2941_v60 = vor.u32 %v3956_v49, %v2938_v53  ;;  %v2866_v63 = vld [vmem:[%s6284_s1 + $0x228] sm:$0xf0]  ;;  %v2997_v14 = vor.u32 %v3970_v4, %v2994_v5  ;;  %v2986_v43 = vld [vmem:[%s6284_s1 + $0x318] sm:$0xf0]  ;;  %v3966_v48 = vld [vmem:[%s6284_s1 + $0x304] sm:$0xf] }
  0xc7   :  { %2375 = vmatpush.bf16.msra.mxu3 %v3101_v56  ;;  %v3988_v56 = vld [vmem:[%s6284_s1 + $0x3b4] sm:$0xf]  ;;  %v2869_v10 = vor.u32 %v3938_v62, %v2866_v63  ;;  %v3061_v36 = vor.u32 %v3986_v8, %v3058_v9  ;;  %v2922_v42 = vld [vmem:[%s6284_s1 + $0x298] sm:$0xf0]  ;;  %v2914_v47 = vld [vmem:[%s6284_s1 + $0x288] sm:$0xf0] }
  0xc8   :  { %2337 = vmatpush.bf16.msra.mxu0 %v2901_v0  ;;  %v2099_v58 = vadd.f32 %v2098_v51, %v2086_v50  ;;  %v3954_v0 = vld [vmem:[%s6284_s1 + $0x2a4] sm:$0xf]  ;;  %v2087_v12 = vpop.f32.mrf.mxu0  ;;  %v2925_v22 = vor.u32 %v3952_v17, %v2922_v42  ;;  %v3053_v50 = vor.u32 %v3984_v27, %v3050_v19  ;;  %v2978_v51 = vld [vmem:[%s6284_s1 + $0x308] sm:$0xf0]  ;;  %v3146_v42 = vld [vmem:[%s6284_s1 + $0x458] sm:$0xf0] }
  0xc9   :  { %2350 = vmatpush.bf16.msra.mxu1 %v2965_v1  ;;  %v2111_v1 = vpop.f32.mrf.mxu2  ;;  %v2100_v20 = vpop.f32.mrf.mxu1  ;;  %v3042_v53 = vld [vmem:[%s6284_s1 + $0x388] sm:$0xf0]  ;;  %v2981_v63 = vor.u32 %v3966_v48, %v2978_v51  ;;  %v4026_v8 = vld [vmem:[%s6284_s1 + $0x4e4] sm:$0xf]  ;;  %v3210_v27 = vld [vmem:[%s6284_s1 + $0x4d8] sm:$0xf0] }
  0xca   :  { %2363 = vmatpush.bf16.msra.mxu2 %v3029_v2  ;;  %v3069_v2 = vor.u32 %v3988_v56, %v3066_v57  ;;  %v2112_v6 = vadd.f32 %v2111_v1, %v2099_v58  ;;  %v3162_v56 = vld [vmem:[%s6284_s1 + $0x478] sm:$0xf0]  ;;  %v4028_v57 = vld [vmem:[%s6284_s1 + $0x4f4] sm:$0xf]  ;;  %v4042_v12 = vld [vmem:[%s6284_s1 + $0x564] sm:$0xf] }
  0xcb   :  { %2376 = vmatpush.bf16.msra.mxu3 %v3093_v7  ;;  %v3354_v1 = vld [vmem:[%s6284_s1 + $0x5f8] sm:$0xf0]  ;;  %v4040_v19 = vld [vmem:[%s6284_s1 + $0x554] sm:$0xf]  ;;  %v4038_v48 = vld [vmem:[%s6284_s1 + $0x544] sm:$0xf] }
  0xcc   :  { %2338 = vmatpush.bf16.msra.mxu0 %v2893_v13  ;;  %v2933_v13 = vor.u32 %v3954_v0, %v2930_v3  ;;  %v4060_v0 = vld [vmem:[%s6284_s1 + $0x5f4] sm:$0xf]  ;;  %v3165_v3 = vor.u32 %v4012_v55, %v3162_v56  ;;  %v4054_v51 = vld [vmem:[%s6284_s1 + $0x5c4] sm:$0xf] }
  0xcd   :  { %2351 = vmatpush.bf16.msra.mxu1 %v2957_v35  ;;  %v3936_v35 = vld [vmem:[%s6284_s1 + $0x214] sm:$0xf]  ;;  %v3357_v9 = vor.u32 %v4060_v0, %v3354_v1  ;;  %v3258_v0 = vld [vmem:[%s6284_s1 + $0x538] sm:$0xf0] }
  0xce   :  { %2364 = vmatpush.bf16.msra.mxu2 %v3021_v15  ;;  %v2124_v7 = vpop.f32.mrf.mxu3  ;;  %v2858_v15 = vld [vmem:[%s6284_s1 + $0x218] sm:$0xf0]  ;;  %v4052_v1 = vld [vmem:[%s6284_s1 + $0x5b4] sm:$0xf] }
  0xcf   :  { %2377 = vmatpush.bf16.msra.mxu3 %v3085_v23  ;;  %v5620_v11 = vadd.f32 %v2124_v7, %v2112_v6  ;;  %v3968_v23 = vld [vmem:[%s6284_s1 + $0x314] sm:$0xf]  ;;  %v2861_v32 = vor.u32 %v3936_v35, %v2858_v15  ;;  %v4010_v6 = vld [vmem:[%s6284_s1 + $0x464] sm:$0xf]  ;;  %v3154_v7 = vld [vmem:[%s6284_s1 + $0x468] sm:$0xf0] }
  0xd0   :  { %2339 = vmatpush.bf16.msra.mxu0 %v2885_v38  ;;  %v2850_v38 = vld [vmem:[%s6284_s1 + $0x208] sm:$0xf0]  ;;  %v3157_v15 = vor.u32 %v4010_v6, %v3154_v7  ;;  %v4002_v6 = vld [vmem:[%s6284_s1 + $0x424] sm:$0xf] }
  0xd1   :  { %2352 = vmatpush.bf16.msra.mxu1 %v2949_v45  ;;  %v2989_v45 = vor.u32 %v3968_v23, %v2986_v43  ;;  %v2113_v49 = vpop.f32.mrf.mxu2  ;;  %v2853_v58 = vor.u32 %v3934_v21, %v2850_v38  ;;  %v3346_v35 = vld [vmem:[%s6284_s1 + $0x5e8] sm:$0xf0]  ;;  %v4024_v23 = vld [vmem:[%s6284_s1 + $0x4d4] sm:$0xf] }
  0xd2   :  { %2365 = vmatpush.bf16.msra.mxu2 %v3013_v46  ;;  %v3950_v46 = vld [vmem:[%s6284_s1 + $0x284] sm:$0xf]  ;;  %v4056_v21 = vld [vmem:[%s6284_s1 + $0x5d4] sm:$0xf]  ;;  %v3266_v49 = vld [vmem:[%s6284_s1 + $0x548] sm:$0xf0] }
  0xd3   :  { %2378 = vmatpush.bf16.msra.mxu3 %v3077_v52  ;;  %v3982_v52 = vld [vmem:[%s6284_s1 + $0x384] sm:$0xf]  ;;  %v2917_v62 = vor.u32 %v3950_v46, %v2914_v47  ;;  %v3138_v47 = vld [vmem:[%s6284_s1 + $0x448] sm:$0xf0] }
  0xd4   :  { %2340 = vmatpush.bf16.msra.mxu0 %v2877_v59  ;;  %v3226_v59 = vld [vmem:[%s6284_s1 + $0x4f8] sm:$0xf0]  ;;  %v4006_v46 = vld [vmem:[%s6284_s1 + $0x444] sm:$0xf]  ;;  %v3122_v7 = vld [vmem:[%s6284_s1 + $0x428] sm:$0xf0] }
  0xd5   :  { %2353 = vmatpush.bf16.msra.mxu1 %v2941_v60  ;;  %v4044_v60 = vld [vmem:[%s6284_s1 + $0x574] sm:$0xf]  ;;  %v3229_v4 = vor.u32 %v4028_v57, %v3226_v59  ;;  %v3269_v57 = vor.u32 %v4038_v48, %v3266_v49  ;;  %v3130_v59 = vld [vmem:[%s6284_s1 + $0x438] sm:$0xf0]  ;;  %v3106_v48 = vld [vmem:[%s6284_s1 + $0x408] sm:$0xf0] }
  0xd6   :  { %2366 = vmatpush.bf16.msra.mxu2 %v3005_v61  ;;  %v2126_v54 = vpop.f32.mrf.mxu3  ;;  %v3290_v61 = vld [vmem:[%s6284_s1 + $0x578] sm:$0xf0] }
  0xd7   :  { %2379 = vmatpush.bf16.msra.mxu3 %v3069_v2  ;;  %v3045_v2 = vor.u32 %v3982_v52, %v3042_v53  ;;  %v3293_v5 = vor.u32 %v4044_v60, %v3290_v61  ;;  %v3330_v52 = vld [vmem:[%s6284_s1 + $0x5c8] sm:$0xf0]  ;;  %v3141_v54 = vor.u32 %v4006_v46, %v3138_v47  ;;  %v4020_v60 = vld [vmem:[%s6284_s1 + $0x4b4] sm:$0xf]  ;;  %v3242_v46 = vld [vmem:[%s6284_s1 + $0x518] sm:$0xf0] }
  0xd8   :  { %2341 = vmatpush.bf16.msra.mxu0 %v2869_v10  ;;  %v3218_v10 = vld [vmem:[%s6284_s1 + $0x4e8] sm:$0xf0]  ;;  %v4048_v47 = vld [vmem:[%s6284_s1 + $0x594] sm:$0xf] }
  0xd9   :  { %2354 = vmatpush.bf16.msra.mxu1 %v2933_v13  ;;  %v3282_v13 = vld [vmem:[%s6284_s1 + $0x568] sm:$0xf0]  ;;  %v3221_v17 = vor.u32 %v4026_v8, %v3218_v10  ;;  %v4018_v8 = vld [vmem:[%s6284_s1 + $0x4a4] sm:$0xf] }
  0xda   :  { %2367 = vmatpush.bf16.msra.mxu2 %v2997_v14  ;;  %v4058_v14 = vld [vmem:[%s6284_s1 + $0x5e4] sm:$0xf]  ;;  %v3285_v20 = vor.u32 %v4042_v12, %v3282_v13  ;;  %v3186_v12 = vld [vmem:[%s6284_s1 + $0x4a8] sm:$0xf0] }
  0xdb   :  { %2380 = vmatpush.bf16.msra.mxu3 %v3061_v36  ;;  %v4008_v36 = vld [vmem:[%s6284_s1 + $0x454] sm:$0xf]  ;;  %v3349_v43 = vor.u32 %v4058_v14, %v3346_v35  ;;  %v4034_v13 = vld [vmem:[%s6284_s1 + $0x524] sm:$0xf]  ;;  %v3250_v14 = vld [vmem:[%s6284_s1 + $0x528] sm:$0xf0] }
  0xdc   :  { %2342 = vmatpush.bf16.msra.mxu0 %v2861_v32  ;;  %v3274_v32 = vld [vmem:[%s6284_s1 + $0x558] sm:$0xf0]  ;;  %v3149_v38 = vor.u32 %v4008_v36, %v3146_v42  ;;  %v3125_v42 = vor.u32 %v4002_v6, %v3122_v7 }
  0xdd   :  { %2355 = vmatpush.bf16.msra.mxu1 %v2925_v22  ;;  %v3213_v22 = vor.u32 %v4024_v23, %v3210_v27  ;;  %v3189_v27 = vor.u32 %v4018_v8, %v3186_v12  ;;  %v3410_v12 = vld [vmem:[%s6284_s1 + $0x668] sm:$0xf0] }
  0xde   :  { %2368 = vmatpush.bf16.msra.mxu2 %v2989_v45  ;;  %v3277_v45 = vor.u32 %v4040_v19, %v3274_v32  ;;  %v3253_v19 = vor.u32 %v4034_v13, %v3250_v14  ;;  %v4000_v32 = vld [vmem:[%s6284_s1 + $0x414] sm:$0xf]  ;;  %v4090_v13 = vld [vmem:[%s6284_s1 + $0x6e4] sm:$0xf] }
  0xdf   :  { %2381 = vmatpush.bf16.msra.mxu3 %v3053_v50 }
  0xe0   :  { %2343 = vmatpush.bf16.msra.mxu0 %v2853_v58  ;;  %v2137_v50 = vpop.f32.mrf.mxu0  ;;  %v4004_v58 = vld [vmem:[%s6284_s1 + $0x434] sm:$0xf] }
  0xe1   :  { %2356 = vmatpush.bf16.msra.mxu1 %v2917_v62  ;;  %v2138_v53 = vadd.f32 %v2137_v50, %v5620_v11  ;;  %v2150_v55 = vpop.f32.mrf.mxu1  ;;  %v3333_v11 = vor.u32 %v4054_v51, %v3330_v52  ;;  %v3194_v62 = vld [vmem:[%s6284_s1 + $0x4b8] sm:$0xf0]  ;;  %v4014_v51 = vld [vmem:[%s6284_s1 + $0x484] sm:$0xf]  ;;  %v3170_v52 = vld [vmem:[%s6284_s1 + $0x488] sm:$0xf0] }
  0xe2   :  { %2369 = vmatpush.bf16.msra.mxu2 %v2981_v63  ;;  %v4036_v63 = vld [vmem:[%s6284_s1 + $0x534] sm:$0xf] }
  0xe3   :  { %2382 = vmatpush.bf16.msra.mxu3 %v3045_v2  ;;  %2344 = vmatmul.bf16.vlgmr.msra.gmra.mxu0 %v4684_v39  ;;  %v4022_v39 = vld [vmem:[%s6284_s1 + $0x4c4] sm:$0xf]  ;;  %v2151_v61 = vadd.f32 %v2150_v55, %v2138_v53  ;;  %v3322_v2 = vld [vmem:[%s6284_s1 + $0x5b8] sm:$0xf0]  ;;  %v3234_v55 = vld [vmem:[%s6284_s1 + $0x508] sm:$0xf0] }
  0xe4   :  { %2388 = vmatpush.bf16.msrb.mxu0 %v3165_v3  ;;  %2357 = vmatmul.bf16.vlgmr.msra.gmra.mxu1 %v4688_v44  ;;  %v3202_v44 = vld [vmem:[%s6284_s1 + $0x4c8] sm:$0xf0]  ;;  %v3133_v3 = vor.u32 %v4004_v58, %v3130_v59  ;;  %v4030_v53 = vld [vmem:[%s6284_s1 + $0x504] sm:$0xf]  ;;  %v4076_v59 = vld [vmem:[%s6284_s1 + $0x674] sm:$0xf] }
  0xe5   :  { %2401 = vmatpush.bf16.msrb.mxu1 %v3229_v4  ;;  %2370 = vmatmul.bf16.vlgmr.msra.gmra.mxu2 %v4676_v34  ;;  %v3338_v34 = vld [vmem:[%s6284_s1 + $0x5d8] sm:$0xf0]  ;;  %v3205_v56 = vor.u32 %v4022_v39, %v3202_v44  ;;  %v3197_v4 = vor.u32 %v4020_v60, %v3194_v62  ;;  %v3998_v44 = vld [vmem:[%s6284_s1 + $0x404] sm:$0xf] }
  0xe6   :  { %2414 = vmatpush.bf16.msrb.mxu2 %v3293_v5  ;;  %2383 = vmatmul.bf16.vlgmr.msra.gmra.mxu3 %v4686_v40  ;;  %v3341_v40 = vor.u32 %v4056_v21, %v3338_v34  ;;  %v3261_v5 = vor.u32 %v4036_v63, %v3258_v0  ;;  %v3114_v21 = vld [vmem:[%s6284_s1 + $0x418] sm:$0xf0]  ;;  %v4016_v34 = vld [vmem:[%s6284_s1 + $0x494] sm:$0xf]  ;;  %v3109_v62 = vor.u32 %v3998_v44, %v3106_v48  ;;  %v4086_v44 = vld [vmem:[%s6284_s1 + $0x6c4] sm:$0xf] }
  0xe7   :  { %2427 = vmatpush.bf16.msrb.mxu3 %v3357_v9  ;;  %v3325_v9 = vor.u32 %v4052_v1, %v3322_v2  ;;  %v3306_v39 = vld [vmem:[%s6284_s1 + $0x598] sm:$0xf0]  ;;  %v4108_v0 = vld [vmem:[%s6284_s1 + $0x774] sm:$0xf]  ;;  %v3173_v2 = vor.u32 %v4014_v51, %v3170_v52  ;;  %v3458_v48 = vld [vmem:[%s6284_s1 + $0x6c8] sm:$0xf0] }
  0xe8   :  { %2389 = vmatpush.bf16.msrb.mxu0 %v3157_v15  ;;  %v2163_v10 = vpop.f32.mrf.mxu2  ;;  %v2139_v36 = vpop.f32.mrf.mxu0  ;;  %v3418_v60 = vld [vmem:[%s6284_s1 + $0x678] sm:$0xf0]  ;;  %v4118_v52 = vld [vmem:[%s6284_s1 + $0x7c4] sm:$0xf] }
  0xe9   :  { %2402 = vmatpush.bf16.msrb.mxu1 %v3221_v17  ;;  %v2164_v35 = vadd.f32 %v2163_v10, %v2151_v61  ;;  %v2176_v15 = vpop.f32.mrf.mxu3  ;;  %v4050_v17 = vld [vmem:[%s6284_s1 + $0x5a4] sm:$0xf]  ;;  %v2152_v23 = vpop.f32.mrf.mxu1  ;;  %v3482_v63 = vld [vmem:[%s6284_s1 + $0x6f8] sm:$0xf0]  ;;  %v3421_v7 = vor.u32 %v4076_v59, %v3418_v60  ;;  %v3602_v36 = vld [vmem:[%s6284_s1 + $0x7e8] sm:$0xf0] }
  0xea   :  { %2415 = vmatpush.bf16.msrb.mxu2 %v3285_v20  ;;  %v3314_v20 = vld [vmem:[%s6284_s1 + $0x5a8] sm:$0xf0]  ;;  %v3546_v1 = vld [vmem:[%s6284_s1 + $0x778] sm:$0xf0]  ;;  %v4074_v10 = vld [vmem:[%s6284_s1 + $0x664] sm:$0xf] }
  0xeb   :  { %2428 = vmatpush.bf16.msrb.mxu3 %v3349_v43  ;;  %v5819_v43 = vadd.f32 %v2176_v15, %v2164_v35  ;;  %v3474_v35 = vld [vmem:[%s6284_s1 + $0x6e8] sm:$0xf0]  ;;  %v4106_v15 = vld [vmem:[%s6284_s1 + $0x764] sm:$0xf]  ;;  %v4068_v59 = vld [vmem:[%s6284_s1 + $0x634] sm:$0xf] }
  0xec   :  { %2390 = vmatpush.bf16.msrb.mxu0 %v3149_v38  ;;  %v3317_v38 = vor.u32 %v4050_v17, %v3314_v20  ;;  %v3538_v17 = vld [vmem:[%s6284_s1 + $0x768] sm:$0xf0]  ;;  %v4122_v20 = vld [vmem:[%s6284_s1 + $0x7e4] sm:$0xf]  ;;  %v3477_v23 = vor.u32 %v4090_v13, %v3474_v35  ;;  %v3386_v60 = vld [vmem:[%s6284_s1 + $0x638] sm:$0xf0] }
  0xed   :  { %2403 = vmatpush.bf16.msrb.mxu1 %v3213_v22  ;;  %v3178_v22 = vld [vmem:[%s6284_s1 + $0x498] sm:$0xf0]  ;;  %v4098_v13 = vld [vmem:[%s6284_s1 + $0x724] sm:$0xf] }
  0xee   :  { %2416 = vmatpush.bf16.msrb.mxu2 %v3277_v45  ;;  %v4032_v45 = vld [vmem:[%s6284_s1 + $0x514] sm:$0xf]  ;;  %v3181_v49 = vor.u32 %v4016_v34, %v3178_v22  ;;  %v3605_v34 = vor.u32 %v4122_v20, %v3602_v36  ;;  %v3570_v20 = vld [vmem:[%s6284_s1 + $0x7a8] sm:$0xf0] }
  0xef   :  { %2429 = vmatpush.bf16.msrb.mxu3 %v3341_v40  ;;  %v3117_v40 = vor.u32 %v4000_v32, %v3114_v21  ;;  %v3245_v50 = vor.u32 %v4032_v45, %v3242_v46  ;;  %v3402_v32 = vld [vmem:[%s6284_s1 + $0x658] sm:$0xf0]  ;;  %v4088_v21 = vld [vmem:[%s6284_s1 + $0x6d4] sm:$0xf] }
  0xf0   :  { %2391 = vmatpush.bf16.msrb.mxu0 %v3141_v54  ;;  %v3309_v54 = vor.u32 %v4048_v47, %v3306_v39  ;;  %v2165_v58 = vpop.f32.mrf.mxu2  ;;  %v4104_v22 = vld [vmem:[%s6284_s1 + $0x754] sm:$0xf]  ;;  %v3530_v45 = vld [vmem:[%s6284_s1 + $0x758] sm:$0xf0] }
  0xf1   :  { %2404 = vmatpush.bf16.msrb.mxu1 %v3205_v56  ;;  %v4046_v56 = vld [vmem:[%s6284_s1 + $0x584] sm:$0xf]  ;;  %v2178_v61 = vpop.f32.mrf.mxu3  ;;  %v3594_v46 = vld [vmem:[%s6284_s1 + $0x7d8] sm:$0xf0] }
  0xf2   :  { %2417 = vmatpush.bf16.msrb.mxu2 %v3269_v57  ;;  %v3298_v57 = vld [vmem:[%s6284_s1 + $0x588] sm:$0xf0] }
  0xf3   :  { %2430 = vmatpush.bf16.msrb.mxu3 %v3333_v11  ;;  %v4092_v11 = vld [vmem:[%s6284_s1 + $0x6f4] sm:$0xf]  ;;  %v3301_v6 = vor.u32 %v4046_v56, %v3298_v57  ;;  %v3461_v57 = vor.u32 %v4086_v44, %v3458_v48  ;;  %v4078_v48 = vld [vmem:[%s6284_s1 + $0x684] sm:$0xf] }
  0xf4   :  { %2392 = vmatpush.bf16.msrb.mxu0 %v3133_v3  ;;  %v3237_v3 = vor.u32 %v4030_v53, %v3234_v55  ;;  %v3485_v8 = vor.u32 %v4092_v11, %v3482_v63  ;;  %v3586_v53 = vld [vmem:[%s6284_s1 + $0x7c8] sm:$0xf0]  ;;  %v4084_v11 = vld [vmem:[%s6284_s1 + $0x6b4] sm:$0xf] }
  0xf5   :  { %2405 = vmatpush.bf16.msrb.mxu1 %v3197_v4  ;;  %v4124_v4 = vld [vmem:[%s6284_s1 + $0x7f4] sm:$0xf] }
  0xf6   :  { %2418 = vmatpush.bf16.msrb.mxu2 %v3261_v5  ;;  %v3610_v5 = vld [vmem:[%s6284_s1 + $0x7f8] sm:$0xf0]  ;;  %v4100_v63 = vld [vmem:[%s6284_s1 + $0x734] sm:$0xf] }
  0xf7   :  { %2431 = vmatpush.bf16.msrb.mxu3 %v3325_v9  ;;  %v3549_v9 = vor.u32 %v4108_v0, %v3546_v1  ;;  %v3613_v14 = vor.u32 %v4124_v4, %v3610_v5  ;;  %v3514_v0 = vld [vmem:[%s6284_s1 + $0x738] sm:$0xf0]  ;;  %v4116_v1 = vld [vmem:[%s6284_s1 + $0x7b4] sm:$0xf] }
  0xf8   :  { %2393 = vmatpush.bf16.msrb.mxu0 %v3125_v42  ;;  %v3413_v42 = vor.u32 %v4074_v10, %v3410_v12  ;;  %v3517_v5 = vor.u32 %v4100_v63, %v3514_v0  ;;  %v3442_v12 = vld [vmem:[%s6284_s1 + $0x6a8] sm:$0xf0]  ;;  %v4188_v0 = vld [vmem:[%s6284_s1 + $0x9f4] sm:$0xf] }
  0xf9   :  { %2406 = vmatpush.bf16.msrb.mxu1 %v3189_v27  ;;  %v3541_v27 = vor.u32 %v4106_v15, %v3538_v17  ;;  %v4114_v17 = vld [vmem:[%s6284_s1 + $0x7a4] sm:$0xf] }
  0xfa   :  { %2419 = vmatpush.bf16.msrb.mxu2 %v3253_v19  ;;  %v4072_v19 = vld [vmem:[%s6284_s1 + $0x654] sm:$0xf] }
  0xfb   :  { %2432 = vmatpush.bf16.msrb.mxu3 %v3317_v38  ;;  %v3466_v38 = vld [vmem:[%s6284_s1 + $0x6d8] sm:$0xf0]  ;;  %v3405_v47 = vor.u32 %v4072_v19, %v3402_v32 }
  0xfc   :  { %2394 = vmatpush.bf16.msrb.mxu0 %v3117_v40  ;;  %v3469_v39 = vor.u32 %v4088_v21, %v3466_v38  ;;  %v3533_v40 = vor.u32 %v4104_v22, %v3530_v45  ;;  %v4064_v21 = vld [vmem:[%s6284_s1 + $0x614] sm:$0xf]  ;;  %v3573_v22 = vor.u32 %v4114_v17, %v3570_v20  ;;  %v3434_v45 = vld [vmem:[%s6284_s1 + $0x698] sm:$0xf0] }
  0xfd   :  { %2407 = vmatpush.bf16.msrb.mxu1 %v3181_v49  ;;  %v4102_v49 = vld [vmem:[%s6284_s1 + $0x744] sm:$0xf]  ;;  %v4080_v38 = vld [vmem:[%s6284_s1 + $0x694] sm:$0xf] }
  0xfe   :  { %2420 = vmatpush.bf16.msrb.mxu2 %v3245_v50  ;;  %v3522_v50 = vld [vmem:[%s6284_s1 + $0x748] sm:$0xf0]  ;;  %v3437_v44 = vor.u32 %v4080_v38, %v3434_v45  ;;  %v3850_v38 = vld [vmem:[%s6284_s1 + $0x9d8] sm:$0xf0] }
  0xff   :  { %2433 = vmatpush.bf16.msrb.mxu3 %v3309_v54  ;;  %v3525_v58 = vor.u32 %v4102_v49, %v3522_v50  ;;  %v3426_v49 = vld [vmem:[%s6284_s1 + $0x688] sm:$0xf0]  ;;  %v4094_v50 = vld [vmem:[%s6284_s1 + $0x704] sm:$0xf] }
 0x100   :  { %2395 = vmatpush.bf16.msrb.mxu0 %v3109_v62  ;;  %v2189_v51 = vpop.f32.mrf.mxu0  ;;  %v3450_v62 = vld [vmem:[%s6284_s1 + $0x6b8] sm:$0xf0] }
 0x101   :  { %2408 = vmatpush.bf16.msrb.mxu1 %v3173_v2  ;;  %v2190_v54 = vadd.f32 %v2189_v51, %v5819_v43  ;;  %v2202_v56 = vpop.f32.mrf.mxu1  ;;  %v3589_v43 = vor.u32 %v4118_v52, %v3586_v53  ;;  %v3578_v2 = vld [vmem:[%s6284_s1 + $0x7b8] sm:$0xf0]  ;;  %v3453_v4 = vor.u32 %v4084_v11, %v3450_v62  ;;  %v3490_v52 = vld [vmem:[%s6284_s1 + $0x708] sm:$0xf0]  ;;  %v4110_v53 = vld [vmem:[%s6284_s1 + $0x784] sm:$0xf]  ;;  %v3429_v62 = vor.u32 %v4078_v48, %v3426_v49 }
 0x102   :  { %2421 = vmatpush.bf16.msrb.mxu2 %v3237_v3  ;;  %v3389_v3 = vor.u32 %v4068_v59, %v3386_v60  ;;  %v3738_v11 = vld [vmem:[%s6284_s1 + $0x8f8] sm:$0xf0]  ;;  %v3493_v63 = vor.u32 %v4094_v50, %v3490_v52  ;;  %v4132_v52 = vld [vmem:[%s6284_s1 + $0x834] sm:$0xf] }
 0x103   :  { %2434 = vmatpush.bf16.msrb.mxu3 %v3301_v6  ;;  %2396 = vmatmul.bf16.vlgmr.msrb.gmra.mxu0 %v4884_v24  ;;  %v4120_v24 = vld [vmem:[%s6284_s1 + $0x7d4] sm:$0xf]  ;;  %v2203_v61 = vadd.f32 %v2202_v56, %v2190_v54  ;;  %v4066_v6 = vld [vmem:[%s6284_s1 + $0x624] sm:$0xf]  ;;  %v3554_v54 = vld [vmem:[%s6284_s1 + $0x788] sm:$0xf0] }
 0x104   :  { %2440 = vmatpush.bf16.msra.mxu0 %v3421_v7  ;;  %2409 = vmatmul.bf16.vlgmr.msrb.gmra.mxu1 %v4901_v18  ;;  %v3394_v18 = vld [vmem:[%s6284_s1 + $0x648] sm:$0xf0]  ;;  %v4140_v56 = vld [vmem:[%s6284_s1 + $0x874] sm:$0xf] }
 0x105   :  { %2453 = vmatpush.bf16.msra.mxu1 %v3485_v8  ;;  %2422 = vmatmul.bf16.vlgmr.msrb.gmra.mxu2 %v4897_v28  ;;  %v4070_v28 = vld [vmem:[%s6284_s1 + $0x644] sm:$0xf]  ;;  %v3378_v7 = vld [vmem:[%s6284_s1 + $0x628] sm:$0xf0] }
 0x106   :  { %2466 = vmatpush.bf16.msra.mxu2 %v3549_v9  ;;  %2435 = vmatmul.bf16.vlgmr.msrb.gmra.mxu3 %v4911_v31  ;;  %v3597_v31 = vor.u32 %v4120_v24, %v3594_v46  ;;  %v3397_v55 = vor.u32 %v4070_v28, %v3394_v18  ;;  %v4082_v8 = vld [vmem:[%s6284_s1 + $0x6a4] sm:$0xf]  ;;  %v3581_v9 = vor.u32 %v4116_v1, %v3578_v2  ;;  %v4096_v24 = vld [vmem:[%s6284_s1 + $0x714] sm:$0xf]  ;;  %v3498_v46 = vld [vmem:[%s6284_s1 + $0x718] sm:$0xf0] }
 0x107   :  { %2479 = vmatpush.bf16.msra.mxu3 %v3613_v14  ;;  %v3506_v14 = vld [vmem:[%s6284_s1 + $0x728] sm:$0xf0]  ;;  %v3445_v19 = vor.u32 %v4082_v8, %v3442_v12  ;;  %v4062_v28 = vld [vmem:[%s6284_s1 + $0x604] sm:$0xf]  ;;  %v3866_v1 = vld [vmem:[%s6284_s1 + $0x9f8] sm:$0xf0]  ;;  %v3557_v2 = vor.u32 %v4110_v53, %v3554_v54 }
 0x108   :  { %2441 = vmatpush.bf16.msra.mxu0 %v3413_v42  ;;  %v2215_v10 = vpop.f32.mrf.mxu2  ;;  %v2191_v36 = vpop.f32.mrf.mxu0  ;;  %v3381_v42 = vor.u32 %v4066_v6, %v3378_v7  ;;  %v3509_v32 = vor.u32 %v4098_v13, %v3506_v14  ;;  %v3362_v18 = vld [vmem:[%s6284_s1 + $0x608] sm:$0xf0]  ;;  %v4138_v6 = vld [vmem:[%s6284_s1 + $0x864] sm:$0xf]  ;;  %v3642_v53 = vld [vmem:[%s6284_s1 + $0x838] sm:$0xf0] }
 0x109   :  { %2454 = vmatpush.bf16.msra.mxu1 %v3477_v23  ;;  %v2216_v35 = vadd.f32 %v2215_v10, %v2203_v61  ;;  %v2228_v15 = vpop.f32.mrf.mxu3  ;;  %v2204_v23 = vpop.f32.mrf.mxu1  ;;  %v3365_v60 = vor.u32 %v4062_v28, %v3362_v18  ;;  %v3802_v61 = vld [vmem:[%s6284_s1 + $0x978] sm:$0xf0]  ;;  %v3666_v7 = vld [vmem:[%s6284_s1 + $0x868] sm:$0xf0]  ;;  %v4154_v8 = vld [vmem:[%s6284_s1 + $0x8e4] sm:$0xf] }
 0x10a   :  { %2467 = vmatpush.bf16.msra.mxu2 %v3541_v27  ;;  %v3730_v10 = vld [vmem:[%s6284_s1 + $0x8e8] sm:$0xf0]  ;;  %v4170_v12 = vld [vmem:[%s6284_s1 + $0x964] sm:$0xf]  ;;  %v4136_v36 = vld [vmem:[%s6284_s1 + $0x854] sm:$0xf] }
 0x10b   :  { %2480 = vmatpush.bf16.msra.mxu3 %v3605_v34  ;;  %v6018_v27 = vadd.f32 %v2228_v15, %v2216_v35  ;;  %v3370_v34 = vld [vmem:[%s6284_s1 + $0x618] sm:$0xf0]  ;;  %v3794_v13 = vld [vmem:[%s6284_s1 + $0x968] sm:$0xf0]  ;;  %v4186_v14 = vld [vmem:[%s6284_s1 + $0x9e4] sm:$0xf]  ;;  %v3669_v15 = vor.u32 %v4138_v6, %v3666_v7  ;;  %v3733_v17 = vor.u32 %v4154_v8, %v3730_v10 }
 0x10c   :  { %2442 = vmatpush.bf16.msra.mxu0 %v3405_v47  ;;  %v4112_v47 = vld [vmem:[%s6284_s1 + $0x794] sm:$0xf]  ;;  %v3858_v35 = vld [vmem:[%s6284_s1 + $0x9e8] sm:$0xf0]  ;;  %v3797_v20 = vor.u32 %v4170_v12, %v3794_v13  ;;  %v4182_v18 = vld [vmem:[%s6284_s1 + $0x9c4] sm:$0xf] }
 0x10d   :  { %2455 = vmatpush.bf16.msra.mxu1 %v3469_v39  ;;  %v3562_v39 = vld [vmem:[%s6284_s1 + $0x798] sm:$0xf0]  ;;  %v4152_v23 = vld [vmem:[%s6284_s1 + $0x8d4] sm:$0xf]  ;;  %v4178_v8 = vld [vmem:[%s6284_s1 + $0x9a4] sm:$0xf] }
 0x10e   :  { %2468 = vmatpush.bf16.msra.mxu2 %v3533_v40  ;;  %v3373_v40 = vor.u32 %v4064_v21, %v3370_v34  ;;  %v3565_v51 = vor.u32 %v4112_v47, %v3562_v39  ;;  %v4168_v21 = vld [vmem:[%s6284_s1 + $0x954] sm:$0xf]  ;;  %v3786_v34 = vld [vmem:[%s6284_s1 + $0x958] sm:$0xf0]  ;;  %v3714_v47 = vld [vmem:[%s6284_s1 + $0x8c8] sm:$0xf0] }
 0x10f   :  { %2481 = vmatpush.bf16.msra.mxu3 %v3597_v31  ;;  %v3501_v31 = vor.u32 %v4096_v24, %v3498_v46  ;;  %v3789_v24 = vor.u32 %v4168_v21, %v3786_v34  ;;  %v4150_v46 = vld [vmem:[%s6284_s1 + $0x8c4] sm:$0xf]  ;;  %v4148_v54 = vld [vmem:[%s6284_s1 + $0x8b4] sm:$0xf]  ;;  %v3818_v34 = vld [vmem:[%s6284_s1 + $0x998] sm:$0xf0] }
 0x110   :  { %2443 = vmatpush.bf16.msra.mxu0 %v3397_v55  ;;  %v2217_v55 = vpop.f32.mrf.mxu2  ;;  %v4166_v39 = vld [vmem:[%s6284_s1 + $0x944] sm:$0xf]  ;;  %v3717_v50 = vor.u32 %v4150_v46, %v3714_v47  ;;  %v4176_v21 = vld [vmem:[%s6284_s1 + $0x994] sm:$0xf]  ;;  %v3682_v46 = vld [vmem:[%s6284_s1 + $0x888] sm:$0xf0] }
 0x111   :  { %2456 = vmatpush.bf16.msra.mxu1 %v3461_v57  ;;  %v3674_v57 = vld [vmem:[%s6284_s1 + $0x878] sm:$0xf0]  ;;  %v2230_v59 = vpop.f32.mrf.mxu3  ;;  %v3746_v47 = vld [vmem:[%s6284_s1 + $0x908] sm:$0xf0] }
 0x112   :  { %2469 = vmatpush.bf16.msra.mxu2 %v3525_v58  ;;  %v4156_v58 = vld [vmem:[%s6284_s1 + $0x8f4] sm:$0xf] }
 0x113   :  { %2482 = vmatpush.bf16.msra.mxu3 %v3589_v43  ;;  %v4172_v43 = vld [vmem:[%s6284_s1 + $0x974] sm:$0xf] }
 0x114   :  { %2444 = vmatpush.bf16.msra.mxu0 %v3389_v3  ;;  %v3677_v3 = vor.u32 %v4140_v56, %v3674_v57  ;;  %v3706_v56 = vld [vmem:[%s6284_s1 + $0x8b8] sm:$0xf0]  ;;  %v4164_v57 = vld [vmem:[%s6284_s1 + $0x934] sm:$0xf] }
 0x115   :  { %2457 = vmatpush.bf16.msra.mxu1 %v3453_v4  ;;  %v3741_v4 = vor.u32 %v4156_v58, %v3738_v11  ;;  %v3770_v58 = vld [vmem:[%s6284_s1 + $0x938] sm:$0xf0]  ;;  %v4180_v59 = vld [vmem:[%s6284_s1 + $0x9b4] sm:$0xf]  ;;  %v3645_v11 = vor.u32 %v4132_v52, %v3642_v53 }
 0x116   :  { %2470 = vmatpush.bf16.msra.mxu2 %v3517_v5  ;;  %v3805_v5 = vor.u32 %v4172_v43, %v3802_v61  ;;  %v3709_v43 = vor.u32 %v4148_v54, %v3706_v56  ;;  %v3773_v61 = vor.u32 %v4164_v57, %v3770_v58 }
 0x117   :  { %2483 = vmatpush.bf16.msra.mxu3 %v3581_v9  ;;  %v3869_v9 = vor.u32 %v4188_v0, %v3866_v1  ;;  %v4146_v0 = vld [vmem:[%s6284_s1 + $0x8a4] sm:$0xf] }
 0x118   :  { %2445 = vmatpush.bf16.msra.mxu0 %v3381_v42  ;;  %v3658_v42 = vld [vmem:[%s6284_s1 + $0x858] sm:$0xf0] }
 0x119   :  { %2458 = vmatpush.bf16.msra.mxu1 %v3445_v19  ;;  %v3861_v19 = vor.u32 %v4186_v14, %v3858_v35 }
 0x11a   :  { %2471 = vmatpush.bf16.msra.mxu2 %v3509_v32  ;;  %v3722_v32 = vld [vmem:[%s6284_s1 + $0x8d8] sm:$0xf0] }
 0x11b   :  { %2484 = vmatpush.bf16.msra.mxu3 %v3573_v22  ;;  %v3661_v22 = vor.u32 %v4136_v36, %v3658_v42  ;;  %v3725_v45 = vor.u32 %v4152_v23, %v3722_v32  ;;  %v4144_v36 = vld [vmem:[%s6284_s1 + $0x894] sm:$0xf]  ;;  %v3690_v23 = vld [vmem:[%s6284_s1 + $0x898] sm:$0xf0] }
 0x11c   :  { %2446 = vmatpush.bf16.msra.mxu0 %v3373_v40  ;;  %v3778_v40 = vld [vmem:[%s6284_s1 + $0x948] sm:$0xf0]  ;;  %v3754_v32 = vld [vmem:[%s6284_s1 + $0x918] sm:$0xf0] }
 0x11d   :  { %2459 = vmatpush.bf16.msra.mxu1 %v3437_v44  ;;  %v3842_v44 = vld [vmem:[%s6284_s1 + $0x9c8] sm:$0xf0] }
 0x11e   :  { %2472 = vmatpush.bf16.msra.mxu2 %v3501_v31 }
 0x11f   :  { %2485 = vmatpush.bf16.msra.mxu3 %v3565_v51  ;;  %v3781_v51 = vor.u32 %v4166_v39, %v3778_v40  ;;  %v4174_v40 = vld [vmem:[%s6284_s1 + $0x984] sm:$0xf] }
 0x120   :  { %2447 = vmatpush.bf16.msra.mxu0 %v3365_v60  ;;  %v2241_v28 = vpop.f32.mrf.mxu0  ;;  %v3834_v60 = vld [vmem:[%s6284_s1 + $0x9b8] sm:$0xf0] }
 0x121   :  { %2460 = vmatpush.bf16.msra.mxu1 %v3429_v62  ;;  %v2242_v31 = vadd.f32 %v2241_v28, %v6018_v27  ;;  %v2254_v49 = vpop.f32.mrf.mxu1  ;;  %v3845_v27 = vor.u32 %v4182_v18, %v3842_v44  ;;  %v4130_v62 = vld [vmem:[%s6284_s1 + $0x824] sm:$0xf]  ;;  %v3837_v1 = vor.u32 %v4180_v59, %v3834_v60  ;;  %v3810_v28 = vld [vmem:[%s6284_s1 + $0x988] sm:$0xf0] }
 0x122   :  { %2473 = vmatpush.bf16.msra.mxu2 %v3493_v63  ;;  %v3634_v63 = vld [vmem:[%s6284_s1 + $0x828] sm:$0xf0] }
 0x123   :  { %2486 = vmatpush.bf16.msra.mxu3 %v3557_v2  ;;  %2448 = vmatmul.bf16.vlgmr.msra.gmra.mxu0 %v5094_v16  ;;  %v4184_v16 = vld [vmem:[%s6284_s1 + $0x9d4] sm:$0xf]  ;;  %v2255_v55 = vadd.f32 %v2254_v49, %v2242_v31  ;;  %v3637_v12 = vor.u32 %v4130_v62, %v3634_v63  ;;  %v3813_v49 = vor.u32 %v4174_v40, %v3810_v28 }
 0x124   :  { %2492 = vmatpush.bf16.msrb.mxu0 %v3677_v3  ;;  %2461 = vmatmul.bf16.vlgmr.msra.gmra.mxu1 %v5107_v26  ;;  %v3650_v26 = vld [vmem:[%s6284_s1 + $0x848] sm:$0xf0] }
 0x125   :  { %2505 = vmatpush.bf16.msrb.mxu1 %v3741_v4  ;;  %2474 = vmatmul.bf16.vlgmr.msra.gmra.mxu2 %v5105_v25  ;;  %v4134_v25 = vld [vmem:[%s6284_s1 + $0x844] sm:$0xf]  ;;  %v3698_v3 = vld [vmem:[%s6284_s1 + $0x8a8] sm:$0xf0] }
 0x126   :  { %2518 = vmatpush.bf16.msrb.mxu2 %v3805_v5  ;;  %2487 = vmatmul.bf16.vlgmr.msra.gmra.mxu3 %v5115_v30  ;;  %v3853_v30 = vor.u32 %v4184_v16, %v3850_v38  ;;  %v3653_v48 = vor.u32 %v4134_v25, %v3650_v26  ;;  %v4162_v4 = vld [vmem:[%s6284_s1 + $0x924] sm:$0xf]  ;;  %v3762_v5 = vld [vmem:[%s6284_s1 + $0x928] sm:$0xf0]  ;;  %v3701_v35 = vor.u32 %v4146_v0, %v3698_v3 }
 0x127   :  { %2531 = vmatpush.bf16.msrb.mxu3 %v3869_v9  ;;  %v3826_v9 = vld [vmem:[%s6284_s1 + $0x9a8] sm:$0xf0]  ;;  %v3693_v38 = vor.u32 %v4144_v36, %v3690_v23  ;;  %v4142_v25 = vld [vmem:[%s6284_s1 + $0x884] sm:$0xf]  ;;  %v3821_v26 = vor.u32 %v4176_v21, %v3818_v34 }
 0x128   :  { %2493 = vmatpush.bf16.msrb.mxu0 %v3669_v15  ;;  %v2267_v2 = vpop.f32.mrf.mxu2  ;;  %v2243_v10 = vpop.f32.mrf.mxu0  ;;  %v3765_v15 = vor.u32 %v4162_v4, %v3762_v5  ;;  %v3829_v42 = vor.u32 %v4178_v8, %v3826_v9  ;;  %v3685_v31 = vor.u32 %v4142_v25, %v3682_v46 }
 0x129   :  { %2506 = vmatpush.bf16.msrb.mxu1 %v3733_v17  ;;  %v2268_v6 = vadd.f32 %v2267_v2, %v2255_v55  ;;  %v2280_v7 = vpop.f32.mrf.mxu3  ;;  %v2256_v13 = vpop.f32.mrf.mxu1  ;;  %v4128_v17 = vld [vmem:[%s6284_s1 + $0x814] sm:$0xf] }
 0x12a   :  { %2519 = vmatpush.bf16.msrb.mxu2 %v3797_v20  ;;  %v3626_v20 = vld [vmem:[%s6284_s1 + $0x818] sm:$0xf0] }
 0x12b   :  { %2532 = vmatpush.bf16.msrb.mxu3 %v3861_v19  ;;  %v6217_v14 = vadd.f32 %v2280_v7, %v2268_v6  ;;  %v4160_v19 = vld [vmem:[%s6284_s1 + $0x914] sm:$0xf]  ;;  %v3629_v16 = vor.u32 %v4128_v17, %v3626_v20 }
 0x12c   :  { %2494 = vmatpush.bf16.msrb.mxu0 %v3661_v22  ;;  %v3757_v22 = vor.u32 %v4160_v19, %v3754_v32 }
 0x12d   :  { %2507 = vmatpush.bf16.msrb.mxu1 %v3725_v45  ;;  %v4126_v45 = vld [vmem:[%s6284_s1 + $0x804] sm:$0xf]  ;;  %v2544_v28 = vmax.f32 %v6217_v14, 0.0 }
 0x12e   :  { %2520 = vmatpush.bf16.msrb.mxu2 %v3789_v24  ;;  %v3618_v24 = vld [vmem:[%s6284_s1 + $0x808] sm:$0xf0] }
 0x12f   :  { %2533 = vmatpush.bf16.msrb.mxu3 %v3853_v30  ;;  %v4158_v30 = vld [vmem:[%s6284_s1 + $0x904] sm:$0xf]  ;;  %v3621_v44 = vor.u32 %v4126_v45, %v3618_v24 }
 0x130   :  { %2495 = vmatpush.bf16.msrb.mxu0 %v3653_v48  ;;  %v2269_v39 = vpop.f32.mrf.mxu2  ;;  %v3749_v48 = vor.u32 %v4158_v30, %v3746_v47  ;;  %v2546_v47 = vld [vmem:[%s6288_s3] sm:$0x3] }
 0x131   :  { %2508 = vmatpush.bf16.msrb.mxu1 %v3717_v50  ;;  %v2282_v18 = vpop.f32.mrf.mxu3  ;;  %v4195_v50 = vld [vmem:[%s6286_s2] sm:$0x3] }
 0x132   :  { %2521 = vmatpush.bf16.msrb.mxu2 %v3781_v51  ;;  %v421_v51 = vperm.slane %v4195_v50, 1 }
 0x133   :  { %2534 = vmatpush.bf16.msrb.mxu3 %v3845_v27 }
 0x134   :  { %2496 = vmatpush.bf16.msrb.mxu0 %v3645_v11 }
 0x135   :  { %2509 = vmatpush.bf16.msrb.mxu1 %v3709_v43 }
 0x136   :  { %2522 = vmatpush.bf16.msrb.mxu2 %v3773_v61 }
 0x137   :  { %2535 = vmatpush.bf16.msrb.mxu3 %v3837_v1 }
 0x138   :  { %2497 = vmatpush.bf16.msrb.mxu0 %v3637_v12 }
 0x139   :  { %2510 = vmatpush.bf16.msrb.mxu1 %v3701_v35 }
 0x13a   :  { %2523 = vmatpush.bf16.msrb.mxu2 %v3765_v15 }
 0x13b   :  { %2536 = vmatpush.bf16.msrb.mxu3 %v3829_v42 }
 0x13c   :  { %2498 = vmatpush.bf16.msrb.mxu0 %v3629_v16  ;;  %v10_v16 = vstv %s6287_s4 }
 0x13d   :  { %2511 = vmatpush.bf16.msrb.mxu1 %v3693_v38  ;;  %11 = vst [vmem:[#allocation2] sm:$0x1] %v10_v16 }
 0x13e   :  { %2524 = vmatpush.bf16.msrb.mxu2 %v3757_v22 }
 0x13f   :  { %2537 = vmatpush.bf16.msrb.mxu3 %v3821_v26 }
 0x140   :  { %2499 = vmatpush.bf16.msrb.mxu0 %v3621_v44  ;;  %v2293_v52 = vpop.f32.mrf.mxu0 }
 0x141   :  { %2512 = vmatpush.bf16.msrb.mxu1 %v3685_v31  ;;  %v2294_v53 = vadd.f32 %v2293_v52, %v421_v51  ;;  %v2306_v54 = vpop.f32.mrf.mxu1  ;;  %v2549_v51 = vperm.slane %v2546_v47, 1 }
 0x142   :  { %2525 = vmatpush.bf16.msrb.mxu2 %v3749_v48  ;;  %v2548_v48 = vperm.slane %v2546_v47, 0 }
 0x143   :  { %2538 = vmatpush.bf16.msrb.mxu3 %v3813_v49  ;;  %2500 = vmatmul.bf16.vlgmr.msrb.gmra.mxu0 %v5298_v29  ;;  %v2307_v27 = vadd.f32 %v2306_v54, %v2294_v53 }
 0x144   :  { %2513 = vmatmul.bf16.vlgmr.msrb.gmra.mxu1 %v5311_v37  ;;  %v2552_v53 = vmul.f32 %v2548_v48, %v2544_v28 }
 0x145   :  { %2526 = vmatmul.bf16.vlgmr.msrb.gmra.mxu2 %v5309_v33 }
 0x146   :  { %2539 = vmatmul.bf16.vlgmr.msrb.gmra.mxu3 %v5319_v41 }
 0x148   :  { %v2319_v55 = vpop.f32.mrf.mxu2  ;;  %v2295_v29 = vpop.f32.mrf.mxu0 }
 0x149   :  { %v2320_v56 = vadd.f32 %v2319_v55, %v2307_v27  ;;  %v2332_v57 = vpop.f32.mrf.mxu3  ;;  %v2308_v59 = vpop.f32.mrf.mxu1  ;;  %v4190_v29 = vld [vmem:[#allocation2] ss:$0 sm:$0xff] }
 0x14b   :  { %v2333_v58 = vadd.f32 %v2332_v57, %v2320_v56  ;;  %v2555_v56 = vsel %vm2554_vm0, %v2552_v53, 0.0 }
 0x150   :  { %v2321_v37 = vpop.f32.mrf.mxu2 }
 0x151   :  { %v2334_v60 = vpop.f32.mrf.mxu3 }
 0x160   :  { %v2345_v33 = vpop.f32.mrf.mxu0 }
 0x161   :  { %v2346_v11 = vadd.f32 %v2345_v33, %v2333_v58  ;;  %v2358_v41 = vpop.f32.mrf.mxu1 }
 0x163   :  { %v2359_v43 = vadd.f32 %v2358_v41, %v2346_v11 }
 0x168   :  { %v2371_v61 = vpop.f32.mrf.mxu2  ;;  %v2347_v1 = vpop.f32.mrf.mxu0 }
 0x169   :  { %v2372_v62 = vadd.f32 %v2371_v61, %v2359_v43  ;;  %v2384_v63 = vpop.f32.mrf.mxu3  ;;  %v2360_v2 = vpop.f32.mrf.mxu1 }
 0x16b   :  { %v2385_v0 = vadd.f32 %v2384_v63, %v2372_v62 }
 0x170   :  { %v2373_v3 = vpop.f32.mrf.mxu2 }
 0x171   :  { %v2386_v4 = vpop.f32.mrf.mxu3 }
 0x180   :  { %v2397_v5 = vpop.f32.mrf.mxu0 }
 0x181   :  { %v2410_v6 = vpop.f32.mrf.mxu1  ;;  %v2398_v17 = vadd.f32 %v2397_v5, %v2385_v0 }
 0x183   :  { %v2411_v19 = vadd.f32 %v2410_v6, %v2398_v17 }
 0x188   :  { %v2423_v7 = vpop.f32.mrf.mxu2  ;;  %v2399_v9 = vpop.f32.mrf.mxu0 }
 0x189   :  { %v2436_v8 = vpop.f32.mrf.mxu3  ;;  %v2412_v10 = vpop.f32.mrf.mxu1  ;;  %v2424_v32 = vadd.f32 %v2423_v7, %v2411_v19 }
 0x18b   :  { %v2437_v38 = vadd.f32 %v2436_v8, %v2424_v32 }
 0x190   :  { %v2425_v12 = vpop.f32.mrf.mxu2 }
 0x191   :  { %v2438_v13 = vpop.f32.mrf.mxu3 }
 0x1a0   :  { %v2449_v35 = vpop.f32.mrf.mxu0 }
 0x1a1   :  { %v2462_v15 = vpop.f32.mrf.mxu1  ;;  %v2450_v22 = vadd.f32 %v2449_v35, %v2437_v38 }
 0x1a3   :  { %v2463_v45 = vadd.f32 %v2462_v15, %v2450_v22 }
 0x1a8   :  { %v2475_v20 = vpop.f32.mrf.mxu2  ;;  %v2451_v42 = vpop.f32.mrf.mxu0 }
 0x1a9   :  { %v2488_v36 = vpop.f32.mrf.mxu3  ;;  %v2464_v23 = vpop.f32.mrf.mxu1  ;;  %v2476_v24 = vadd.f32 %v2475_v20, %v2463_v45 }
 0x1ab   :  { %v2489_v25 = vadd.f32 %v2488_v36, %v2476_v24 }
 0x1b0   :  { %v2477_v21 = vpop.f32.mrf.mxu2 }
 0x1b1   :  { %v2490_v34 = vpop.f32.mrf.mxu3 }
 0x1c0   :  { %v2501_v26 = vpop.f32.mrf.mxu0 }
 0x1c1   :  { %v2514_v46 = vpop.f32.mrf.mxu1  ;;  %v2502_v30 = vadd.f32 %v2501_v26, %v2489_v25 }
 0x1c3   :  { %v2515_v39 = vadd.f32 %v2514_v46, %v2502_v30 }
 0x1c8   :  { %v2527_v40 = vpop.f32.mrf.mxu2  ;;  %v2503_v31 = vpop.f32.mrf.mxu0 }
 0x1c9   :  { %v2528_v18 = vadd.f32 %v2527_v40, %v2515_v39  ;;  %v2540_v44 = vpop.f32.mrf.mxu3  ;;  %v2516_v49 = vpop.f32.mrf.mxu1 }
 0x1cb   :  { %v2541_v50 = vadd.f32 %v2540_v44, %v2528_v18 }
 0x1cd   :  { %v2545_v52 = vmax.f32 %v2541_v50, 0.0 }
 0x1cf   :  { %v2553_v54 = vmul.f32 %v2549_v51, %v2545_v52 }
 0x1d0   :  { %v2529_v27 = vpop.f32.mrf.mxu2 }
 0x1d1   :  { %v2542_v55 = vpop.f32.mrf.mxu3  ;;  %v2556_v57 = vsel %vm2554_vm0, %v2553_v54, 0.0 }
 0x1d2   :  { %v2557_v58 = vadd.f32 %v2556_v57, %v2555_v56 }
 0x1d4   :  { %2558 = vadd.xlane.f32.xlu0 %v2557_v58 }
 0x247   :  { %v2559_v59 = vpop.xlane.xlu0 %2558 }
 0x248   :  { %v2564_v14 = vadd.f32 %v4190_v29, %v2559_v59 }
 0x24a   :  { %v2565_v37 = vsub.f32 0.0, %v2564_v14 }
 0x24c   :  { %v2566_v60 = vmul.f32 1.442695, %v2565_v37 }
 0x24e   :  { %4191 = vpow2.f32 %v2566_v60 }
 0x254   :  { %v4192_v33 = vpop.eup %4191 }
 0x255   :  { %v2568_v11 = vadd.f32 1.0, %v4192_v33 }
 0x257   :  { %4193 = vrcp.f32 %v2568_v11  ;;  %v2580_v62 = vand.u32 2147483648, %v2568_v11  ;;  %v2578_v0 = vand.u32 2147483647, %v2568_v11  ;;  %vm2574_vm2 = vweird.f32 %v2568_v11 }
 0x259   :  { %v2581_v2 = vor.u32 1.1754944e-38, %v2580_v62  ;;  %vm2579_vm5 = vcmp.eq.f32.partialorder %v2578_v0, 8.507059e+37 }
 0x25d   :  { %v4194_v41 = vpop.eup %4193 }
 0x25e   :  { %v2570_v43 = vmul.f32 %v4194_v41, %v2568_v11  ;;  %vm2575_vm1 = vweird.f32 %v4194_v41 }
 0x25f   :  { %vm2576_vm3 = vmor %vm2574_vm2, %vm2575_vm1 }
 0x260   :  { %v2571_v61 = vsub.f32 1.0, %v2570_v43 }
 0x262   :  { %v2572_v63 = vmul.f32 %v4194_v41, %v2571_v61 }
 0x264   :  { %v2573_v1 = vadd.f32 %v4194_v41, %v2572_v63 }
 0x266   :  { %v2577_v3 = vsel %vm2576_vm3, %v4194_v41, %v2573_v1 }
 0x267   :  { %v2582_v4 = vsel %vm2579_vm5, %v2581_v2, %v2577_v3 }
 0x268   :  { %2585 = vst.msk [vmem:[%s6289_s5] sm:$0x3] %vm2584_vm4, %v2582_v4 }

</bundles_post_ra>
